<compile_context>
chip_gen: v7x
topology: tpu7x:2x2x1
jax: 0.10.0
libtpu: 0.0.40
codegen_flags: <defaults>
</compile_context>

<pallas_src>
import functools

import numpy as np
import jax
import jax.numpy as jnp
from jax.experimental import pallas as pl
from jax.experimental.pallas import tpu as pltpu


RBF_GAMMA = 10.0   # RBF_Emb((np.arange(0, pi, 0.1), 10))


def _swish(x):
    return x * jax.nn.sigmoid(x)


def _relu(x):
    return jnp.maximum(x, 0.0)


def _acos(x):
    # TODO(synk): local_geometry_calc source not provided; arccos has no Mosaic
    # lowering, so use the Abramowitz-Stegun 4.4.45 polynomial (|err| < 2e-8).
    a = jnp.abs(x)
    p = jnp.float32(-0.0012624911)
    p = p * a + jnp.float32(0.0066700901)
    p = p * a - jnp.float32(0.0170881256)
    p = p * a + jnp.float32(0.0308918810)
    p = p * a - jnp.float32(0.0501743046)
    p = p * a + jnp.float32(0.0889789874)
    p = p * a - jnp.float32(0.2145988016)
    p = p * a + jnp.float32(1.5707963050)
    r = jnp.sqrt(jnp.maximum(1.0 - a, 0.0)) * p
    return jnp.where(x < 0.0, jnp.float32(np.pi) - r, r)


# ---------------------------------------------------------------------------
# Kernel bodies.  Everything is per batch element; pair tensors are flattened
# to (N*N, F) with row index r = i*N + j so every op is a 2-D matmul or a 2-D
# broadcast.  R1[r] = onehot(i), R2[r] = onehot(j), S = R1.T (sum over j).
# ---------------------------------------------------------------------------

def _embed_init_kernel(xh_ref, pos_ref, nm_ref, pmf_ref, r1_ref, r2_ref,
                       wxh_ref, bxh_ref, wd1_ref, bd1_ref, wd2_ref, bd2_ref,
                       wfa_ref, wfb_ref, wfc_ref, bf_ref,
                       xhe_ref, pair_ref):
    f32 = jnp.float32
    nm = nm_ref[0]                         # (N, 1)
    pmf = pmf_ref[0]                       # (N*N, 1)
    # xh embedding: relu(Linear(xh * nm)) * nm
    x = xh_ref[0] * nm
    xh = _relu(jnp.dot(x, wxh_ref[...], preferred_element_type=f32)
               + bxh_ref[...]) * nm        # (N, E)
    # pairwise squared distance (masked), computed in-kernel from pos
    pos = pos_ref[0]                       # (N, 3)
    pi = jnp.dot(r1_ref[...], pos, preferred_element_type=f32)   # (N*N, 3)
    pj = jnp.dot(r2_ref[...], pos, preferred_element_type=f32)
    d = pi - pj
    radial = jnp.sum(d * d, axis=1, keepdims=True) * pmf         # (N*N, 1)
    # DistEncoder surrogate (TODO(synk): source not provided): 2-layer swish
    # MLP; the K=1 first layer is a VPU broadcast multiply-add, not a matmul.
    h = _swish(radial * wd1_ref[...] + bd1_ref[...])              # (N*N, E)
    h = _swish(jnp.dot(h, wd2_ref[...], preferred_element_type=f32) + bd2_ref[...])
    # node_pair_fuse, decomposed: pm*(xh_j@Wa + xh_i@Wb) + de@Wc + b
    a = jnp.dot(xh, wfa_ref[...], preferred_element_type=f32)
    b = jnp.dot(xh, wfb_ref[...], preferred_element_type=f32)
    ab = (jnp.dot(r2_ref[...], a, preferred_element_type=f32)
          + jnp.dot(r1_ref[...], b, preferred_element_type=f32))
    pair0 = (pmf * ab + jnp.dot(h, wfc_ref[...], preferred_element_type=f32)
             + bf_ref[...]) * pmf
    xhe_ref[0] = xh
    pair_ref[0] = pair0


def _tri_kernel(pos_ref, post_ref, posr_ref, posc_ref, pmc_ref, pmr_ref,
                cen_ref, wr_ref, br_ref, out_ref, *, n_node):
    # Per (batch, centre-atom i): bond angles -> RBF -> projection -> relu ->
    # sum over k.  The O(N^3) angle / tri_emb values never leave VMEM.
    f32 = jnp.float32
    p = pos_ref[0]            # (N, 3)
    pt = post_ref[0]          # (3, N)
    ctr = posr_ref[0, 0]      # (1, 3)  pos of centre atom i
    ctr_t = posc_ref[0, 0]    # (3, 1)
    pmc = pmc_ref[0, 0]       # (N, 1)  pair_mask[b, i, :]
    pmr = pmr_ref[0, 0]       # (1, N)
    rel = p - ctr
    relt = pt - ctr_t
    r2c = jnp.sum(rel * rel, axis=1, keepdims=True)
    r2r = jnp.sum(relt * relt, axis=0, keepdims=True)
    u = rel * jax.lax.rsqrt(r2c + 1e-8)
    ut = relt * jax.lax.rsqrt(r2r + 1e-8)
    cosv = jnp.dot(u, ut, preferred_element_type=f32)             # (N, N) [j, k]
    ang = _acos(jnp.clip(cosv, -1.0 + 1e-6, 1.0 - 1e-6)) * pmc * pmr
    acc = jnp.zeros(out_ref.shape[1:], f32)                       # (N, E2)
    for k in range(n_node):   # static unroll over the third atom k
        a = ang[:, k:k + 1]                                       # (N, 1)
        rbf = jnp.exp(-RBF_GAMMA * (a - cen_ref[...]) ** 2)       # (N, C)
        acc = acc + _relu(jnp.dot(rbf, wr_ref[...], preferred_element_type=f32)
                          + br_ref[...])
    out_ref[0] = acc


def _layer_kernel(xh_ref, pair_ref, tri_ref, pos_ref, nm_ref, pmf_ref,
                  r1_ref, r2_ref, s_ref,
                  we1_ref, we2_ref, be_ref, wpc_ref, bp_ref,
                  wn1_ref, wn2_ref, bn_ref,
                  wfa_ref, wfb_ref, wfc_ref, bf_ref,
                  xho_ref, poso_ref, pairo_ref, *, emb_dim):
    # TODO(synk): InterBlock source not provided; same surrogate math as v1
    # (num_heads / dropout not reproduced), now fully fused with node_pair_fuse.
    f32 = jnp.float32
    xh = xh_ref[0]            # (N, E)
    pe = pair_ref[0]          # (N*N, E)   already pair-masked
    tf = tri_ref[0]           # (N*N, E2)
    pos = pos_ref[0]          # (N, 3)
    nm = nm_ref[0]            # (N, 1)
    pmf = pmf_ref[0]          # (N*N, 1)
    r1 = r1_ref[...]
    r2 = r2_ref[...]
    s = s_ref[...]
    # edge MLP (concat decomposed) -> messages
    msg = _swish(jnp.dot(pe, we1_ref[...], preferred_element_type=f32)
                 + jnp.dot(tf, we2_ref[...], preferred_element_type=f32)
                 + be_ref[...]) * pmf                               # (N*N, H)
    # one matmul for both the pair update and the coordinate weight
    pc = jnp.dot(msg, wpc_ref[...], preferred_element_type=f32)     # (N*N, E+1)
    cw = pc[:, emb_dim:emb_dim + 1] * pmf                            # (N*N, 1)
    # equivariant coord update: pos_i += nm_i * sum_j cw_ij * (pos_i - pos_j)
    pi = jnp.dot(r1, pos, preferred_element_type=f32)
    pj = jnp.dot(r2, pos, preferred_element_type=f32)
    delta = jnp.dot(s, cw * (pi - pj), preferred_element_type=f32)   # (N, 3)
    pos_new = pos + delta * nm
    # node update
    agg = jnp.dot(s, msg, preferred_element_type=f32)                # (N, H)
    xh_new = (xh + _relu(jnp.dot(xh, wn1_ref[...], preferred_element_type=f32)
                         + jnp.dot(agg, wn2_ref[...], preferred_element_type=f32)
                         + bn_ref[...])) * nm
    # pair update
    pair_new = (pe + _swish(pc[:, :emb_dim] + bp_ref[...])) * pmf
    # node_pair_fuse (decomposed) on the updated node embeddings
    a = jnp.dot(xh_new, wfa_ref[...], preferred_element_type=f32)
    b = jnp.dot(xh_new, wfb_ref[...], preferred_element_type=f32)
    ab = (jnp.dot(r2, a, preferred_element_type=f32)
          + jnp.dot(r1, b, preferred_element_type=f32))
    pair_fused = (pmf * ab
                  + jnp.dot(pair_new, wfc_ref[...], preferred_element_type=f32)
                  + bf_ref[...]) * pmf
    xho_ref[0] = xh_new
    poso_ref[0] = pos_new
    pairo_ref[0] = pair_fused


def _head_vel_kernel(xh_ref, pos_ref, pos0_ref, nm_ref,
                     w1_ref, b1_ref, w2_ref, b2_ref, w3_ref,
                     xho_ref, vel_ref):
    f32 = jnp.float32
    nm = nm_ref[0]
    # xh_embedding_out: Linear -> ReLU -> Linear -> ReLU -> Linear(no bias)
    h = _relu(jnp.dot(xh_ref[0], w1_ref[...], preferred_element_type=f32) + b1_ref[...])
    h = _relu(jnp.dot(h, w2_ref[...], preferred_element_type=f32) + b2_ref[...])
    xho_ref[0] = jnp.dot(h, w3_ref[...], preferred_element_type=f32) * nm
    # vel = remove_mean_with_mask(pos_new - pos0, node_mask)
    v = (pos_ref[0] - pos0_ref[0]) * nm
    cnt = jnp.maximum(jnp.sum(nm, axis=0, keepdims=True), 1.0)  # guard empty batch
    mean = jnp.sum(v, axis=0, keepdims=True) / cnt
    vel_ref[0] = v - mean * nm


# ---------------------------------------------------------------------------
# Parameter preparation (weight splits, bias reshapes, selector constants)
# ---------------------------------------------------------------------------

def _prepare_params(p, cfg, N):
    E = cfg["emb_dim"]
    E2 = E // 2
    kp = {}
    kp["w_xh"], kp["b_xh"] = p["w_xh"], p["b_xh"].reshape(1, -1)
    kp["w_d1"], kp["b_d1"] = p["w_d1"], p["b_d1"].reshape(1, -1)
    kp["w_d2"], kp["b_d2"] = p["w_d2"], p["b_d2"].reshape(1, -1)
    kp["w_fa"] = p["w_fuse"][0:E]          # multiplies xh_j
    kp["w_fb"] = p["w_fuse"][E:2 * E]      # multiplies xh_i
    kp["w_fc"] = p["w_fuse"][2 * E:3 * E]  # multiplies pair_emb
    kp["b_fuse"] = p["b_fuse"].reshape(1, -1)
    kp["centers"] = p["rbf_centers"].reshape(1, -1)
    kp["w_rbf"], kp["b_rbf"] = p["w_rbf"], p["b_rbf"].reshape(1, -1)
    layers = []
    for lp in p["layers"]:
        d = {}
        d["w_e1"] = lp["w_edge"][0:E]
        d["w_e2"] = lp["w_edge"][E:E + E2]
        d["b_edge"] = lp["b_edge"].reshape(1, -1)
        # fuse pair-update and coord-weight matrices: one (H, E+1) matmul
        d["w_pc"] = jnp.concatenate([lp["w_pair"], lp["w_coord"]], axis=1)
        d["b_pair"] = lp["b_pair"].reshape(1, -1)
        d["w_n1"] = lp["w_node"][0:E]
        d["w_n2"] = lp["w_node"][E:]
        d["b_node"] = lp["b_node"].reshape(1, -1)
        layers.append(d)
    kp["layers"] = layers
    kp["w_o1"], kp["b_o1"] = p["w_o1"], p["b_o1"].reshape(1, -1)
    kp["w_o2"], kp["b_o2"] = p["w_o2"], p["b_o2"].reshape(1, -1)
    kp["w_o3"] = p["w_o3"]
    # selector constants for the flattened pair index r = i*N + j
    eye = np.eye(N, dtype=np.float32)
    kp["R1"] = jnp.asarray(np.kron(eye, np.ones((N, 1), np.float32)))   # (N^2, N) -> i
    kp["R2"] = jnp.asarray(np.tile(eye, (N, 1)))                        # (N^2, N) -> j
    kp["S"] = jnp.asarray(np.kron(eye, np.ones((1, N), np.float32)))    # (N, N^2) sum_j
    return kp


# ---------------------------------------------------------------------------
# EquiGNN._forward
# ---------------------------------------------------------------------------

def equignn_forward(params, cfg, z_t, t, node_mask, pair_mask, context=None):
    node_nf = cfg["node_nf"]
    E = cfg["emb_dim"]
    E2 = E // 2
    B, N = z_t.shape[0], z_t.shape[1]
    atom_feat = node_nf + cfg["context_dim"] + 1

    kp = _prepare_params(params, cfg, N)

    pos0 = z_t[:, :, :3]
    xh = z_t[:, :, 3:]
    xh_time = jnp.full((B, N, 1), t, dtype=jnp.float32)
    xh_aug = jnp.concatenate([xh, xh_time], axis=2)
    if context is not None:
        xh_aug = jnp.concatenate([xh_aug, context], axis=2)

    pmf = pair_mask.reshape(B, N * N, 1)
    pos_t = jnp.transpose(pos0, (0, 2, 1))          # (B, 3, N)
    pos_r = pos0[:, :, None, :]                     # (B, N, 1, 3)
    pos_c = pos0[:, :, :, None]                     # (B, N, 3, 1)
    pm_t = jnp.transpose(pair_mask, (0, 1, 3, 2))   # (B, N, 1, N)

    par1 = pltpu.CompilerParams(dimension_semantics=("parallel",))
    par2 = pltpu.CompilerParams(dimension_semantics=("parallel", "parallel"))

    def full(a):
        return pl.BlockSpec(a.shape, lambda *_: (0,) * a.ndim)

    def perb(a):
        tail = a.shape[1:]
        return pl.BlockSpec((1,) + tail, lambda b, *_: (b,) + (0,) * len(tail))

    def perbi(a):
        tail = a.shape[2:]
        return pl.BlockSpec((1, 1) + tail, lambda b, i: (b, i) + (0,) * len(tail))

    # 1) node embedding + initial pair embedding (pair-dist + DistEncoder +
    #    node_pair_fuse) fused into one kernel.
    xh_emb, pair_emb = pl.pallas_call(
        _embed_init_kernel,
        grid=(B,),
        out_shape=(jax.ShapeDtypeStruct((B, N, E), jnp.float32),
                   jax.ShapeDtypeStruct((B, N * N, E), jnp.float32)),
        in_specs=[perb(xh_aug), perb(pos0), perb(node_mask), perb(pmf),
                  full(kp["R1"]), full(kp["R2"]),
                  full(kp["w_xh"]), full(kp["b_xh"]),
                  full(kp["w_d1"]), full(kp["b_d1"]),
                  full(kp["w_d2"]), full(kp["b_d2"]),
                  full(kp["w_fa"]), full(kp["w_fb"]), full(kp["w_fc"]),
                  full(kp["b_fuse"])],
        out_specs=(pl.BlockSpec((1, N, E), lambda b: (b, 0, 0)),
                   pl.BlockSpec((1, N * N, E), lambda b: (b, 0, 0))),
        compiler_params=par1,
    )(xh_aug, pos0, node_mask, pmf, kp["R1"], kp["R2"],
      kp["w_xh"], kp["b_xh"], kp["w_d1"], kp["b_d1"], kp["w_d2"], kp["b_d2"],
      kp["w_fa"], kp["w_fb"], kp["w_fc"], kp["b_fuse"])

    # 2) angles -> RBF -> projection -> sum_k, fused; loop-invariant so it is
    #    computed once before the layer loop (block_calc == False).
    tri_agg = pl.pallas_call(
        functools.partial(_tri_kernel, n_node=N),
        grid=(B, N),
        out_shape=jax.ShapeDtypeStruct((B, N * N, E2), jnp.float32),
        in_specs=[perb(pos0), perb(pos_t), perbi(pos_r), perbi(pos_c),
                  perbi(pair_mask), perbi(pm_t),
                  full(kp["centers"]), full(kp["w_rbf"]), full(kp["b_rbf"])],
        out_specs=pl.BlockSpec((1, N, E2), lambda b, i: (b, i, 0)),
        compiler_params=par2,
    )(pos0, pos_t, pos_r, pos_c, pair_mask, pm_t,
      kp["centers"], kp["w_rbf"], kp["b_rbf"])

    # 3) message-passing layers: one fused kernel per layer.
    pos = pos0
    for lp in kp["layers"]:
        xh_emb, pos, pair_emb = pl.pallas_call(
            functools.partial(_layer_kernel, emb_dim=E),
            grid=(B,),
            out_shape=(jax.ShapeDtypeStruct((B, N, E), jnp.float32),
                       jax.ShapeDtypeStruct((B, N, 3), jnp.float32),
                       jax.ShapeDtypeStruct((B, N * N, E), jnp.float32)),
            in_specs=[perb(xh_emb), perb(pair_emb), perb(tri_agg), perb(pos),
                      perb(node_mask), perb(pmf),
                      full(kp["R1"]), full(kp["R2"]), full(kp["S"]),
                      full(lp["w_e1"]), full(lp["w_e2"]), full(lp["b_edge"]),
                      full(lp["w_pc"]), full(lp["b_pair"]),
                      full(lp["w_n1"]), full(lp["w_n2"]), full(lp["b_node"]),
                      full(kp["w_fa"]), full(kp["w_fb"]), full(kp["w_fc"]),
                      full(kp["b_fuse"])],
            out_specs=(pl.BlockSpec((1, N, E), lambda b: (b, 0, 0)),
                       pl.BlockSpec((1, N, 3), lambda b: (b, 0, 0)),
                       pl.BlockSpec((1, N * N, E), lambda b: (b, 0, 0))),
            compiler_params=par1,
        )(xh_emb, pair_emb, tri_agg, pos, node_mask, pmf,
          kp["R1"], kp["R2"], kp["S"],
          lp["w_e1"], lp["w_e2"], lp["b_edge"], lp["w_pc"], lp["b_pair"],
          lp["w_n1"], lp["w_n2"], lp["b_node"],
          kp["w_fa"], kp["w_fb"], kp["w_fc"], kp["b_fuse"])

    # 4) output head + velocity (remove_mean_with_mask) fused.
    xh_out, vel = pl.pallas_call(
        _head_vel_kernel,
        grid=(B,),
        out_shape=(jax.ShapeDtypeStruct((B, N, atom_feat), jnp.float32),
                   jax.ShapeDtypeStruct((B, N, 3), jnp.float32)),
        in_specs=[perb(xh_emb), perb(pos), perb(pos0), perb(node_mask),
                  full(kp["w_o1"]), full(kp["b_o1"]),
                  full(kp["w_o2"]), full(kp["b_o2"]), full(kp["w_o3"])],
        out_specs=(pl.BlockSpec((1, N, atom_feat), lambda b: (b, 0, 0)),
                   pl.BlockSpec((1, N, 3), lambda b: (b, 0, 0))),
        compiler_params=par1,
    )(xh_emb, pos, pos0, node_mask,
      kp["w_o1"], kp["b_o1"], kp["w_o2"], kp["b_o2"], kp["w_o3"])

    return jnp.concatenate([vel, xh_out[:, :, :node_nf]], axis=2)


# ---------------------------------------------------------------------------
# Deterministic parameter init (shapes follow __init__)
# ---------------------------------------------------------------------------

def init_params(key, cfg):
    E, H = cfg["emb_dim"], cfg["hidden_dim"]
    node_nf = cfg["node_nf"]
    atom_feat = node_nf + cfg["context_dim"] + 1
    centers = jnp.asarray(np.arange(0.0, np.pi, 0.1), jnp.float32)   # RBF_Emb centers
    C = centers.shape[0]
    E2 = E // 2
    keys = iter(jax.random.split(key, 64))

    def lin(fin, fout, bias=True):
        w = jax.random.normal(next(keys), (fin, fout), jnp.float32) / np.sqrt(fin)
        b = 0.01 * jax.random.normal(next(keys), (fout,), jnp.float32) if bias else None
        return w, b

    p = {}
    p["w_xh"], p["b_xh"] = lin(atom_feat, E)          # xh_embedding
    p["w_d1"], p["b_d1"] = lin(1, E)                  # DistEncoder (TODO(synk) surrogate)
    p["w_d2"], p["b_d2"] = lin(E, E)
    p["w_fuse"], p["b_fuse"] = lin(3 * E, E)          # node_pair_fuse
    p["rbf_centers"] = centers
    p["w_rbf"], p["b_rbf"] = lin(C, E2)               # RBF_Emb projection
    layers = []
    for _ in range(cfg["num_layers"]):
        lp = {}
        lp["w_edge"], lp["b_edge"] = lin(E + E2, H)
        lp["w_coord"], _ = lin(H, 1, bias=False)
        lp["w_node"], lp["b_node"] = lin(E + H, E)
        lp["w_pair"], lp["b_pair"] = lin(H, E)
        layers.append(lp)
    p["layers"] = layers
    p["w_o1"], p["b_o1"] = lin(E, H)                  # xh_embedding_out
    p["w_o2"], p["b_o2"] = lin(H, E)
    p["w_o3"], _ = lin(E, atom_feat, bias=False)
    return p


# ---------------------------------------------------------------------------

if __name__ == "__main__":
    cfg = dict(
        num_layers=2, emb_dim=32, hidden_dim=64, num_heads=4, dropout=0.0,
        node_nf=6,            # x_class=4 + include_an=1 + include_de=1
        context_dim=0,        # context disabled
        add_time=False, block_calc=False,
    )

    key = jax.random.PRNGKey(0)
    k_p, k_z = jax.random.split(key)
    params = init_params(k_p, cfg)

    B, N = 2, 8
    z_t = jax.random.normal(k_z, (B, N, 3 + cfg["node_nf"]), jnp.float32)
    t = jnp.float32(0.5)

    node_mask = jnp.ones((B, N, 1), jnp.float32).at[1, N - 1].set(0.0)
    eye = jnp.eye(N, dtype=jnp.float32)
    pair_mask = (node_mask[:, :, None, :] * node_mask[:, None, :, :]) \
        * (1.0 - eye)[None, :, :, None]

    fwd = jax.jit(lambda p, z, tt, nm, pm: equignn_forward(p, cfg, z, tt, nm, pm))
    out = jax.block_until_ready(fwd(params, z_t, t, node_mask, pair_mask))

    assert out.shape == (B, N, 3 + cfg["node_nf"]), out.shape
    assert bool(jnp.all(jnp.isfinite(out)))
    print("KERNEL_OK")
</pallas_src>

<mosaic_0001>
module attributes {stable_mosaic.version = 11 : i64} {
  func.func @_embed_init_kernel(%arg0: i32, %arg1: memref<1x8x7xf32, #tpu.memory_space<vmem>>, %arg2: memref<1x8x3xf32, #tpu.memory_space<vmem>>, %arg3: memref<1x8x1xf32, #tpu.memory_space<vmem>>, %arg4: memref<1x64x1xf32, #tpu.memory_space<vmem>>, %arg5: memref<64x8xf32, #tpu.memory_space<vmem>>, %arg6: memref<64x8xf32, #tpu.memory_space<vmem>>, %arg7: memref<7x32xf32, #tpu.memory_space<vmem>>, %arg8: memref<1x32xf32, #tpu.memory_space<vmem>>, %arg9: memref<1x32xf32, #tpu.memory_space<vmem>>, %arg10: memref<1x32xf32, #tpu.memory_space<vmem>>, %arg11: memref<32x32xf32, #tpu.memory_space<vmem>>, %arg12: memref<1x32xf32, #tpu.memory_space<vmem>>, %arg13: memref<32x32xf32, #tpu.memory_space<vmem>>, %arg14: memref<32x32xf32, #tpu.memory_space<vmem>>, %arg15: memref<32x32xf32, #tpu.memory_space<vmem>>, %arg16: memref<1x32xf32, #tpu.memory_space<vmem>>, %arg17: memref<1x8x32xf32, #tpu.memory_space<vmem>>, %arg18: memref<1x64x32xf32, #tpu.memory_space<vmem>>) attributes {dimension_semantics = [#tpu.dimension_semantics<parallel>], iteration_bounds = array<i64: 2>, scalar_prefetch = 0 : i64, scratch_operands = 0 : i64, tpu.core_type = #tpu.core_type<tc>, window_params = [{transform_indices = @transform_0, window_bounds = array<i64: 1, 8, 7>}, {transform_indices = @transform_1, window_bounds = array<i64: 1, 8, 3>}, {transform_indices = @transform_2, window_bounds = array<i64: 1, 8, 1>}, {transform_indices = @transform_3, window_bounds = array<i64: 1, 64, 1>}, {pipeline_mode = #tpu.pipeline_mode<synchronous>, transform_indices = @transform_4, window_bounds = array<i64: 64, 8>}, {pipeline_mode = #tpu.pipeline_mode<synchronous>, transform_indices = @transform_5, window_bounds = array<i64: 64, 8>}, {pipeline_mode = #tpu.pipeline_mode<synchronous>, transform_indices = @transform_6, window_bounds = array<i64: 7, 32>}, {pipeline_mode = #tpu.pipeline_mode<synchronous>, transform_indices = @transform_7, window_bounds = array<i64: 1, 32>}, {pipeline_mode = #tpu.pipeline_mode<synchronous>, transform_indices = @transform_8, window_bounds = array<i64: 1, 32>}, {pipeline_mode = #tpu.pipeline_mode<synchronous>, transform_indices = @transform_9, window_bounds = array<i64: 1, 32>}, {pipeline_mode = #tpu.pipeline_mode<synchronous>, transform_indices = @transform_10, window_bounds = array<i64: 32, 32>}, {pipeline_mode = #tpu.pipeline_mode<synchronous>, transform_indices = @transform_11, window_bounds = array<i64: 1, 32>}, {pipeline_mode = #tpu.pipeline_mode<synchronous>, transform_indices = @transform_12, window_bounds = array<i64: 32, 32>}, {pipeline_mode = #tpu.pipeline_mode<synchronous>, transform_indices = @transform_13, window_bounds = array<i64: 32, 32>}, {pipeline_mode = #tpu.pipeline_mode<synchronous>, transform_indices = @transform_14, window_bounds = array<i64: 32, 32>}, {pipeline_mode = #tpu.pipeline_mode<synchronous>, transform_indices = @transform_15, window_bounds = array<i64: 1, 32>}, {transform_indices = @transform_16, window_bounds = array<i64: 1, 8, 32>}, {transform_indices = @transform_17, window_bounds = array<i64: 1, 64, 32>}]} {
    %c0 = arith.constant 0 : index
    %c0_0 = arith.constant 0 : index
    %c0_1 = arith.constant 0 : index
    %0 = vector.load %arg3[%c0, %c0_0, %c0_1] : memref<1x8x1xf32, #tpu.memory_space<vmem>>, vector<1x8x1xf32>
    %1 = vector.shape_cast %0 : vector<1x8x1xf32> to vector<8x1xf32>
    %c0_2 = arith.constant 0 : index
    %c0_3 = arith.constant 0 : index
    %c0_4 = arith.constant 0 : index
    %2 = vector.load %arg4[%c0_2, %c0_3, %c0_4] : memref<1x64x1xf32, #tpu.memory_space<vmem>>, vector<1x64x1xf32>
    %3 = vector.shape_cast %2 : vector<1x64x1xf32> to vector<64x1xf32>
    %c0_5 = arith.constant 0 : index
    %c0_6 = arith.constant 0 : index
    %c0_7 = arith.constant 0 : index
    %4 = vector.load %arg1[%c0_5, %c0_6, %c0_7] : memref<1x8x7xf32, #tpu.memory_space<vmem>>, vector<1x8x7xf32>
    %5 = vector.shape_cast %4 : vector<1x8x7xf32> to vector<8x7xf32>
    %6 = vector.broadcast %1 : vector<8x1xf32> to vector<8x7xf32>
    %7 = arith.mulf %5, %6 : vector<8x7xf32>
    %c0_8 = arith.constant 0 : index
    %c0_9 = arith.constant 0 : index
    %8 = vector.load %arg7[%c0_8, %c0_9] : memref<7x32xf32, #tpu.memory_space<vmem>>, vector<7x32xf32>
    %cst = arith.constant dense<0.000000e+00> : vector<8x32xf32>
    %9 = tpu.matmul %7, %8, %cst {dimension_numbers = #tpu.dot_dimension_numbers<[1], [0], [0], [1], [0, 0, 1, 1], [], []>} : vector<8x7xf32>, vector<7x32xf32>, vector<8x32xf32> -> vector<8x32xf32>
    %c0_10 = arith.constant 0 : index
    %c0_11 = arith.constant 0 : index
    %10 = vector.load %arg8[%c0_10, %c0_11] : memref<1x32xf32, #tpu.memory_space<vmem>>, vector<1x32xf32>
    %11 = vector.broadcast %10 : vector<1x32xf32> to vector<8x32xf32>
    %12 = arith.addf %9, %11 : vector<8x32xf32>
    %cst_12 = arith.constant 0.000000e+00 : f32
    %13 = vector.broadcast %cst_12 : f32 to vector<8x32xf32>
    %14 = arith.maximumf %12, %13 : vector<8x32xf32>
    %15 = vector.broadcast %1 : vector<8x1xf32> to vector<8x32xf32>
    %16 = arith.mulf %14, %15 : vector<8x32xf32>
    %c0_13 = arith.constant 0 : index
    %c0_14 = arith.constant 0 : index
    %c0_15 = arith.constant 0 : index
    %17 = vector.load %arg2[%c0_13, %c0_14, %c0_15] : memref<1x8x3xf32, #tpu.memory_space<vmem>>, vector<1x8x3xf32>
    %18 = vector.shape_cast %17 : vector<1x8x3xf32> to vector<8x3xf32>
    %c0_16 = arith.constant 0 : index
    %c0_17 = arith.constant 0 : index
    %19 = vector.load %arg5[%c0_16, %c0_17] : memref<64x8xf32, #tpu.memory_space<vmem>>, vector<64x8xf32>
    %cst_18 = arith.constant dense<0.000000e+00> : vector<64x3xf32>
    %20 = tpu.matmul %19, %18, %cst_18 {dimension_numbers = #tpu.dot_dimension_numbers<[1], [0], [0], [1], [0, 0, 1, 1], [], []>} : vector<64x8xf32>, vector<8x3xf32>, vector<64x3xf32> -> vector<64x3xf32>
    %c0_19 = arith.constant 0 : index
    %c0_20 = arith.constant 0 : index
    %21 = vector.load %arg6[%c0_19, %c0_20] : memref<64x8xf32, #tpu.memory_space<vmem>>, vector<64x8xf32>
    %cst_21 = arith.constant dense<0.000000e+00> : vector<64x3xf32>
    %22 = tpu.matmul %21, %18, %cst_21 {dimension_numbers = #tpu.dot_dimension_numbers<[1], [0], [0], [1], [0, 0, 1, 1], [], []>} : vector<64x8xf32>, vector<8x3xf32>, vector<64x3xf32> -> vector<64x3xf32>
    %23 = arith.subf %20, %22 : vector<64x3xf32>
    %24 = arith.mulf %23, %23 : vector<64x3xf32>
    %cst_22 = arith.constant dense<0.000000e+00> : vector<64xf32>
    %25 = vector.multi_reduction <add>, %24, %cst_22 [1] : vector<64x3xf32> to vector<64xf32>
    %26 = vector.shape_cast %25 : vector<64xf32> to vector<64x1xf32>
    %27 = arith.mulf %26, %3 : vector<64x1xf32>
    %c0_23 = arith.constant 0 : index
    %c0_24 = arith.constant 0 : index
    %28 = vector.load %arg9[%c0_23, %c0_24] : memref<1x32xf32, #tpu.memory_space<vmem>>, vector<1x32xf32>
    %29 = vector.broadcast %27 : vector<64x1xf32> to vector<64x32xf32>
    %30 = vector.broadcast %28 : vector<1x32xf32> to vector<64x32xf32>
    %31 = arith.mulf %29, %30 : vector<64x32xf32>
    %c0_25 = arith.constant 0 : index
    %c0_26 = arith.constant 0 : index
    %32 = vector.load %arg10[%c0_25, %c0_26] : memref<1x32xf32, #tpu.memory_space<vmem>>, vector<1x32xf32>
    %33 = vector.broadcast %32 : vector<1x32xf32> to vector<64x32xf32>
    %34 = arith.addf %31, %33 : vector<64x32xf32>
    %35 = arith.negf %34 : vector<64x32xf32>
    %36 = math.exp %35 : vector<64x32xf32>
    %cst_27 = arith.constant 1.000000e+00 : f32
    %37 = vector.broadcast %cst_27 : f32 to vector<64x32xf32>
    %38 = arith.addf %37, %36 : vector<64x32xf32>
    %39 = arith.divf %37, %38 : vector<64x32xf32>
    %40 = arith.mulf %34, %39 : vector<64x32xf32>
    %c0_28 = arith.constant 0 : index
    %c0_29 = arith.constant 0 : index
    %41 = vector.load %arg11[%c0_28, %c0_29] : memref<32x32xf32, #tpu.memory_space<vmem>>, vector<32x32xf32>
    %cst_30 = arith.constant dense<0.000000e+00> : vector<64x32xf32>
    %42 = tpu.matmul %40, %41, %cst_30 {dimension_numbers = #tpu.dot_dimension_numbers<[1], [0], [0], [1], [0, 0, 1, 1], [], []>} : vector<64x32xf32>, vector<32x32xf32>, vector<64x32xf32> -> vector<64x32xf32>
    %c0_31 = arith.constant 0 : index
    %c0_32 = arith.constant 0 : index
    %43 = vector.load %arg12[%c0_31, %c0_32] : memref<1x32xf32, #tpu.memory_space<vmem>>, vector<1x32xf32>
    %44 = vector.broadcast %43 : vector<1x32xf32> to vector<64x32xf32>
    %45 = arith.addf %42, %44 : vector<64x32xf32>
    %46 = arith.negf %45 : vector<64x32xf32>
    %47 = math.exp %46 : vector<64x32xf32>
    %cst_33 = arith.constant 1.000000e+00 : f32
    %48 = vector.broadcast %cst_33 : f32 to vector<64x32xf32>
    %49 = arith.addf %48, %47 : vector<64x32xf32>
    %50 = arith.divf %48, %49 : vector<64x32xf32>
    %51 = arith.mulf %45, %50 : vector<64x32xf32>
    %c0_34 = arith.constant 0 : index
    %c0_35 = arith.constant 0 : index
    %52 = vector.load %arg13[%c0_34, %c0_35] : memref<32x32xf32, #tpu.memory_space<vmem>>, vector<32x32xf32>
    %cst_36 = arith.constant dense<0.000000e+00> : vector<8x32xf32>
    %53 = tpu.matmul %16, %52, %cst_36 {dimension_numbers = #tpu.dot_dimension_numbers<[1], [0], [0], [1], [0, 0, 1, 1], [], []>} : vector<8x32xf32>, vector<32x32xf32>, vector<8x32xf32> -> vector<8x32xf32>
    %c0_37 = arith.constant 0 : index
    %c0_38 = arith.constant 0 : index
    %54 = vector.load %arg14[%c0_37, %c0_38] : memref<32x32xf32, #tpu.memory_space<vmem>>, vector<32x32xf32>
    %cst_39 = arith.constant dense<0.000000e+00> : vector<8x32xf32>
    %55 = tpu.matmul %16, %54, %cst_39 {dimension_numbers = #tpu.dot_dimension_numbers<[1], [0], [0], [1], [0, 0, 1, 1], [], []>} : vector<8x32xf32>, vector<32x32xf32>, vector<8x32xf32> -> vector<8x32xf32>
    %c0_40 = arith.constant 0 : index
    %c0_41 = arith.constant 0 : index
    %56 = vector.load %arg6[%c0_40, %c0_41] : memref<64x8xf32, #tpu.memory_space<vmem>>, vector<64x8xf32>
    %cst_42 = arith.constant dense<0.000000e+00> : vector<64x32xf32>
    %57 = tpu.matmul %56, %53, %cst_42 {dimension_numbers = #tpu.dot_dimension_numbers<[1], [0], [0], [1], [0, 0, 1, 1], [], []>} : vector<64x8xf32>, vector<8x32xf32>, vector<64x32xf32> -> vector<64x32xf32>
    %c0_43 = arith.constant 0 : index
    %c0_44 = arith.constant 0 : index
    %58 = vector.load %arg5[%c0_43, %c0_44] : memref<64x8xf32, #tpu.memory_space<vmem>>, vector<64x8xf32>
    %cst_45 = arith.constant dense<0.000000e+00> : vector<64x32xf32>
    %59 = tpu.matmul %58, %55, %cst_45 {dimension_numbers = #tpu.dot_dimension_numbers<[1], [0], [0], [1], [0, 0, 1, 1], [], []>} : vector<64x8xf32>, vector<8x32xf32>, vector<64x32xf32> -> vector<64x32xf32>
    %60 = arith.addf %57, %59 : vector<64x32xf32>
    %61 = vector.broadcast %3 : vector<64x1xf32> to vector<64x32xf32>
    %62 = arith.mulf %61, %60 : vector<64x32xf32>
    %c0_46 = arith.constant 0 : index
    %c0_47 = arith.constant 0 : index
    %63 = vector.load %arg15[%c0_46, %c0_47] : memref<32x32xf32, #tpu.memory_space<vmem>>, vector<32x32xf32>
    %cst_48 = arith.constant dense<0.000000e+00> : vector<64x32xf32>
    %64 = tpu.matmul %51, %63, %cst_48 {dimension_numbers = #tpu.dot_dimension_numbers<[1], [0], [0], [1], [0, 0, 1, 1], [], []>} : vector<64x32xf32>, vector<32x32xf32>, vector<64x32xf32> -> vector<64x32xf32>
    %65 = arith.addf %62, %64 : vector<64x32xf32>
    %c0_49 = arith.constant 0 : index
    %c0_50 = arith.constant 0 : index
    %66 = vector.load %arg16[%c0_49, %c0_50] : memref<1x32xf32, #tpu.memory_space<vmem>>, vector<1x32xf32>
    %67 = vector.broadcast %66 : vector<1x32xf32> to vector<64x32xf32>
    %68 = arith.addf %65, %67 : vector<64x32xf32>
    %69 = vector.broadcast %3 : vector<64x1xf32> to vector<64x32xf32>
    %70 = arith.mulf %68, %69 : vector<64x32xf32>
    %c0_51 = arith.constant 0 : index
    %c0_52 = arith.constant 0 : index
    %c0_53 = arith.constant 0 : index
    %71 = vector.load %arg17[%c0_51, %c0_52, %c0_53] : memref<1x8x32xf32, #tpu.memory_space<vmem>>, vector<1x8x32xf32>
    %72 = vector.shape_cast %71 : vector<1x8x32xf32> to vector<8x32xf32>
    %73 = vector.shape_cast %16 : vector<8x32xf32> to vector<1x8x32xf32>
    tpu.vector_store %arg17[%c0_51, %c0_52, %c0_53], %73 {strides = array<i32>} : memref<1x8x32xf32, #tpu.memory_space<vmem>>, vector<1x8x32xf32>,
    %c0_54 = arith.constant 0 : index
    %c0_55 = arith.constant 0 : index
    %c0_56 = arith.constant 0 : index
    %74 = vector.load %arg18[%c0_54, %c0_55, %c0_56] : memref<1x64x32xf32, #tpu.memory_space<vmem>>, vector<1x64x32xf32>
    %75 = vector.shape_cast %74 : vector<1x64x32xf32> to vector<64x32xf32>
    %76 = vector.shape_cast %70 : vector<64x32xf32> to vector<1x64x32xf32>
    tpu.vector_store %arg18[%c0_54, %c0_55, %c0_56], %76 {strides = array<i32>} : memref<1x64x32xf32, #tpu.memory_space<vmem>>, vector<1x64x32xf32>,
    return
  }
  func.func @transform_0(%arg0: i32) -> (i32, i32, i32) {
    %c0_i32 = arith.constant 0 : i32
    %c0_i32_0 = arith.constant 0 : i32
    %c0_i32_1 = arith.constant 0 : i32
    return %arg0, %c0_i32, %c0_i32_0 : i32, i32, i32
  }
  func.func @transform_1(%arg0: i32) -> (i32, i32, i32) {
    %c0_i32 = arith.constant 0 : i32
    %c0_i32_0 = arith.constant 0 : i32
    %c0_i32_1 = arith.constant 0 : i32
    return %arg0, %c0_i32, %c0_i32_0 : i32, i32, i32
  }
  func.func @transform_2(%arg0: i32) -> (i32, i32, i32) {
    %c0_i32 = arith.constant 0 : i32
    %c0_i32_0 = arith.constant 0 : i32
    %c0_i32_1 = arith.constant 0 : i32
    return %arg0, %c0_i32, %c0_i32_0 : i32, i32, i32
  }
  func.func @transform_3(%arg0: i32) -> (i32, i32, i32) {
    %c0_i32 = arith.constant 0 : i32
    %c0_i32_0 = arith.constant 0 : i32
    %c0_i32_1 = arith.constant 0 : i32
    return %arg0, %c0_i32, %c0_i32_0 : i32, i32, i32
  }
  func.func @transform_4(%arg0: i32) -> (i32, i32) {
    %c0_i32 = arith.constant 0 : i32
    %c0_i32_0 = arith.constant 0 : i32
    %c0_i32_1 = arith.constant 0 : i32
    return %c0_i32, %c0_i32_0 : i32, i32
  }
  func.func @transform_5(%arg0: i32) -> (i32, i32) {
    %c0_i32 = arith.constant 0 : i32
    %c0_i32_0 = arith.constant 0 : i32
    %c0_i32_1 = arith.constant 0 : i32
    return %c0_i32, %c0_i32_0 : i32, i32
  }
  func.func @transform_6(%arg0: i32) -> (i32, i32) {
    %c0_i32 = arith.constant 0 : i32
    %c0_i32_0 = arith.constant 0 : i32
    %c0_i32_1 = arith.constant 0 : i32
    return %c0_i32, %c0_i32_0 : i32, i32
  }
  func.func @transform_7(%arg0: i32) -> (i32, i32) {
    %c0_i32 = arith.constant 0 : i32
    %c0_i32_0 = arith.constant 0 : i32
    %c0_i32_1 = arith.constant 0 : i32
    return %c0_i32, %c0_i32_0 : i32, i32
  }
  func.func @transform_8(%arg0: i32) -> (i32, i32) {
    %c0_i32 = arith.constant 0 : i32
    %c0_i32_0 = arith.constant 0 : i32
    %c0_i32_1 = arith.constant 0 : i32
    return %c0_i32, %c0_i32_0 : i32, i32
  }
  func.func @transform_9(%arg0: i32) -> (i32, i32) {
    %c0_i32 = arith.constant 0 : i32
    %c0_i32_0 = arith.constant 0 : i32
    %c0_i32_1 = arith.constant 0 : i32
    return %c0_i32, %c0_i32_0 : i32, i32
  }
  func.func @transform_10(%arg0: i32) -> (i32, i32) {
    %c0_i32 = arith.constant 0 : i32
    %c0_i32_0 = arith.constant 0 : i32
    %c0_i32_1 = arith.constant 0 : i32
    return %c0_i32, %c0_i32_0 : i32, i32
  }
  func.func @transform_11(%arg0: i32) -> (i32, i32) {
    %c0_i32 = arith.constant 0 : i32
    %c0_i32_0 = arith.constant 0 : i32
    %c0_i32_1 = arith.constant 0 : i32
    return %c0_i32, %c0_i32_0 : i32, i32
  }
  func.func @transform_12(%arg0: i32) -> (i32, i32) {
    %c0_i32 = arith.constant 0 : i32
    %c0_i32_0 = arith.constant 0 : i32
    %c0_i32_1 = arith.constant 0 : i32
    return %c0_i32, %c0_i32_0 : i32, i32
  }
  func.func @transform_13(%arg0: i32) -> (i32, i32) {
    %c0_i32 = arith.constant 0 : i32
    %c0_i32_0 = arith.constant 0 : i32
    %c0_i32_1 = arith.constant 0 : i32
    return %c0_i32, %c0_i32_0 : i32, i32
  }
  func.func @transform_14(%arg0: i32) -> (i32, i32) {
    %c0_i32 = arith.constant 0 : i32
    %c0_i32_0 = arith.constant 0 : i32
    %c0_i32_1 = arith.constant 0 : i32
    return %c0_i32, %c0_i32_0 : i32, i32
  }
  func.func @transform_15(%arg0: i32) -> (i32, i32) {
    %c0_i32 = arith.constant 0 : i32
    %c0_i32_0 = arith.constant 0 : i32
    %c0_i32_1 = arith.constant 0 : i32
    return %c0_i32, %c0_i32_0 : i32, i32
  }
  func.func @transform_16(%arg0: i32) -> (i32, i32, i32) {
    %c0_i32 = arith.constant 0 : i32
    %c0_i32_0 = arith.constant 0 : i32
    %c0_i32_1 = arith.constant 0 : i32
    return %arg0, %c0_i32, %c0_i32_0 : i32, i32, i32
  }
  func.func @transform_17(%arg0: i32) -> (i32, i32, i32) {
    %c0_i32 = arith.constant 0 : i32
    %c0_i32_0 = arith.constant 0 : i32
    %c0_i32_1 = arith.constant 0 : i32
    return %arg0, %c0_i32, %c0_i32_0 : i32, i32, i32
  }
}

module attributes {stable_mosaic.version = 11 : i64} {
  func.func @_tri_kernel(%arg0: i32, %arg1: i32, %arg2: memref<1x8x3xf32, #tpu.memory_space<vmem>>, %arg3: memref<1x3x8xf32, #tpu.memory_space<vmem>>, %arg4: memref<1x1x1x3xf32, #tpu.memory_space<vmem>>, %arg5: memref<1x1x3x1xf32, #tpu.memory_space<vmem>>, %arg6: memref<1x1x8x1xf32, #tpu.memory_space<vmem>>, %arg7: memref<1x1x1x8xf32, #tpu.memory_space<vmem>>, %arg8: memref<1x32xf32, #tpu.memory_space<vmem>>, %arg9: memref<32x16xf32, #tpu.memory_space<vmem>>, %arg10: memref<1x16xf32, #tpu.memory_space<vmem>>, %arg11: memref<1x8x16xf32, #tpu.memory_space<vmem>>) attributes {dimension_semantics = [#tpu.dimension_semantics<parallel>, #tpu.dimension_semantics<parallel>], iteration_bounds = array<i64: 2, 8>, scalar_prefetch = 0 : i64, scratch_operands = 0 : i64, tpu.core_type = #tpu.core_type<tc>, window_params = [{transform_indices = @transform_0, window_bounds = array<i64: 1, 8, 3>}, {transform_indices = @transform_1, window_bounds = array<i64: 1, 3, 8>}, {transform_indices = @transform_2, window_bounds = array<i64: 1, 1, 1, 3>}, {transform_indices = @transform_3, window_bounds = array<i64: 1, 1, 3, 1>}, {transform_indices = @transform_4, window_bounds = array<i64: 1, 1, 8, 1>}, {transform_indices = @transform_5, window_bounds = array<i64: 1, 1, 1, 8>}, {pipeline_mode = #tpu.pipeline_mode<synchronous>, transform_indices = @transform_6, window_bounds = array<i64: 1, 32>}, {pipeline_mode = #tpu.pipeline_mode<synchronous>, transform_indices = @transform_7, window_bounds = array<i64: 32, 16>}, {pipeline_mode = #tpu.pipeline_mode<synchronous>, transform_indices = @transform_8, window_bounds = array<i64: 1, 16>}, {transform_indices = @transform_9, window_bounds = array<i64: 1, 8, 16>}]} {
    %c0 = arith.constant 0 : index
    %c0_0 = arith.constant 0 : index
    %c0_1 = arith.constant 0 : index
    %0 = vector.load %arg2[%c0, %c0_0, %c0_1] : memref<1x8x3xf32, #tpu.memory_space<vmem>>, vector<1x8x3xf32>
    %1 = vector.shape_cast %0 : vector<1x8x3xf32> to vector<8x3xf32>
    %c0_2 = arith.constant 0 : index
    %c0_3 = arith.constant 0 : index
    %c0_4 = arith.constant 0 : index
    %2 = vector.load %arg3[%c0_2, %c0_3, %c0_4] : memref<1x3x8xf32, #tpu.memory_space<vmem>>, vector<1x3x8xf32>
    %3 = vector.shape_cast %2 : vector<1x3x8xf32> to vector<3x8xf32>
    %c0_5 = arith.constant 0 : index
    %c0_6 = arith.constant 0 : index
    %c0_7 = arith.constant 0 : index
    %c0_8 = arith.constant 0 : index
    %4 = vector.load %arg4[%c0_5, %c0_6, %c0_7, %c0_8] : memref<1x1x1x3xf32, #tpu.memory_space<vmem>>, vector<1x1x1x3xf32>
    %5 = vector.shape_cast %4 : vector<1x1x1x3xf32> to vector<1x3xf32>
    %c0_9 = arith.constant 0 : index
    %c0_10 = arith.constant 0 : index
    %c0_11 = arith.constant 0 : index
    %c0_12 = arith.constant 0 : index
    %6 = vector.load %arg5[%c0_9, %c0_10, %c0_11, %c0_12] : memref<1x1x3x1xf32, #tpu.memory_space<vmem>>, vector<1x1x3x1xf32>
    %7 = vector.shape_cast %6 : vector<1x1x3x1xf32> to vector<3x1xf32>
    %c0_13 = arith.constant 0 : index
    %c0_14 = arith.constant 0 : index
    %c0_15 = arith.constant 0 : index
    %c0_16 = arith.constant 0 : index
    %8 = vector.load %arg6[%c0_13, %c0_14, %c0_15, %c0_16] : memref<1x1x8x1xf32, #tpu.memory_space<vmem>>, vector<1x1x8x1xf32>
    %9 = vector.shape_cast %8 : vector<1x1x8x1xf32> to vector<8x1xf32>
    %c0_17 = arith.constant 0 : index
    %c0_18 = arith.constant 0 : index
    %c0_19 = arith.constant 0 : index
    %c0_20 = arith.constant 0 : index
    %10 = vector.load %arg7[%c0_17, %c0_18, %c0_19, %c0_20] : memref<1x1x1x8xf32, #tpu.memory_space<vmem>>, vector<1x1x1x8xf32>
    %11 = vector.shape_cast %10 : vector<1x1x1x8xf32> to vector<1x8xf32>
    %12 = vector.broadcast %5 : vector<1x3xf32> to vector<8x3xf32>
    %13 = arith.subf %1, %12 : vector<8x3xf32>
    %14 = vector.broadcast %7 : vector<3x1xf32> to vector<3x8xf32>
    %15 = arith.subf %3, %14 : vector<3x8xf32>
    %16 = arith.mulf %13, %13 : vector<8x3xf32>
    %cst = arith.constant dense<0.000000e+00> : vector<8xf32>
    %17 = vector.multi_reduction <add>, %16, %cst [1] : vector<8x3xf32> to vector<8xf32>
    %18 = vector.shape_cast %17 : vector<8xf32> to vector<8x1xf32>
    %19 = arith.mulf %15, %15 : vector<3x8xf32>
    %cst_21 = arith.constant dense<0.000000e+00> : vector<8xf32>
    %20 = vector.multi_reduction <add>, %19, %cst_21 [0] : vector<3x8xf32> to vector<8xf32>
    %21 = vector.shape_cast %20 : vector<8xf32> to vector<1x8xf32>
    %cst_22 = arith.constant 9.99999993E-9 : f32
    %22 = vector.broadcast %cst_22 : f32 to vector<8x1xf32>
    %23 = arith.addf %18, %22 : vector<8x1xf32>
    %24 = math.rsqrt %23 : vector<8x1xf32>
    %25 = vector.broadcast %24 : vector<8x1xf32> to vector<8x3xf32>
    %26 = arith.mulf %13, %25 : vector<8x3xf32>
    %cst_23 = arith.constant 9.99999993E-9 : f32
    %27 = vector.broadcast %cst_23 : f32 to vector<1x8xf32>
    %28 = arith.addf %21, %27 : vector<1x8xf32>
    %29 = math.rsqrt %28 : vector<1x8xf32>
    %30 = vector.broadcast %29 : vector<1x8xf32> to vector<3x8xf32>
    %31 = arith.mulf %15, %30 : vector<3x8xf32>
    %cst_24 = arith.constant dense<0.000000e+00> : vector<8x8xf32>
    %32 = tpu.matmul %26, %31, %cst_24 {dimension_numbers = #tpu.dot_dimension_numbers<[1], [0], [0], [1], [0, 0, 1, 1], [], []>} : vector<8x3xf32>, vector<3x8xf32>, vector<8x8xf32> -> vector<8x8xf32>
    %cst_25 = arith.constant -0.999998986 : f32
    %cst_26 = arith.constant 0.999998986 : f32
    %33 = vector.broadcast %cst_25 : f32 to vector<8x8xf32>
    %34 = arith.maximumf %33, %32 : vector<8x8xf32>
    %35 = vector.broadcast %cst_26 : f32 to vector<8x8xf32>
    %36 = arith.minimumf %35, %34 : vector<8x8xf32>
    %37 = math.absf %36 : vector<8x8xf32>
    %cst_27 = arith.constant -0.0012624911 : f32
    %38 = vector.broadcast %cst_27 : f32 to vector<8x8xf32>
    %39 = arith.mulf %38, %37 : vector<8x8xf32>
    %cst_28 = arith.constant 6.670090e-03 : f32
    %40 = vector.broadcast %cst_28 : f32 to vector<8x8xf32>
    %41 = arith.addf %39, %40 : vector<8x8xf32>
    %42 = arith.mulf %41, %37 : vector<8x8xf32>
    %cst_29 = arith.constant 0.0170881264 : f32
    %43 = vector.broadcast %cst_29 : f32 to vector<8x8xf32>
    %44 = arith.subf %42, %43 : vector<8x8xf32>
    %45 = arith.mulf %44, %37 : vector<8x8xf32>
    %cst_30 = arith.constant 0.0308918804 : f32
    %46 = vector.broadcast %cst_30 : f32 to vector<8x8xf32>
    %47 = arith.addf %45, %46 : vector<8x8xf32>
    %48 = arith.mulf %47, %37 : vector<8x8xf32>
    %cst_31 = arith.constant 0.0501743034 : f32
    %49 = vector.broadcast %cst_31 : f32 to vector<8x8xf32>
    %50 = arith.subf %48, %49 : vector<8x8xf32>
    %51 = arith.mulf %50, %37 : vector<8x8xf32>
    %cst_32 = arith.constant 0.0889789909 : f32
    %52 = vector.broadcast %cst_32 : f32 to vector<8x8xf32>
    %53 = arith.addf %51, %52 : vector<8x8xf32>
    %54 = arith.mulf %53, %37 : vector<8x8xf32>
    %cst_33 = arith.constant 0.214598805 : f32
    %55 = vector.broadcast %cst_33 : f32 to vector<8x8xf32>
    %56 = arith.subf %54, %55 : vector<8x8xf32>
    %57 = arith.mulf %56, %37 : vector<8x8xf32>
    %cst_34 = arith.constant 1.57079625 : f32
    %58 = vector.broadcast %cst_34 : f32 to vector<8x8xf32>
    %59 = arith.addf %57, %58 : vector<8x8xf32>
    %cst_35 = arith.constant 1.000000e+00 : f32
    %60 = vector.broadcast %cst_35 : f32 to vector<8x8xf32>
    %61 = arith.subf %60, %37 : vector<8x8xf32>
    %cst_36 = arith.constant 0.000000e+00 : f32
    %62 = vector.broadcast %cst_36 : f32 to vector<8x8xf32>
    %63 = arith.maximumf %61, %62 : vector<8x8xf32>
    %64 = math.sqrt %63 : vector<8x8xf32>
    %65 = arith.mulf %64, %59 : vector<8x8xf32>
    %cst_37 = arith.constant 0.000000e+00 : f32
    %66 = vector.broadcast %cst_37 : f32 to vector<8x8xf32>
    %67 = arith.cmpf olt, %36, %66 : vector<8x8xf32>
    %cst_38 = arith.constant 3.14159274 : f32
    %68 = vector.broadcast %cst_38 : f32 to vector<8x8xf32>
    %69 = arith.subf %68, %65 : vector<8x8xf32>
    %70 = arith.select %67, %69, %65 : vector<8x8xi1>, vector<8x8xf32>
    %71 = vector.broadcast %9 : vector<8x1xf32> to vector<8x8xf32>
    %72 = arith.mulf %70, %71 : vector<8x8xf32>
    %73 = vector.broadcast %11 : vector<1x8xf32> to vector<8x8xf32>
    %74 = arith.mulf %72, %73 : vector<8x8xf32>
    %cst_39 = arith.constant 0.000000e+00 : f32
    %75 = vector.broadcast %cst_39 : f32 to vector<8x16xf32>
    %76 = vector.extract_strided_slice %74 {offsets = [0, 0], sizes = [8, 1], strides = [1, 1]} : vector<8x8xf32> to vector<8x1xf32>
    %c0_40 = arith.constant 0 : index
    %c0_41 = arith.constant 0 : index
    %77 = vector.load %arg8[%c0_40, %c0_41] : memref<1x32xf32, #tpu.memory_space<vmem>>, vector<1x32xf32>
    %78 = vector.broadcast %76 : vector<8x1xf32> to vector<8x32xf32>
    %79 = vector.broadcast %77 : vector<1x32xf32> to vector<8x32xf32>
    %80 = arith.subf %78, %79 : vector<8x32xf32>
    %81 = arith.mulf %80, %80 : vector<8x32xf32>
    %cst_42 = arith.constant -1.000000e+01 : f32
    %82 = vector.broadcast %cst_42 : f32 to vector<8x32xf32>
    %83 = arith.mulf %82, %81 : vector<8x32xf32>
    %84 = math.exp %83 : vector<8x32xf32>
    %c0_43 = arith.constant 0 : index
    %c0_44 = arith.constant 0 : index
    %85 = vector.load %arg9[%c0_43, %c0_44] : memref<32x16xf32, #tpu.memory_space<vmem>>, vector<32x16xf32>
    %cst_45 = arith.constant dense<0.000000e+00> : vector<8x16xf32>
    %86 = tpu.matmul %84, %85, %cst_45 {dimension_numbers = #tpu.dot_dimension_numbers<[1], [0], [0], [1], [0, 0, 1, 1], [], []>} : vector<8x32xf32>, vector<32x16xf32>, vector<8x16xf32> -> vector<8x16xf32>
    %c0_46 = arith.constant 0 : index
    %c0_47 = arith.constant 0 : index
    %87 = vector.load %arg10[%c0_46, %c0_47] : memref<1x16xf32, #tpu.memory_space<vmem>>, vector<1x16xf32>
    %88 = vector.broadcast %87 : vector<1x16xf32> to vector<8x16xf32>
    %89 = arith.addf %86, %88 : vector<8x16xf32>
    %cst_48 = arith.constant 0.000000e+00 : f32
    %90 = vector.broadcast %cst_48 : f32 to vector<8x16xf32>
    %91 = arith.maximumf %89, %90 : vector<8x16xf32>
    %92 = arith.addf %75, %91 : vector<8x16xf32>
    %93 = vector.extract_strided_slice %74 {offsets = [0, 1], sizes = [8, 1], strides = [1, 1]} : vector<8x8xf32> to vector<8x1xf32>
    %c0_49 = arith.constant 0 : index
    %c0_50 = arith.constant 0 : index
    %94 = vector.load %arg8[%c0_49, %c0_50] : memref<1x32xf32, #tpu.memory_space<vmem>>, vector<1x32xf32>
    %95 = vector.broadcast %93 : vector<8x1xf32> to vector<8x32xf32>
    %96 = vector.broadcast %94 : vector<1x32xf32> to vector<8x32xf32>
    %97 = arith.subf %95, %96 : vector<8x32xf32>
    %98 = arith.mulf %97, %97 : vector<8x32xf32>
    %cst_51 = arith.constant -1.000000e+01 : f32
    %99 = vector.broadcast %cst_51 : f32 to vector<8x32xf32>
    %100 = arith.mulf %99, %98 : vector<8x32xf32>
    %101 = math.exp %100 : vector<8x32xf32>
    %c0_52 = arith.constant 0 : index
    %c0_53 = arith.constant 0 : index
    %102 = vector.load %arg9[%c0_52, %c0_53] : memref<32x16xf32, #tpu.memory_space<vmem>>, vector<32x16xf32>
    %cst_54 = arith.constant dense<0.000000e+00> : vector<8x16xf32>
    %103 = tpu.matmul %101, %102, %cst_54 {dimension_numbers = #tpu.dot_dimension_numbers<[1], [0], [0], [1], [0, 0, 1, 1], [], []>} : vector<8x32xf32>, vector<32x16xf32>, vector<8x16xf32> -> vector<8x16xf32>
    %c0_55 = arith.constant 0 : index
    %c0_56 = arith.constant 0 : index
    %104 = vector.load %arg10[%c0_55, %c0_56] : memref<1x16xf32, #tpu.memory_space<vmem>>, vector<1x16xf32>
    %105 = vector.broadcast %104 : vector<1x16xf32> to vector<8x16xf32>
    %106 = arith.addf %103, %105 : vector<8x16xf32>
    %cst_57 = arith.constant 0.000000e+00 : f32
    %107 = vector.broadcast %cst_57 : f32 to vector<8x16xf32>
    %108 = arith.maximumf %106, %107 : vector<8x16xf32>
    %109 = arith.addf %92, %108 : vector<8x16xf32>
    %110 = vector.extract_strided_slice %74 {offsets = [0, 2], sizes = [8, 1], strides = [1, 1]} : vector<8x8xf32> to vector<8x1xf32>
    %c0_58 = arith.constant 0 : index
    %c0_59 = arith.constant 0 : index
    %111 = vector.load %arg8[%c0_58, %c0_59] : memref<1x32xf32, #tpu.memory_space<vmem>>, vector<1x32xf32>
    %112 = vector.broadcast %110 : vector<8x1xf32> to vector<8x32xf32>
    %113 = vector.broadcast %111 : vector<1x32xf32> to vector<8x32xf32>
    %114 = arith.subf %112, %113 : vector<8x32xf32>
    %115 = arith.mulf %114, %114 : vector<8x32xf32>
    %cst_60 = arith.constant -1.000000e+01 : f32
    %116 = vector.broadcast %cst_60 : f32 to vector<8x32xf32>
    %117 = arith.mulf %116, %115 : vector<8x32xf32>
    %118 = math.exp %117 : vector<8x32xf32>
    %c0_61 = arith.constant 0 : index
    %c0_62 = arith.constant 0 : index
    %119 = vector.load %arg9[%c0_61, %c0_62] : memref<32x16xf32, #tpu.memory_space<vmem>>, vector<32x16xf32>
    %cst_63 = arith.constant dense<0.000000e+00> : vector<8x16xf32>
    %120 = tpu.matmul %118, %119, %cst_63 {dimension_numbers = #tpu.dot_dimension_numbers<[1], [0], [0], [1], [0, 0, 1, 1], [], []>} : vector<8x32xf32>, vector<32x16xf32>, vector<8x16xf32> -> vector<8x16xf32>
    %c0_64 = arith.constant 0 : index
    %c0_65 = arith.constant 0 : index
    %121 = vector.load %arg10[%c0_64, %c0_65] : memref<1x16xf32, #tpu.memory_space<vmem>>, vector<1x16xf32>
    %122 = vector.broadcast %121 : vector<1x16xf32> to vector<8x16xf32>
    %123 = arith.addf %120, %122 : vector<8x16xf32>
    %cst_66 = arith.constant 0.000000e+00 : f32
    %124 = vector.broadcast %cst_66 : f32 to vector<8x16xf32>
    %125 = arith.maximumf %123, %124 : vector<8x16xf32>
    %126 = arith.addf %109, %125 : vector<8x16xf32>
    %127 = vector.extract_strided_slice %74 {offsets = [0, 3], sizes = [8, 1], strides = [1, 1]} : vector<8x8xf32> to vector<8x1xf32>
    %c0_67 = arith.constant 0 : index
    %c0_68 = arith.constant 0 : index
    %128 = vector.load %arg8[%c0_67, %c0_68] : memref<1x32xf32, #tpu.memory_space<vmem>>, vector<1x32xf32>
    %129 = vector.broadcast %127 : vector<8x1xf32> to vector<8x32xf32>
    %130 = vector.broadcast %128 : vector<1x32xf32> to vector<8x32xf32>
    %131 = arith.subf %129, %130 : vector<8x32xf32>
    %132 = arith.mulf %131, %131 : vector<8x32xf32>
    %cst_69 = arith.constant -1.000000e+01 : f32
    %133 = vector.broadcast %cst_69 : f32 to vector<8x32xf32>
    %134 = arith.mulf %133, %132 : vector<8x32xf32>
    %135 = math.exp %134 : vector<8x32xf32>
    %c0_70 = arith.constant 0 : index
    %c0_71 = arith.constant 0 : index
    %136 = vector.load %arg9[%c0_70, %c0_71] : memref<32x16xf32, #tpu.memory_space<vmem>>, vector<32x16xf32>
    %cst_72 = arith.constant dense<0.000000e+00> : vector<8x16xf32>
    %137 = tpu.matmul %135, %136, %cst_72 {dimension_numbers = #tpu.dot_dimension_numbers<[1], [0], [0], [1], [0, 0, 1, 1], [], []>} : vector<8x32xf32>, vector<32x16xf32>, vector<8x16xf32> -> vector<8x16xf32>
    %c0_73 = arith.constant 0 : index
    %c0_74 = arith.constant 0 : index
    %138 = vector.load %arg10[%c0_73, %c0_74] : memref<1x16xf32, #tpu.memory_space<vmem>>, vector<1x16xf32>
    %139 = vector.broadcast %138 : vector<1x16xf32> to vector<8x16xf32>
    %140 = arith.addf %137, %139 : vector<8x16xf32>
    %cst_75 = arith.constant 0.000000e+00 : f32
    %141 = vector.broadcast %cst_75 : f32 to vector<8x16xf32>
    %142 = arith.maximumf %140, %141 : vector<8x16xf32>
    %143 = arith.addf %126, %142 : vector<8x16xf32>
    %144 = vector.extract_strided_slice %74 {offsets = [0, 4], sizes = [8, 1], strides = [1, 1]} : vector<8x8xf32> to vector<8x1xf32>
    %c0_76 = arith.constant 0 : index
    %c0_77 = arith.constant 0 : index
    %145 = vector.load %arg8[%c0_76, %c0_77] : memref<1x32xf32, #tpu.memory_space<vmem>>, vector<1x32xf32>
    %146 = vector.broadcast %144 : vector<8x1xf32> to vector<8x32xf32>
    %147 = vector.broadcast %145 : vector<1x32xf32> to vector<8x32xf32>
    %148 = arith.subf %146, %147 : vector<8x32xf32>
    %149 = arith.mulf %148, %148 : vector<8x32xf32>
    %cst_78 = arith.constant -1.000000e+01 : f32
    %150 = vector.broadcast %cst_78 : f32 to vector<8x32xf32>
    %151 = arith.mulf %150, %149 : vector<8x32xf32>
    %152 = math.exp %151 : vector<8x32xf32>
    %c0_79 = arith.constant 0 : index
    %c0_80 = arith.constant 0 : index
    %153 = vector.load %arg9[%c0_79, %c0_80] : memref<32x16xf32, #tpu.memory_space<vmem>>, vector<32x16xf32>
    %cst_81 = arith.constant dense<0.000000e+00> : vector<8x16xf32>
    %154 = tpu.matmul %152, %153, %cst_81 {dimension_numbers = #tpu.dot_dimension_numbers<[1], [0], [0], [1], [0, 0, 1, 1], [], []>} : vector<8x32xf32>, vector<32x16xf32>, vector<8x16xf32> -> vector<8x16xf32>
    %c0_82 = arith.constant 0 : index
    %c0_83 = arith.constant 0 : index
    %155 = vector.load %arg10[%c0_82, %c0_83] : memref<1x16xf32, #tpu.memory_space<vmem>>, vector<1x16xf32>
    %156 = vector.broadcast %155 : vector<1x16xf32> to vector<8x16xf32>
    %157 = arith.addf %154, %156 : vector<8x16xf32>
    %cst_84 = arith.constant 0.000000e+00 : f32
    %158 = vector.broadcast %cst_84 : f32 to vector<8x16xf32>
    %159 = arith.maximumf %157, %158 : vector<8x16xf32>
    %160 = arith.addf %143, %159 : vector<8x16xf32>
    %161 = vector.extract_strided_slice %74 {offsets = [0, 5], sizes = [8, 1], strides = [1, 1]} : vector<8x8xf32> to vector<8x1xf32>
    %c0_85 = arith.constant 0 : index
    %c0_86 = arith.constant 0 : index
    %162 = vector.load %arg8[%c0_85, %c0_86] : memref<1x32xf32, #tpu.memory_space<vmem>>, vector<1x32xf32>
    %163 = vector.broadcast %161 : vector<8x1xf32> to vector<8x32xf32>
    %164 = vector.broadcast %162 : vector<1x32xf32> to vector<8x32xf32>
    %165 = arith.subf %163, %164 : vector<8x32xf32>
    %166 = arith.mulf %165, %165 : vector<8x32xf32>
    %cst_87 = arith.constant -1.000000e+01 : f32
    %167 = vector.broadcast %cst_87 : f32 to vector<8x32xf32>
    %168 = arith.mulf %167, %166 : vector<8x32xf32>
    %169 = math.exp %168 : vector<8x32xf32>
    %c0_88 = arith.constant 0 : index
    %c0_89 = arith.constant 0 : index
    %170 = vector.load %arg9[%c0_88, %c0_89] : memref<32x16xf32, #tpu.memory_space<vmem>>, vector<32x16xf32>
    %cst_90 = arith.constant dense<0.000000e+00> : vector<8x16xf32>
    %171 = tpu.matmul %169, %170, %cst_90 {dimension_numbers = #tpu.dot_dimension_numbers<[1], [0], [0], [1], [0, 0, 1, 1], [], []>} : vector<8x32xf32>, vector<32x16xf32>, vector<8x16xf32> -> vector<8x16xf32>
    %c0_91 = arith.constant 0 : index
    %c0_92 = arith.constant 0 : index
    %172 = vector.load %arg10[%c0_91, %c0_92] : memref<1x16xf32, #tpu.memory_space<vmem>>, vector<1x16xf32>
    %173 = vector.broadcast %172 : vector<1x16xf32> to vector<8x16xf32>
    %174 = arith.addf %171, %173 : vector<8x16xf32>
    %cst_93 = arith.constant 0.000000e+00 : f32
    %175 = vector.broadcast %cst_93 : f32 to vector<8x16xf32>
    %176 = arith.maximumf %174, %175 : vector<8x16xf32>
    %177 = arith.addf %160, %176 : vector<8x16xf32>
    %178 = vector.extract_strided_slice %74 {offsets = [0, 6], sizes = [8, 1], strides = [1, 1]} : vector<8x8xf32> to vector<8x1xf32>
    %c0_94 = arith.constant 0 : index
    %c0_95 = arith.constant 0 : index
    %179 = vector.load %arg8[%c0_94, %c0_95] : memref<1x32xf32, #tpu.memory_space<vmem>>, vector<1x32xf32>
    %180 = vector.broadcast %178 : vector<8x1xf32> to vector<8x32xf32>
    %181 = vector.broadcast %179 : vector<1x32xf32> to vector<8x32xf32>
    %182 = arith.subf %180, %181 : vector<8x32xf32>
    %183 = arith.mulf %182, %182 : vector<8x32xf32>
    %cst_96 = arith.constant -1.000000e+01 : f32
    %184 = vector.broadcast %cst_96 : f32 to vector<8x32xf32>
    %185 = arith.mulf %184, %183 : vector<8x32xf32>
    %186 = math.exp %185 : vector<8x32xf32>
    %c0_97 = arith.constant 0 : index
    %c0_98 = arith.constant 0 : index
    %187 = vector.load %arg9[%c0_97, %c0_98] : memref<32x16xf32, #tpu.memory_space<vmem>>, vector<32x16xf32>
    %cst_99 = arith.constant dense<0.000000e+00> : vector<8x16xf32>
    %188 = tpu.matmul %186, %187, %cst_99 {dimension_numbers = #tpu.dot_dimension_numbers<[1], [0], [0], [1], [0, 0, 1, 1], [], []>} : vector<8x32xf32>, vector<32x16xf32>, vector<8x16xf32> -> vector<8x16xf32>
    %c0_100 = arith.constant 0 : index
    %c0_101 = arith.constant 0 : index
    %189 = vector.load %arg10[%c0_100, %c0_101] : memref<1x16xf32, #tpu.memory_space<vmem>>, vector<1x16xf32>
    %190 = vector.broadcast %189 : vector<1x16xf32> to vector<8x16xf32>
    %191 = arith.addf %188, %190 : vector<8x16xf32>
    %cst_102 = arith.constant 0.000000e+00 : f32
    %192 = vector.broadcast %cst_102 : f32 to vector<8x16xf32>
    %193 = arith.maximumf %191, %192 : vector<8x16xf32>
    %194 = arith.addf %177, %193 : vector<8x16xf32>
    %195 = vector.extract_strided_slice %74 {offsets = [0, 7], sizes = [8, 1], strides = [1, 1]} : vector<8x8xf32> to vector<8x1xf32>
    %c0_103 = arith.constant 0 : index
    %c0_104 = arith.constant 0 : index
    %196 = vector.load %arg8[%c0_103, %c0_104] : memref<1x32xf32, #tpu.memory_space<vmem>>, vector<1x32xf32>
    %197 = vector.broadcast %195 : vector<8x1xf32> to vector<8x32xf32>
    %198 = vector.broadcast %196 : vector<1x32xf32> to vector<8x32xf32>
    %199 = arith.subf %197, %198 : vector<8x32xf32>
    %200 = arith.mulf %199, %199 : vector<8x32xf32>
    %cst_105 = arith.constant -1.000000e+01 : f32
    %201 = vector.broadcast %cst_105 : f32 to vector<8x32xf32>
    %202 = arith.mulf %201, %200 : vector<8x32xf32>
    %203 = math.exp %202 : vector<8x32xf32>
    %c0_106 = arith.constant 0 : index
    %c0_107 = arith.constant 0 : index
    %204 = vector.load %arg9[%c0_106, %c0_107] : memref<32x16xf32, #tpu.memory_space<vmem>>, vector<32x16xf32>
    %cst_108 = arith.constant dense<0.000000e+00> : vector<8x16xf32>
    %205 = tpu.matmul %203, %204, %cst_108 {dimension_numbers = #tpu.dot_dimension_numbers<[1], [0], [0], [1], [0, 0, 1, 1], [], []>} : vector<8x32xf32>, vector<32x16xf32>, vector<8x16xf32> -> vector<8x16xf32>
    %c0_109 = arith.constant 0 : index
    %c0_110 = arith.constant 0 : index
    %206 = vector.load %arg10[%c0_109, %c0_110] : memref<1x16xf32, #tpu.memory_space<vmem>>, vector<1x16xf32>
    %207 = vector.broadcast %206 : vector<1x16xf32> to vector<8x16xf32>
    %208 = arith.addf %205, %207 : vector<8x16xf32>
    %cst_111 = arith.constant 0.000000e+00 : f32
    %209 = vector.broadcast %cst_111 : f32 to vector<8x16xf32>
    %210 = arith.maximumf %208, %209 : vector<8x16xf32>
    %211 = arith.addf %194, %210 : vector<8x16xf32>
    %c0_112 = arith.constant 0 : index
    %c0_113 = arith.constant 0 : index
    %c0_114 = arith.constant 0 : index
    %212 = vector.load %arg11[%c0_112, %c0_113, %c0_114] : memref<1x8x16xf32, #tpu.memory_space<vmem>>, vector<1x8x16xf32>
    %213 = vector.shape_cast %212 : vector<1x8x16xf32> to vector<8x16xf32>
    %214 = vector.shape_cast %211 : vector<8x16xf32> to vector<1x8x16xf32>
    tpu.vector_store %arg11[%c0_112, %c0_113, %c0_114], %214 {strides = array<i32>} : memref<1x8x16xf32, #tpu.memory_space<vmem>>, vector<1x8x16xf32>,
    return
  }
  func.func @transform_0(%arg0: i32, %arg1: i32) -> (i32, i32, i32) {
    %c0_i32 = arith.constant 0 : i32
    %c0_i32_0 = arith.constant 0 : i32
    %c0_i32_1 = arith.constant 0 : i32
    return %arg0, %c0_i32, %c0_i32_0 : i32, i32, i32
  }
  func.func @transform_1(%arg0: i32, %arg1: i32) -> (i32, i32, i32) {
    %c0_i32 = arith.constant 0 : i32
    %c0_i32_0 = arith.constant 0 : i32
    %c0_i32_1 = arith.constant 0 : i32
    return %arg0, %c0_i32, %c0_i32_0 : i32, i32, i32
  }
  func.func @transform_2(%arg0: i32, %arg1: i32) -> (i32, i32, i32, i32) {
    %c0_i32 = arith.constant 0 : i32
    %c0_i32_0 = arith.constant 0 : i32
    %c0_i32_1 = arith.constant 0 : i32
    return %arg0, %arg1, %c0_i32, %c0_i32_0 : i32, i32, i32, i32
  }
  func.func @transform_3(%arg0: i32, %arg1: i32) -> (i32, i32, i32, i32) {
    %c0_i32 = arith.constant 0 : i32
    %c0_i32_0 = arith.constant 0 : i32
    %c0_i32_1 = arith.constant 0 : i32
    return %arg0, %arg1, %c0_i32, %c0_i32_0 : i32, i32, i32, i32
  }
  func.func @transform_4(%arg0: i32, %arg1: i32) -> (i32, i32, i32, i32) {
    %c0_i32 = arith.constant 0 : i32
    %c0_i32_0 = arith.constant 0 : i32
    %c0_i32_1 = arith.constant 0 : i32
    return %arg0, %arg1, %c0_i32, %c0_i32_0 : i32, i32, i32, i32
  }
  func.func @transform_5(%arg0: i32, %arg1: i32) -> (i32, i32, i32, i32) {
    %c0_i32 = arith.constant 0 : i32
    %c0_i32_0 = arith.constant 0 : i32
    %c0_i32_1 = arith.constant 0 : i32
    return %arg0, %arg1, %c0_i32, %c0_i32_0 : i32, i32, i32, i32
  }
  func.func @transform_6(%arg0: i32, %arg1: i32) -> (i32, i32) {
    %c0_i32 = arith.constant 0 : i32
    %c0_i32_0 = arith.constant 0 : i32
    %c0_i32_1 = arith.constant 0 : i32
    return %c0_i32, %c0_i32_0 : i32, i32
  }
  func.func @transform_7(%arg0: i32, %arg1: i32) -> (i32, i32) {
    %c0_i32 = arith.constant 0 : i32
    %c0_i32_0 = arith.constant 0 : i32
    %c0_i32_1 = arith.constant 0 : i32
    return %c0_i32, %c0_i32_0 : i32, i32
  }
  func.func @transform_8(%arg0: i32, %arg1: i32) -> (i32, i32) {
    %c0_i32 = arith.constant 0 : i32
    %c0_i32_0 = arith.constant 0 : i32
    %c0_i32_1 = arith.constant 0 : i32
    return %c0_i32, %c0_i32_0 : i32, i32
  }
  func.func @transform_9(%arg0: i32, %arg1: i32) -> (i32, i32, i32) {
    %c0_i32 = arith.constant 0 : i32
    %c0_i32_0 = arith.constant 0 : i32
    return %arg0, %arg1, %c0_i32 : i32, i32, i32
  }
}

module attributes {stable_mosaic.version = 11 : i64} {
  func.func @_layer_kernel(%arg0: i32, %arg1: memref<1x8x32xf32, #tpu.memory_space<vmem>>, %arg2: memref<1x64x32xf32, #tpu.memory_space<vmem>>, %arg3: memref<1x64x16xf32, #tpu.memory_space<vmem>>, %arg4: memref<1x8x3xf32, #tpu.memory_space<vmem>>, %arg5: memref<1x8x1xf32, #tpu.memory_space<vmem>>, %arg6: memref<1x64x1xf32, #tpu.memory_space<vmem>>, %arg7: memref<64x8xf32, #tpu.memory_space<vmem>>, %arg8: memref<64x8xf32, #tpu.memory_space<vmem>>, %arg9: memref<8x64xf32, #tpu.memory_space<vmem>>, %arg10: memref<32x64xf32, #tpu.memory_space<vmem>>, %arg11: memref<16x64xf32, #tpu.memory_space<vmem>>, %arg12: memref<1x64xf32, #tpu.memory_space<vmem>>, %arg13: memref<64x33xf32, #tpu.memory_space<vmem>>, %arg14: memref<1x32xf32, #tpu.memory_space<vmem>>, %arg15: memref<32x32xf32, #tpu.memory_space<vmem>>, %arg16: memref<64x32xf32, #tpu.memory_space<vmem>>, %arg17: memref<1x32xf32, #tpu.memory_space<vmem>>, %arg18: memref<32x32xf32, #tpu.memory_space<vmem>>, %arg19: memref<32x32xf32, #tpu.memory_space<vmem>>, %arg20: memref<32x32xf32, #tpu.memory_space<vmem>>, %arg21: memref<1x32xf32, #tpu.memory_space<vmem>>, %arg22: memref<1x8x32xf32, #tpu.memory_space<vmem>>, %arg23: memref<1x8x3xf32, #tpu.memory_space<vmem>>, %arg24: memref<1x64x32xf32, #tpu.memory_space<vmem>>) attributes {dimension_semantics = [#tpu.dimension_semantics<parallel>], iteration_bounds = array<i64: 2>, scalar_prefetch = 0 : i64, scratch_operands = 0 : i64, tpu.core_type = #tpu.core_type<tc>, window_params = [{transform_indices = @transform_0, window_bounds = array<i64: 1, 8, 32>}, {transform_indices = @transform_1, window_bounds = array<i64: 1, 64, 32>}, {transform_indices = @transform_2, window_bounds = array<i64: 1, 64, 16>}, {transform_indices = @transform_3, window_bounds = array<i64: 1, 8, 3>}, {transform_indices = @transform_4, window_bounds = array<i64: 1, 8, 1>}, {transform_indices = @transform_5, window_bounds = array<i64: 1, 64, 1>}, {pipeline_mode = #tpu.pipeline_mode<synchronous>, transform_indices = @transform_6, window_bounds = array<i64: 64, 8>}, {pipeline_mode = #tpu.pipeline_mode<synchronous>, transform_indices = @transform_7, window_bounds = array<i64: 64, 8>}, {pipeline_mode = #tpu.pipeline_mode<synchronous>, transform_indices = @transform_8, window_bounds = array<i64: 8, 64>}, {pipeline_mode = #tpu.pipeline_mode<synchronous>, transform_indices = @transform_9, window_bounds = array<i64: 32, 64>}, {pipeline_mode = #tpu.pipeline_mode<synchronous>, transform_indices = @transform_10, window_bounds = array<i64: 16, 64>}, {pipeline_mode = #tpu.pipeline_mode<synchronous>, transform_indices = @transform_11, window_bounds = array<i64: 1, 64>}, {pipeline_mode = #tpu.pipeline_mode<synchronous>, transform_indices = @transform_12, window_bounds = array<i64: 64, 33>}, {pipeline_mode = #tpu.pipeline_mode<synchronous>, transform_indices = @transform_13, window_bounds = array<i64: 1, 32>}, {pipeline_mode = #tpu.pipeline_mode<synchronous>, transform_indices = @transform_14, window_bounds = array<i64: 32, 32>}, {pipeline_mode = #tpu.pipeline_mode<synchronous>, transform_indices = @transform_15, window_bounds = array<i64: 64, 32>}, {pipeline_mode = #tpu.pipeline_mode<synchronous>, transform_indices = @transform_16, window_bounds = array<i64: 1, 32>}, {pipeline_mode = #tpu.pipeline_mode<synchronous>, transform_indices = @transform_17, window_bounds = array<i64: 32, 32>}, {pipeline_mode = #tpu.pipeline_mode<synchronous>, transform_indices = @transform_18, window_bounds = array<i64: 32, 32>}, {pipeline_mode = #tpu.pipeline_mode<synchronous>, transform_indices = @transform_19, window_bounds = array<i64: 32, 32>}, {pipeline_mode = #tpu.pipeline_mode<synchronous>, transform_indices = @transform_20, window_bounds = array<i64: 1, 32>}, {transform_indices = @transform_21, window_bounds = array<i64: 1, 8, 32>}, {transform_indices = @transform_22, window_bounds = array<i64: 1, 8, 3>}, {transform_indices = @transform_23, window_bounds = array<i64: 1, 64, 32>}]} {
    %c0 = arith.constant 0 : index
    %c0_0 = arith.constant 0 : index
    %c0_1 = arith.constant 0 : index
    %0 = vector.load %arg1[%c0, %c0_0, %c0_1] : memref<1x8x32xf32, #tpu.memory_space<vmem>>, vector<1x8x32xf32>
    %1 = vector.shape_cast %0 : vector<1x8x32xf32> to vector<8x32xf32>
    %c0_2 = arith.constant 0 : index
    %c0_3 = arith.constant 0 : index
    %c0_4 = arith.constant 0 : index
    %2 = vector.load %arg2[%c0_2, %c0_3, %c0_4] : memref<1x64x32xf32, #tpu.memory_space<vmem>>, vector<1x64x32xf32>
    %3 = vector.shape_cast %2 : vector<1x64x32xf32> to vector<64x32xf32>
    %c0_5 = arith.constant 0 : index
    %c0_6 = arith.constant 0 : index
    %c0_7 = arith.constant 0 : index
    %4 = vector.load %arg3[%c0_5, %c0_6, %c0_7] : memref<1x64x16xf32, #tpu.memory_space<vmem>>, vector<1x64x16xf32>
    %5 = vector.shape_cast %4 : vector<1x64x16xf32> to vector<64x16xf32>
    %c0_8 = arith.constant 0 : index
    %c0_9 = arith.constant 0 : index
    %c0_10 = arith.constant 0 : index
    %6 = vector.load %arg4[%c0_8, %c0_9, %c0_10] : memref<1x8x3xf32, #tpu.memory_space<vmem>>, vector<1x8x3xf32>
    %7 = vector.shape_cast %6 : vector<1x8x3xf32> to vector<8x3xf32>
    %c0_11 = arith.constant 0 : index
    %c0_12 = arith.constant 0 : index
    %c0_13 = arith.constant 0 : index
    %8 = vector.load %arg5[%c0_11, %c0_12, %c0_13] : memref<1x8x1xf32, #tpu.memory_space<vmem>>, vector<1x8x1xf32>
    %9 = vector.shape_cast %8 : vector<1x8x1xf32> to vector<8x1xf32>
    %c0_14 = arith.constant 0 : index
    %c0_15 = arith.constant 0 : index
    %c0_16 = arith.constant 0 : index
    %10 = vector.load %arg6[%c0_14, %c0_15, %c0_16] : memref<1x64x1xf32, #tpu.memory_space<vmem>>, vector<1x64x1xf32>
    %11 = vector.shape_cast %10 : vector<1x64x1xf32> to vector<64x1xf32>
    %c0_17 = arith.constant 0 : index
    %c0_18 = arith.constant 0 : index
    %12 = vector.load %arg7[%c0_17, %c0_18] : memref<64x8xf32, #tpu.memory_space<vmem>>, vector<64x8xf32>
    %c0_19 = arith.constant 0 : index
    %c0_20 = arith.constant 0 : index
    %13 = vector.load %arg8[%c0_19, %c0_20] : memref<64x8xf32, #tpu.memory_space<vmem>>, vector<64x8xf32>
    %c0_21 = arith.constant 0 : index
    %c0_22 = arith.constant 0 : index
    %14 = vector.load %arg9[%c0_21, %c0_22] : memref<8x64xf32, #tpu.memory_space<vmem>>, vector<8x64xf32>
    %c0_23 = arith.constant 0 : index
    %c0_24 = arith.constant 0 : index
    %15 = vector.load %arg10[%c0_23, %c0_24] : memref<32x64xf32, #tpu.memory_space<vmem>>, vector<32x64xf32>
    %cst = arith.constant dense<0.000000e+00> : vector<64x64xf32>
    %16 = tpu.matmul %3, %15, %cst {dimension_numbers = #tpu.dot_dimension_numbers<[1], [0], [0], [1], [0, 0, 1, 1], [], []>} : vector<64x32xf32>, vector<32x64xf32>, vector<64x64xf32> -> vector<64x64xf32>
    %c0_25 = arith.constant 0 : index
    %c0_26 = arith.constant 0 : index
    %17 = vector.load %arg11[%c0_25, %c0_26] : memref<16x64xf32, #tpu.memory_space<vmem>>, vector<16x64xf32>
    %cst_27 = arith.constant dense<0.000000e+00> : vector<64x64xf32>
    %18 = tpu.matmul %5, %17, %cst_27 {dimension_numbers = #tpu.dot_dimension_numbers<[1], [0], [0], [1], [0, 0, 1, 1], [], []>} : vector<64x16xf32>, vector<16x64xf32>, vector<64x64xf32> -> vector<64x64xf32>
    %19 = arith.addf %16, %18 : vector<64x64xf32>
    %c0_28 = arith.constant 0 : index
    %c0_29 = arith.constant 0 : index
    %20 = vector.load %arg12[%c0_28, %c0_29] : memref<1x64xf32, #tpu.memory_space<vmem>>, vector<1x64xf32>
    %21 = vector.broadcast %20 : vector<1x64xf32> to vector<64x64xf32>
    %22 = arith.addf %19, %21 : vector<64x64xf32>
    %23 = arith.negf %22 : vector<64x64xf32>
    %24 = math.exp %23 : vector<64x64xf32>
    %cst_30 = arith.constant 1.000000e+00 : f32
    %25 = vector.broadcast %cst_30 : f32 to vector<64x64xf32>
    %26 = arith.addf %25, %24 : vector<64x64xf32>
    %27 = arith.divf %25, %26 : vector<64x64xf32>
    %28 = arith.mulf %22, %27 : vector<64x64xf32>
    %29 = vector.broadcast %11 : vector<64x1xf32> to vector<64x64xf32>
    %30 = arith.mulf %28, %29 : vector<64x64xf32>
    %c0_31 = arith.constant 0 : index
    %c0_32 = arith.constant 0 : index
    %31 = vector.load %arg13[%c0_31, %c0_32] : memref<64x33xf32, #tpu.memory_space<vmem>>, vector<64x33xf32>
    %cst_33 = arith.constant dense<0.000000e+00> : vector<64x33xf32>
    %32 = tpu.matmul %30, %31, %cst_33 {dimension_numbers = #tpu.dot_dimension_numbers<[1], [0], [0], [1], [0, 0, 1, 1], [], []>} : vector<64x64xf32>, vector<64x33xf32>, vector<64x33xf32> -> vector<64x33xf32>
    %33 = vector.extract_strided_slice %32 {offsets = [0, 32], sizes = [64, 1], strides = [1, 1]} : vector<64x33xf32> to vector<64x1xf32>
    %34 = arith.mulf %33, %11 : vector<64x1xf32>
    %cst_34 = arith.constant dense<0.000000e+00> : vector<64x3xf32>
    %35 = tpu.matmul %12, %7, %cst_34 {dimension_numbers = #tpu.dot_dimension_numbers<[1], [0], [0], [1], [0, 0, 1, 1], [], []>} : vector<64x8xf32>, vector<8x3xf32>, vector<64x3xf32> -> vector<64x3xf32>
    %cst_35 = arith.constant dense<0.000000e+00> : vector<64x3xf32>
    %36 = tpu.matmul %13, %7, %cst_35 {dimension_numbers = #tpu.dot_dimension_numbers<[1], [0], [0], [1], [0, 0, 1, 1], [], []>} : vector<64x8xf32>, vector<8x3xf32>, vector<64x3xf32> -> vector<64x3xf32>
    %37 = arith.subf %35, %36 : vector<64x3xf32>
    %38 = vector.broadcast %34 : vector<64x1xf32> to vector<64x3xf32>
    %39 = arith.mulf %38, %37 : vector<64x3xf32>
    %cst_36 = arith.constant dense<0.000000e+00> : vector<8x3xf32>
    %40 = tpu.matmul %14, %39, %cst_36 {dimension_numbers = #tpu.dot_dimension_numbers<[1], [0], [0], [1], [0, 0, 1, 1], [], []>} : vector<8x64xf32>, vector<64x3xf32>, vector<8x3xf32> -> vector<8x3xf32>
    %41 = vector.broadcast %9 : vector<8x1xf32> to vector<8x3xf32>
    %42 = arith.mulf %40, %41 : vector<8x3xf32>
    %43 = arith.addf %7, %42 : vector<8x3xf32>
    %cst_37 = arith.constant dense<0.000000e+00> : vector<8x64xf32>
    %44 = tpu.matmul %14, %30, %cst_37 {dimension_numbers = #tpu.dot_dimension_numbers<[1], [0], [0], [1], [0, 0, 1, 1], [], []>} : vector<8x64xf32>, vector<64x64xf32>, vector<8x64xf32> -> vector<8x64xf32>
    %c0_38 = arith.constant 0 : index
    %c0_39 = arith.constant 0 : index
    %45 = vector.load %arg15[%c0_38, %c0_39] : memref<32x32xf32, #tpu.memory_space<vmem>>, vector<32x32xf32>
    %cst_40 = arith.constant dense<0.000000e+00> : vector<8x32xf32>
    %46 = tpu.matmul %1, %45, %cst_40 {dimension_numbers = #tpu.dot_dimension_numbers<[1], [0], [0], [1], [0, 0, 1, 1], [], []>} : vector<8x32xf32>, vector<32x32xf32>, vector<8x32xf32> -> vector<8x32xf32>
    %c0_41 = arith.constant 0 : index
    %c0_42 = arith.constant 0 : index
    %47 = vector.load %arg16[%c0_41, %c0_42] : memref<64x32xf32, #tpu.memory_space<vmem>>, vector<64x32xf32>
    %cst_43 = arith.constant dense<0.000000e+00> : vector<8x32xf32>
    %48 = tpu.matmul %44, %47, %cst_43 {dimension_numbers = #tpu.dot_dimension_numbers<[1], [0], [0], [1], [0, 0, 1, 1], [], []>} : vector<8x64xf32>, vector<64x32xf32>, vector<8x32xf32> -> vector<8x32xf32>
    %49 = arith.addf %46, %48 : vector<8x32xf32>
    %c0_44 = arith.constant 0 : index
    %c0_45 = arith.constant 0 : index
    %50 = vector.load %arg17[%c0_44, %c0_45] : memref<1x32xf32, #tpu.memory_space<vmem>>, vector<1x32xf32>
    %51 = vector.broadcast %50 : vector<1x32xf32> to vector<8x32xf32>
    %52 = arith.addf %49, %51 : vector<8x32xf32>
    %cst_46 = arith.constant 0.000000e+00 : f32
    %53 = vector.broadcast %cst_46 : f32 to vector<8x32xf32>
    %54 = arith.maximumf %52, %53 : vector<8x32xf32>
    %55 = arith.addf %1, %54 : vector<8x32xf32>
    %56 = vector.broadcast %9 : vector<8x1xf32> to vector<8x32xf32>
    %57 = arith.mulf %55, %56 : vector<8x32xf32>
    %58 = vector.extract_strided_slice %32 {offsets = [0, 0], sizes = [64, 32], strides = [1, 1]} : vector<64x33xf32> to vector<64x32xf32>
    %c0_47 = arith.constant 0 : index
    %c0_48 = arith.constant 0 : index
    %59 = vector.load %arg14[%c0_47, %c0_48] : memref<1x32xf32, #tpu.memory_space<vmem>>, vector<1x32xf32>
    %60 = vector.broadcast %59 : vector<1x32xf32> to vector<64x32xf32>
    %61 = arith.addf %58, %60 : vector<64x32xf32>
    %62 = arith.negf %61 : vector<64x32xf32>
    %63 = math.exp %62 : vector<64x32xf32>
    %cst_49 = arith.constant 1.000000e+00 : f32
    %64 = vector.broadcast %cst_49 : f32 to vector<64x32xf32>
    %65 = arith.addf %64, %63 : vector<64x32xf32>
    %66 = arith.divf %64, %65 : vector<64x32xf32>
    %67 = arith.mulf %61, %66 : vector<64x32xf32>
    %68 = arith.addf %3, %67 : vector<64x32xf32>
    %69 = vector.broadcast %11 : vector<64x1xf32> to vector<64x32xf32>
    %70 = arith.mulf %68, %69 : vector<64x32xf32>
    %c0_50 = arith.constant 0 : index
    %c0_51 = arith.constant 0 : index
    %71 = vector.load %arg18[%c0_50, %c0_51] : memref<32x32xf32, #tpu.memory_space<vmem>>, vector<32x32xf32>
    %cst_52 = arith.constant dense<0.000000e+00> : vector<8x32xf32>
    %72 = tpu.matmul %57, %71, %cst_52 {dimension_numbers = #tpu.dot_dimension_numbers<[1], [0], [0], [1], [0, 0, 1, 1], [], []>} : vector<8x32xf32>, vector<32x32xf32>, vector<8x32xf32> -> vector<8x32xf32>
    %c0_53 = arith.constant 0 : index
    %c0_54 = arith.constant 0 : index
    %73 = vector.load %arg19[%c0_53, %c0_54] : memref<32x32xf32, #tpu.memory_space<vmem>>, vector<32x32xf32>
    %cst_55 = arith.constant dense<0.000000e+00> : vector<8x32xf32>
    %74 = tpu.matmul %57, %73, %cst_55 {dimension_numbers = #tpu.dot_dimension_numbers<[1], [0], [0], [1], [0, 0, 1, 1], [], []>} : vector<8x32xf32>, vector<32x32xf32>, vector<8x32xf32> -> vector<8x32xf32>
    %cst_56 = arith.constant dense<0.000000e+00> : vector<64x32xf32>
    %75 = tpu.matmul %13, %72, %cst_56 {dimension_numbers = #tpu.dot_dimension_numbers<[1], [0], [0], [1], [0, 0, 1, 1], [], []>} : vector<64x8xf32>, vector<8x32xf32>, vector<64x32xf32> -> vector<64x32xf32>
    %cst_57 = arith.constant dense<0.000000e+00> : vector<64x32xf32>
    %76 = tpu.matmul %12, %74, %cst_57 {dimension_numbers = #tpu.dot_dimension_numbers<[1], [0], [0], [1], [0, 0, 1, 1], [], []>} : vector<64x8xf32>, vector<8x32xf32>, vector<64x32xf32> -> vector<64x32xf32>
    %77 = arith.addf %75, %76 : vector<64x32xf32>
    %78 = vector.broadcast %11 : vector<64x1xf32> to vector<64x32xf32>
    %79 = arith.mulf %78, %77 : vector<64x32xf32>
    %c0_58 = arith.constant 0 : index
    %c0_59 = arith.constant 0 : index
    %80 = vector.load %arg20[%c0_58, %c0_59] : memref<32x32xf32, #tpu.memory_space<vmem>>, vector<32x32xf32>
    %cst_60 = arith.constant dense<0.000000e+00> : vector<64x32xf32>
    %81 = tpu.matmul %70, %80, %cst_60 {dimension_numbers = #tpu.dot_dimension_numbers<[1], [0], [0], [1], [0, 0, 1, 1], [], []>} : vector<64x32xf32>, vector<32x32xf32>, vector<64x32xf32> -> vector<64x32xf32>
    %82 = arith.addf %79, %81 : vector<64x32xf32>
    %c0_61 = arith.constant 0 : index
    %c0_62 = arith.constant 0 : index
    %83 = vector.load %arg21[%c0_61, %c0_62] : memref<1x32xf32, #tpu.memory_space<vmem>>, vector<1x32xf32>
    %84 = vector.broadcast %83 : vector<1x32xf32> to vector<64x32xf32>
    %85 = arith.addf %82, %84 : vector<64x32xf32>
    %86 = vector.broadcast %11 : vector<64x1xf32> to vector<64x32xf32>
    %87 = arith.mulf %85, %86 : vector<64x32xf32>
    %c0_63 = arith.constant 0 : index
    %c0_64 = arith.constant 0 : index
    %c0_65 = arith.constant 0 : index
    %88 = vector.load %arg22[%c0_63, %c0_64, %c0_65] : memref<1x8x32xf32, #tpu.memory_space<vmem>>, vector<1x8x32xf32>
    %89 = vector.shape_cast %88 : vector<1x8x32xf32> to vector<8x32xf32>
    %90 = vector.shape_cast %57 : vector<8x32xf32> to vector<1x8x32xf32>
    tpu.vector_store %arg22[%c0_63, %c0_64, %c0_65], %90 {strides = array<i32>} : memref<1x8x32xf32, #tpu.memory_space<vmem>>, vector<1x8x32xf32>,
    %c0_66 = arith.constant 0 : index
    %c0_67 = arith.constant 0 : index
    %c0_68 = arith.constant 0 : index
    %91 = vector.load %arg23[%c0_66, %c0_67, %c0_68] : memref<1x8x3xf32, #tpu.memory_space<vmem>>, vector<1x8x3xf32>
    %92 = vector.shape_cast %91 : vector<1x8x3xf32> to vector<8x3xf32>
    %93 = vector.shape_cast %43 : vector<8x3xf32> to vector<1x8x3xf32>
    tpu.vector_store %arg23[%c0_66, %c0_67, %c0_68], %93 {strides = array<i32>} : memref<1x8x3xf32, #tpu.memory_space<vmem>>, vector<1x8x3xf32>,
    %c0_69 = arith.constant 0 : index
    %c0_70 = arith.constant 0 : index
    %c0_71 = arith.constant 0 : index
    %94 = vector.load %arg24[%c0_69, %c0_70, %c0_71] : memref<1x64x32xf32, #tpu.memory_space<vmem>>, vector<1x64x32xf32>
    %95 = vector.shape_cast %94 : vector<1x64x32xf32> to vector<64x32xf32>
    %96 = vector.shape_cast %87 : vector<64x32xf32> to vector<1x64x32xf32>
    tpu.vector_store %arg24[%c0_69, %c0_70, %c0_71], %96 {strides = array<i32>} : memref<1x64x32xf32, #tpu.memory_space<vmem>>, vector<1x64x32xf32>,
    return
  }
  func.func @transform_0(%arg0: i32) -> (i32, i32, i32) {
    %c0_i32 = arith.constant 0 : i32
    %c0_i32_0 = arith.constant 0 : i32
    %c0_i32_1 = arith.constant 0 : i32
    return %arg0, %c0_i32, %c0_i32_0 : i32, i32, i32
  }
  func.func @transform_1(%arg0: i32) -> (i32, i32, i32) {
    %c0_i32 = arith.constant 0 : i32
    %c0_i32_0 = arith.constant 0 : i32
    %c0_i32_1 = arith.constant 0 : i32
    return %arg0, %c0_i32, %c0_i32_0 : i32, i32, i32
  }
  func.func @transform_2(%arg0: i32) -> (i32, i32, i32) {
    %c0_i32 = arith.constant 0 : i32
    %c0_i32_0 = arith.constant 0 : i32
    %c0_i32_1 = arith.constant 0 : i32
    return %arg0, %c0_i32, %c0_i32_0 : i32, i32, i32
  }
  func.func @transform_3(%arg0: i32) -> (i32, i32, i32) {
    %c0_i32 = arith.constant 0 : i32
    %c0_i32_0 = arith.constant 0 : i32
    %c0_i32_1 = arith.constant 0 : i32
    return %arg0, %c0_i32, %c0_i32_0 : i32, i32, i32
  }
  func.func @transform_4(%arg0: i32) -> (i32, i32, i32) {
    %c0_i32 = arith.constant 0 : i32
    %c0_i32_0 = arith.constant 0 : i32
    %c0_i32_1 = arith.constant 0 : i32
    return %arg0, %c0_i32, %c0_i32_0 : i32, i32, i32
  }
  func.func @transform_5(%arg0: i32) -> (i32, i32, i32) {
    %c0_i32 = arith.constant 0 : i32
    %c0_i32_0 = arith.constant 0 : i32
    %c0_i32_1 = arith.constant 0 : i32
    return %arg0, %c0_i32, %c0_i32_0 : i32, i32, i32
  }
  func.func @transform_6(%arg0: i32) -> (i32, i32) {
    %c0_i32 = arith.constant 0 : i32
    %c0_i32_0 = arith.constant 0 : i32
    %c0_i32_1 = arith.constant 0 : i32
    return %c0_i32, %c0_i32_0 : i32, i32
  }
  func.func @transform_7(%arg0: i32) -> (i32, i32) {
    %c0_i32 = arith.constant 0 : i32
    %c0_i32_0 = arith.constant 0 : i32
    %c0_i32_1 = arith.constant 0 : i32
    return %c0_i32, %c0_i32_0 : i32, i32
  }
  func.func @transform_8(%arg0: i32) -> (i32, i32) {
    %c0_i32 = arith.constant 0 : i32
    %c0_i32_0 = arith.constant 0 : i32
    %c0_i32_1 = arith.constant 0 : i32
    return %c0_i32, %c0_i32_0 : i32, i32
  }
  func.func @transform_9(%arg0: i32) -> (i32, i32) {
    %c0_i32 = arith.constant 0 : i32
    %c0_i32_0 = arith.constant 0 : i32
    %c0_i32_1 = arith.constant 0 : i32
    return %c0_i32, %c0_i32_0 : i32, i32
  }
  func.func @transform_10(%arg0: i32) -> (i32, i32) {
    %c0_i32 = arith.constant 0 : i32
    %c0_i32_0 = arith.constant 0 : i32
    %c0_i32_1 = arith.constant 0 : i32
    return %c0_i32, %c0_i32_0 : i32, i32
  }
  func.func @transform_11(%arg0: i32) -> (i32, i32) {
    %c0_i32 = arith.constant 0 : i32
    %c0_i32_0 = arith.constant 0 : i32
    %c0_i32_1 = arith.constant 0 : i32
    return %c0_i32, %c0_i32_0 : i32, i32
  }
  func.func @transform_12(%arg0: i32) -> (i32, i32) {
    %c0_i32 = arith.constant 0 : i32
    %c0_i32_0 = arith.constant 0 : i32
    %c0_i32_1 = arith.constant 0 : i32
    return %c0_i32, %c0_i32_0 : i32, i32
  }
  func.func @transform_13(%arg0: i32) -> (i32, i32) {
    %c0_i32 = arith.constant 0 : i32
    %c0_i32_0 = arith.constant 0 : i32
    %c0_i32_1 = arith.constant 0 : i32
    return %c0_i32, %c0_i32_0 : i32, i32
  }
  func.func @transform_14(%arg0: i32) -> (i32, i32) {
    %c0_i32 = arith.constant 0 : i32
    %c0_i32_0 = arith.constant 0 : i32
    %c0_i32_1 = arith.constant 0 : i32
    return %c0_i32, %c0_i32_0 : i32, i32
  }
  func.func @transform_15(%arg0: i32) -> (i32, i32) {
    %c0_i32 = arith.constant 0 : i32
    %c0_i32_0 = arith.constant 0 : i32
    %c0_i32_1 = arith.constant 0 : i32
    return %c0_i32, %c0_i32_0 : i32, i32
  }
  func.func @transform_16(%arg0: i32) -> (i32, i32) {
    %c0_i32 = arith.constant 0 : i32
    %c0_i32_0 = arith.constant 0 : i32
    %c0_i32_1 = arith.constant 0 : i32
    return %c0_i32, %c0_i32_0 : i32, i32
  }
  func.func @transform_17(%arg0: i32) -> (i32, i32) {
    %c0_i32 = arith.constant 0 : i32
    %c0_i32_0 = arith.constant 0 : i32
    %c0_i32_1 = arith.constant 0 : i32
    return %c0_i32, %c0_i32_0 : i32, i32
  }
  func.func @transform_18(%arg0: i32) -> (i32, i32) {
    %c0_i32 = arith.constant 0 : i32
    %c0_i32_0 = arith.constant 0 : i32
    %c0_i32_1 = arith.constant 0 : i32
    return %c0_i32, %c0_i32_0 : i32, i32
  }
  func.func @transform_19(%arg0: i32) -> (i32, i32) {
    %c0_i32 = arith.constant 0 : i32
    %c0_i32_0 = arith.constant 0 : i32
    %c0_i32_1 = arith.constant 0 : i32
    return %c0_i32, %c0_i32_0 : i32, i32
  }
  func.func @transform_20(%arg0: i32) -> (i32, i32) {
    %c0_i32 = arith.constant 0 : i32
    %c0_i32_0 = arith.constant 0 : i32
    %c0_i32_1 = arith.constant 0 : i32
    return %c0_i32, %c0_i32_0 : i32, i32
  }
  func.func @transform_21(%arg0: i32) -> (i32, i32, i32) {
    %c0_i32 = arith.constant 0 : i32
    %c0_i32_0 = arith.constant 0 : i32
    %c0_i32_1 = arith.constant 0 : i32
    return %arg0, %c0_i32, %c0_i32_0 : i32, i32, i32
  }
  func.func @transform_22(%arg0: i32) -> (i32, i32, i32) {
    %c0_i32 = arith.constant 0 : i32
    %c0_i32_0 = arith.constant 0 : i32
    %c0_i32_1 = arith.constant 0 : i32
    return %arg0, %c0_i32, %c0_i32_0 : i32, i32, i32
  }
  func.func @transform_23(%arg0: i32) -> (i32, i32, i32) {
    %c0_i32 = arith.constant 0 : i32
    %c0_i32_0 = arith.constant 0 : i32
    %c0_i32_1 = arith.constant 0 : i32
    return %arg0, %c0_i32, %c0_i32_0 : i32, i32, i32
  }
}

module attributes {stable_mosaic.version = 11 : i64} {
  func.func @_layer_kernel(%arg0: i32, %arg1: memref<1x8x32xf32, #tpu.memory_space<vmem>>, %arg2: memref<1x64x32xf32, #tpu.memory_space<vmem>>, %arg3: memref<1x64x16xf32, #tpu.memory_space<vmem>>, %arg4: memref<1x8x3xf32, #tpu.memory_space<vmem>>, %arg5: memref<1x8x1xf32, #tpu.memory_space<vmem>>, %arg6: memref<1x64x1xf32, #tpu.memory_space<vmem>>, %arg7: memref<64x8xf32, #tpu.memory_space<vmem>>, %arg8: memref<64x8xf32, #tpu.memory_space<vmem>>, %arg9: memref<8x64xf32, #tpu.memory_space<vmem>>, %arg10: memref<32x64xf32, #tpu.memory_space<vmem>>, %arg11: memref<16x64xf32, #tpu.memory_space<vmem>>, %arg12: memref<1x64xf32, #tpu.memory_space<vmem>>, %arg13: memref<64x33xf32, #tpu.memory_space<vmem>>, %arg14: memref<1x32xf32, #tpu.memory_space<vmem>>, %arg15: memref<32x32xf32, #tpu.memory_space<vmem>>, %arg16: memref<64x32xf32, #tpu.memory_space<vmem>>, %arg17: memref<1x32xf32, #tpu.memory_space<vmem>>, %arg18: memref<32x32xf32, #tpu.memory_space<vmem>>, %arg19: memref<32x32xf32, #tpu.memory_space<vmem>>, %arg20: memref<32x32xf32, #tpu.memory_space<vmem>>, %arg21: memref<1x32xf32, #tpu.memory_space<vmem>>, %arg22: memref<1x8x32xf32, #tpu.memory_space<vmem>>, %arg23: memref<1x8x3xf32, #tpu.memory_space<vmem>>, %arg24: memref<1x64x32xf32, #tpu.memory_space<vmem>>) attributes {dimension_semantics = [#tpu.dimension_semantics<parallel>], iteration_bounds = array<i64: 2>, scalar_prefetch = 0 : i64, scratch_operands = 0 : i64, tpu.core_type = #tpu.core_type<tc>, window_params = [{transform_indices = @transform_0, window_bounds = array<i64: 1, 8, 32>}, {transform_indices = @transform_1, window_bounds = array<i64: 1, 64, 32>}, {transform_indices = @transform_2, window_bounds = array<i64: 1, 64, 16>}, {transform_indices = @transform_3, window_bounds = array<i64: 1, 8, 3>}, {transform_indices = @transform_4, window_bounds = array<i64: 1, 8, 1>}, {transform_indices = @transform_5, window_bounds = array<i64: 1, 64, 1>}, {pipeline_mode = #tpu.pipeline_mode<synchronous>, transform_indices = @transform_6, window_bounds = array<i64: 64, 8>}, {pipeline_mode = #tpu.pipeline_mode<synchronous>, transform_indices = @transform_7, window_bounds = array<i64: 64, 8>}, {pipeline_mode = #tpu.pipeline_mode<synchronous>, transform_indices = @transform_8, window_bounds = array<i64: 8, 64>}, {pipeline_mode = #tpu.pipeline_mode<synchronous>, transform_indices = @transform_9, window_bounds = array<i64: 32, 64>}, {pipeline_mode = #tpu.pipeline_mode<synchronous>, transform_indices = @transform_10, window_bounds = array<i64: 16, 64>}, {pipeline_mode = #tpu.pipeline_mode<synchronous>, transform_indices = @transform_11, window_bounds = array<i64: 1, 64>}, {pipeline_mode = #tpu.pipeline_mode<synchronous>, transform_indices = @transform_12, window_bounds = array<i64: 64, 33>}, {pipeline_mode = #tpu.pipeline_mode<synchronous>, transform_indices = @transform_13, window_bounds = array<i64: 1, 32>}, {pipeline_mode = #tpu.pipeline_mode<synchronous>, transform_indices = @transform_14, window_bounds = array<i64: 32, 32>}, {pipeline_mode = #tpu.pipeline_mode<synchronous>, transform_indices = @transform_15, window_bounds = array<i64: 64, 32>}, {pipeline_mode = #tpu.pipeline_mode<synchronous>, transform_indices = @transform_16, window_bounds = array<i64: 1, 32>}, {pipeline_mode = #tpu.pipeline_mode<synchronous>, transform_indices = @transform_17, window_bounds = array<i64: 32, 32>}, {pipeline_mode = #tpu.pipeline_mode<synchronous>, transform_indices = @transform_18, window_bounds = array<i64: 32, 32>}, {pipeline_mode = #tpu.pipeline_mode<synchronous>, transform_indices = @transform_19, window_bounds = array<i64: 32, 32>}, {pipeline_mode = #tpu.pipeline_mode<synchronous>, transform_indices = @transform_20, window_bounds = array<i64: 1, 32>}, {transform_indices = @transform_21, window_bounds = array<i64: 1, 8, 32>}, {transform_indices = @transform_22, window_bounds = array<i64: 1, 8, 3>}, {transform_indices = @transform_23, window_bounds = array<i64: 1, 64, 32>}]} {
    %c0 = arith.constant 0 : index
    %c0_0 = arith.constant 0 : index
    %c0_1 = arith.constant 0 : index
    %0 = vector.load %arg1[%c0, %c0_0, %c0_1] : memref<1x8x32xf32, #tpu.memory_space<vmem>>, vector<1x8x32xf32>
    %1 = vector.shape_cast %0 : vector<1x8x32xf32> to vector<8x32xf32>
    %c0_2 = arith.constant 0 : index
    %c0_3 = arith.constant 0 : index
    %c0_4 = arith.constant 0 : index
    %2 = vector.load %arg2[%c0_2, %c0_3, %c0_4] : memref<1x64x32xf32, #tpu.memory_space<vmem>>, vector<1x64x32xf32>
    %3 = vector.shape_cast %2 : vector<1x64x32xf32> to vector<64x32xf32>
    %c0_5 = arith.constant 0 : index
    %c0_6 = arith.constant 0 : index
    %c0_7 = arith.constant 0 : index
    %4 = vector.load %arg3[%c0_5, %c0_6, %c0_7] : memref<1x64x16xf32, #tpu.memory_space<vmem>>, vector<1x64x16xf32>
    %5 = vector.shape_cast %4 : vector<1x64x16xf32> to vector<64x16xf32>
    %c0_8 = arith.constant 0 : index
    %c0_9 = arith.constant 0 : index
    %c0_10 = arith.constant 0 : index
    %6 = vector.load %arg4[%c0_8, %c0_9, %c0_10] : memref<1x8x3xf32, #tpu.memory_space<vmem>>, vector<1x8x3xf32>
    %7 = vector.shape_cast %6 : vector<1x8x3xf32> to vector<8x3xf32>
    %c0_11 = arith.constant 0 : index
    %c0_12 = arith.constant 0 : index
    %c0_13 = arith.constant 0 : index
    %8 = vector.load %arg5[%c0_11, %c0_12, %c0_13] : memref<1x8x1xf32, #tpu.memory_space<vmem>>, vector<1x8x1xf32>
    %9 = vector.shape_cast %8 : vector<1x8x1xf32> to vector<8x1xf32>
    %c0_14 = arith.constant 0 : index
    %c0_15 = arith.constant 0 : index
    %c0_16 = arith.constant 0 : index
    %10 = vector.load %arg6[%c0_14, %c0_15, %c0_16] : memref<1x64x1xf32, #tpu.memory_space<vmem>>, vector<1x64x1xf32>
    %11 = vector.shape_cast %10 : vector<1x64x1xf32> to vector<64x1xf32>
    %c0_17 = arith.constant 0 : index
    %c0_18 = arith.constant 0 : index
    %12 = vector.load %arg7[%c0_17, %c0_18] : memref<64x8xf32, #tpu.memory_space<vmem>>, vector<64x8xf32>
    %c0_19 = arith.constant 0 : index
    %c0_20 = arith.constant 0 : index
    %13 = vector.load %arg8[%c0_19, %c0_20] : memref<64x8xf32, #tpu.memory_space<vmem>>, vector<64x8xf32>
    %c0_21 = arith.constant 0 : index
    %c0_22 = arith.constant 0 : index
    %14 = vector.load %arg9[%c0_21, %c0_22] : memref<8x64xf32, #tpu.memory_space<vmem>>, vector<8x64xf32>
    %c0_23 = arith.constant 0 : index
    %c0_24 = arith.constant 0 : index
    %15 = vector.load %arg10[%c0_23, %c0_24] : memref<32x64xf32, #tpu.memory_space<vmem>>, vector<32x64xf32>
    %cst = arith.constant dense<0.000000e+00> : vector<64x64xf32>
    %16 = tpu.matmul %3, %15, %cst {dimension_numbers = #tpu.dot_dimension_numbers<[1], [0], [0], [1], [0, 0, 1, 1], [], []>} : vector<64x32xf32>, vector<32x64xf32>, vector<64x64xf32> -> vector<64x64xf32>
    %c0_25 = arith.constant 0 : index
    %c0_26 = arith.constant 0 : index
    %17 = vector.load %arg11[%c0_25, %c0_26] : memref<16x64xf32, #tpu.memory_space<vmem>>, vector<16x64xf32>
    %cst_27 = arith.constant dense<0.000000e+00> : vector<64x64xf32>
    %18 = tpu.matmul %5, %17, %cst_27 {dimension_numbers = #tpu.dot_dimension_numbers<[1], [0], [0], [1], [0, 0, 1, 1], [], []>} : vector<64x16xf32>, vector<16x64xf32>, vector<64x64xf32> -> vector<64x64xf32>
    %19 = arith.addf %16, %18 : vector<64x64xf32>
    %c0_28 = arith.constant 0 : index
    %c0_29 = arith.constant 0 : index
    %20 = vector.load %arg12[%c0_28, %c0_29] : memref<1x64xf32, #tpu.memory_space<vmem>>, vector<1x64xf32>
    %21 = vector.broadcast %20 : vector<1x64xf32> to vector<64x64xf32>
    %22 = arith.addf %19, %21 : vector<64x64xf32>
    %23 = arith.negf %22 : vector<64x64xf32>
    %24 = math.exp %23 : vector<64x64xf32>
    %cst_30 = arith.constant 1.000000e+00 : f32
    %25 = vector.broadcast %cst_30 : f32 to vector<64x64xf32>
    %26 = arith.addf %25, %24 : vector<64x64xf32>
    %27 = arith.divf %25, %26 : vector<64x64xf32>
    %28 = arith.mulf %22, %27 : vector<64x64xf32>
    %29 = vector.broadcast %11 : vector<64x1xf32> to vector<64x64xf32>
    %30 = arith.mulf %28, %29 : vector<64x64xf32>
    %c0_31 = arith.constant 0 : index
    %c0_32 = arith.constant 0 : index
    %31 = vector.load %arg13[%c0_31, %c0_32] : memref<64x33xf32, #tpu.memory_space<vmem>>, vector<64x33xf32>
    %cst_33 = arith.constant dense<0.000000e+00> : vector<64x33xf32>
    %32 = tpu.matmul %30, %31, %cst_33 {dimension_numbers = #tpu.dot_dimension_numbers<[1], [0], [0], [1], [0, 0, 1, 1], [], []>} : vector<64x64xf32>, vector<64x33xf32>, vector<64x33xf32> -> vector<64x33xf32>
    %33 = vector.extract_strided_slice %32 {offsets = [0, 32], sizes = [64, 1], strides = [1, 1]} : vector<64x33xf32> to vector<64x1xf32>
    %34 = arith.mulf %33, %11 : vector<64x1xf32>
    %cst_34 = arith.constant dense<0.000000e+00> : vector<64x3xf32>
    %35 = tpu.matmul %12, %7, %cst_34 {dimension_numbers = #tpu.dot_dimension_numbers<[1], [0], [0], [1], [0, 0, 1, 1], [], []>} : vector<64x8xf32>, vector<8x3xf32>, vector<64x3xf32> -> vector<64x3xf32>
    %cst_35 = arith.constant dense<0.000000e+00> : vector<64x3xf32>
    %36 = tpu.matmul %13, %7, %cst_35 {dimension_numbers = #tpu.dot_dimension_numbers<[1], [0], [0], [1], [0, 0, 1, 1], [], []>} : vector<64x8xf32>, vector<8x3xf32>, vector<64x3xf32> -> vector<64x3xf32>
    %37 = arith.subf %35, %36 : vector<64x3xf32>
    %38 = vector.broadcast %34 : vector<64x1xf32> to vector<64x3xf32>
    %39 = arith.mulf %38, %37 : vector<64x3xf32>
    %cst_36 = arith.constant dense<0.000000e+00> : vector<8x3xf32>
    %40 = tpu.matmul %14, %39, %cst_36 {dimension_numbers = #tpu.dot_dimension_numbers<[1], [0], [0], [1], [0, 0, 1, 1], [], []>} : vector<8x64xf32>, vector<64x3xf32>, vector<8x3xf32> -> vector<8x3xf32>
    %41 = vector.broadcast %9 : vector<8x1xf32> to vector<8x3xf32>
    %42 = arith.mulf %40, %41 : vector<8x3xf32>
    %43 = arith.addf %7, %42 : vector<8x3xf32>
    %cst_37 = arith.constant dense<0.000000e+00> : vector<8x64xf32>
    %44 = tpu.matmul %14, %30, %cst_37 {dimension_numbers = #tpu.dot_dimension_numbers<[1], [0], [0], [1], [0, 0, 1, 1], [], []>} : vector<8x64xf32>, vector<64x64xf32>, vector<8x64xf32> -> vector<8x64xf32>
    %c0_38 = arith.constant 0 : index
    %c0_39 = arith.constant 0 : index
    %45 = vector.load %arg15[%c0_38, %c0_39] : memref<32x32xf32, #tpu.memory_space<vmem>>, vector<32x32xf32>
    %cst_40 = arith.constant dense<0.000000e+00> : vector<8x32xf32>
    %46 = tpu.matmul %1, %45, %cst_40 {dimension_numbers = #tpu.dot_dimension_numbers<[1], [0], [0], [1], [0, 0, 1, 1], [], []>} : vector<8x32xf32>, vector<32x32xf32>, vector<8x32xf32> -> vector<8x32xf32>
    %c0_41 = arith.constant 0 : index
    %c0_42 = arith.constant 0 : index
    %47 = vector.load %arg16[%c0_41, %c0_42] : memref<64x32xf32, #tpu.memory_space<vmem>>, vector<64x32xf32>
    %cst_43 = arith.constant dense<0.000000e+00> : vector<8x32xf32>
    %48 = tpu.matmul %44, %47, %cst_43 {dimension_numbers = #tpu.dot_dimension_numbers<[1], [0], [0], [1], [0, 0, 1, 1], [], []>} : vector<8x64xf32>, vector<64x32xf32>, vector<8x32xf32> -> vector<8x32xf32>
    %49 = arith.addf %46, %48 : vector<8x32xf32>
    %c0_44 = arith.constant 0 : index
    %c0_45 = arith.constant 0 : index
    %50 = vector.load %arg17[%c0_44, %c0_45] : memref<1x32xf32, #tpu.memory_space<vmem>>, vector<1x32xf32>
    %51 = vector.broadcast %50 : vector<1x32xf32> to vector<8x32xf32>
    %52 = arith.addf %49, %51 : vector<8x32xf32>
    %cst_46 = arith.constant 0.000000e+00 : f32
    %53 = vector.broadcast %cst_46 : f32 to vector<8x32xf32>
    %54 = arith.maximumf %52, %53 : vector<8x32xf32>
    %55 = arith.addf %1, %54 : vector<8x32xf32>
    %56 = vector.broadcast %9 : vector<8x1xf32> to vector<8x32xf32>
    %57 = arith.mulf %55, %56 : vector<8x32xf32>
    %58 = vector.extract_strided_slice %32 {offsets = [0, 0], sizes = [64, 32], strides = [1, 1]} : vector<64x33xf32> to vector<64x32xf32>
    %c0_47 = arith.constant 0 : index
    %c0_48 = arith.constant 0 : index
    %59 = vector.load %arg14[%c0_47, %c0_48] : memref<1x32xf32, #tpu.memory_space<vmem>>, vector<1x32xf32>
    %60 = vector.broadcast %59 : vector<1x32xf32> to vector<64x32xf32>
    %61 = arith.addf %58, %60 : vector<64x32xf32>
    %62 = arith.negf %61 : vector<64x32xf32>
    %63 = math.exp %62 : vector<64x32xf32>
    %cst_49 = arith.constant 1.000000e+00 : f32
    %64 = vector.broadcast %cst_49 : f32 to vector<64x32xf32>
    %65 = arith.addf %64, %63 : vector<64x32xf32>
    %66 = arith.divf %64, %65 : vector<64x32xf32>
    %67 = arith.mulf %61, %66 : vector<64x32xf32>
    %68 = arith.addf %3, %67 : vector<64x32xf32>
    %69 = vector.broadcast %11 : vector<64x1xf32> to vector<64x32xf32>
    %70 = arith.mulf %68, %69 : vector<64x32xf32>
    %c0_50 = arith.constant 0 : index
    %c0_51 = arith.constant 0 : index
    %71 = vector.load %arg18[%c0_50, %c0_51] : memref<32x32xf32, #tpu.memory_space<vmem>>, vector<32x32xf32>
    %cst_52 = arith.constant dense<0.000000e+00> : vector<8x32xf32>
    %72 = tpu.matmul %57, %71, %cst_52 {dimension_numbers = #tpu.dot_dimension_numbers<[1], [0], [0], [1], [0, 0, 1, 1], [], []>} : vector<8x32xf32>, vector<32x32xf32>, vector<8x32xf32> -> vector<8x32xf32>
    %c0_53 = arith.constant 0 : index
    %c0_54 = arith.constant 0 : index
    %73 = vector.load %arg19[%c0_53, %c0_54] : memref<32x32xf32, #tpu.memory_space<vmem>>, vector<32x32xf32>
    %cst_55 = arith.constant dense<0.000000e+00> : vector<8x32xf32>
    %74 = tpu.matmul %57, %73, %cst_55 {dimension_numbers = #tpu.dot_dimension_numbers<[1], [0], [0], [1], [0, 0, 1, 1], [], []>} : vector<8x32xf32>, vector<32x32xf32>, vector<8x32xf32> -> vector<8x32xf32>
    %cst_56 = arith.constant dense<0.000000e+00> : vector<64x32xf32>
    %75 = tpu.matmul %13, %72, %cst_56 {dimension_numbers = #tpu.dot_dimension_numbers<[1], [0], [0], [1], [0, 0, 1, 1], [], []>} : vector<64x8xf32>, vector<8x32xf32>, vector<64x32xf32> -> vector<64x32xf32>
    %cst_57 = arith.constant dense<0.000000e+00> : vector<64x32xf32>
    %76 = tpu.matmul %12, %74, %cst_57 {dimension_numbers = #tpu.dot_dimension_numbers<[1], [0], [0], [1], [0, 0, 1, 1], [], []>} : vector<64x8xf32>, vector<8x32xf32>, vector<64x32xf32> -> vector<64x32xf32>
    %77 = arith.addf %75, %76 : vector<64x32xf32>
    %78 = vector.broadcast %11 : vector<64x1xf32> to vector<64x32xf32>
    %79 = arith.mulf %78, %77 : vector<64x32xf32>
    %c0_58 = arith.constant 0 : index
    %c0_59 = arith.constant 0 : index
    %80 = vector.load %arg20[%c0_58, %c0_59] : memref<32x32xf32, #tpu.memory_space<vmem>>, vector<32x32xf32>
    %cst_60 = arith.constant dense<0.000000e+00> : vector<64x32xf32>
    %81 = tpu.matmul %70, %80, %cst_60 {dimension_numbers = #tpu.dot_dimension_numbers<[1], [0], [0], [1], [0, 0, 1, 1], [], []>} : vector<64x32xf32>, vector<32x32xf32>, vector<64x32xf32> -> vector<64x32xf32>
    %82 = arith.addf %79, %81 : vector<64x32xf32>
    %c0_61 = arith.constant 0 : index
    %c0_62 = arith.constant 0 : index
    %83 = vector.load %arg21[%c0_61, %c0_62] : memref<1x32xf32, #tpu.memory_space<vmem>>, vector<1x32xf32>
    %84 = vector.broadcast %83 : vector<1x32xf32> to vector<64x32xf32>
    %85 = arith.addf %82, %84 : vector<64x32xf32>
    %86 = vector.broadcast %11 : vector<64x1xf32> to vector<64x32xf32>
    %87 = arith.mulf %85, %86 : vector<64x32xf32>
    %c0_63 = arith.constant 0 : index
    %c0_64 = arith.constant 0 : index
    %c0_65 = arith.constant 0 : index
    %88 = vector.load %arg22[%c0_63, %c0_64, %c0_65] : memref<1x8x32xf32, #tpu.memory_space<vmem>>, vector<1x8x32xf32>
    %89 = vector.shape_cast %88 : vector<1x8x32xf32> to vector<8x32xf32>
    %90 = vector.shape_cast %57 : vector<8x32xf32> to vector<1x8x32xf32>
    tpu.vector_store %arg22[%c0_63, %c0_64, %c0_65], %90 {strides = array<i32>} : memref<1x8x32xf32, #tpu.memory_space<vmem>>, vector<1x8x32xf32>,
    %c0_66 = arith.constant 0 : index
    %c0_67 = arith.constant 0 : index
    %c0_68 = arith.constant 0 : index
    %91 = vector.load %arg23[%c0_66, %c0_67, %c0_68] : memref<1x8x3xf32, #tpu.memory_space<vmem>>, vector<1x8x3xf32>
    %92 = vector.shape_cast %91 : vector<1x8x3xf32> to vector<8x3xf32>
    %93 = vector.shape_cast %43 : vector<8x3xf32> to vector<1x8x3xf32>
    tpu.vector_store %arg23[%c0_66, %c0_67, %c0_68], %93 {strides = array<i32>} : memref<1x8x3xf32, #tpu.memory_space<vmem>>, vector<1x8x3xf32>,
    %c0_69 = arith.constant 0 : index
    %c0_70 = arith.constant 0 : index
    %c0_71 = arith.constant 0 : index
    %94 = vector.load %arg24[%c0_69, %c0_70, %c0_71] : memref<1x64x32xf32, #tpu.memory_space<vmem>>, vector<1x64x32xf32>
    %95 = vector.shape_cast %94 : vector<1x64x32xf32> to vector<64x32xf32>
    %96 = vector.shape_cast %87 : vector<64x32xf32> to vector<1x64x32xf32>
    tpu.vector_store %arg24[%c0_69, %c0_70, %c0_71], %96 {strides = array<i32>} : memref<1x64x32xf32, #tpu.memory_space<vmem>>, vector<1x64x32xf32>,
    return
  }
  func.func @transform_0(%arg0: i32) -> (i32, i32, i32) {
    %c0_i32 = arith.constant 0 : i32
    %c0_i32_0 = arith.constant 0 : i32
    %c0_i32_1 = arith.constant 0 : i32
    return %arg0, %c0_i32, %c0_i32_0 : i32, i32, i32
  }
  func.func @transform_1(%arg0: i32) -> (i32, i32, i32) {
    %c0_i32 = arith.constant 0 : i32
    %c0_i32_0 = arith.constant 0 : i32
    %c0_i32_1 = arith.constant 0 : i32
    return %arg0, %c0_i32, %c0_i32_0 : i32, i32, i32
  }
  func.func @transform_2(%arg0: i32) -> (i32, i32, i32) {
    %c0_i32 = arith.constant 0 : i32
    %c0_i32_0 = arith.constant 0 : i32
    %c0_i32_1 = arith.constant 0 : i32
    return %arg0, %c0_i32, %c0_i32_0 : i32, i32, i32
  }
  func.func @transform_3(%arg0: i32) -> (i32, i32, i32) {
    %c0_i32 = arith.constant 0 : i32
    %c0_i32_0 = arith.constant 0 : i32
    %c0_i32_1 = arith.constant 0 : i32
    return %arg0, %c0_i32, %c0_i32_0 : i32, i32, i32
  }
  func.func @transform_4(%arg0: i32) -> (i32, i32, i32) {
    %c0_i32 = arith.constant 0 : i32
    %c0_i32_0 = arith.constant 0 : i32
    %c0_i32_1 = arith.constant 0 : i32
    return %arg0, %c0_i32, %c0_i32_0 : i32, i32, i32
  }
  func.func @transform_5(%arg0: i32) -> (i32, i32, i32) {
    %c0_i32 = arith.constant 0 : i32
    %c0_i32_0 = arith.constant 0 : i32
    %c0_i32_1 = arith.constant 0 : i32
    return %arg0, %c0_i32, %c0_i32_0 : i32, i32, i32
  }
  func.func @transform_6(%arg0: i32) -> (i32, i32) {
    %c0_i32 = arith.constant 0 : i32
    %c0_i32_0 = arith.constant 0 : i32
    %c0_i32_1 = arith.constant 0 : i32
    return %c0_i32, %c0_i32_0 : i32, i32
  }
  func.func @transform_7(%arg0: i32) -> (i32, i32) {
    %c0_i32 = arith.constant 0 : i32
    %c0_i32_0 = arith.constant 0 : i32
    %c0_i32_1 = arith.constant 0 : i32
    return %c0_i32, %c0_i32_0 : i32, i32
  }
  func.func @transform_8(%arg0: i32) -> (i32, i32) {
    %c0_i32 = arith.constant 0 : i32
    %c0_i32_0 = arith.constant 0 : i32
    %c0_i32_1 = arith.constant 0 : i32
    return %c0_i32, %c0_i32_0 : i32, i32
  }
  func.func @transform_9(%arg0: i32) -> (i32, i32) {
    %c0_i32 = arith.constant 0 : i32
    %c0_i32_0 = arith.constant 0 : i32
    %c0_i32_1 = arith.constant 0 : i32
    return %c0_i32, %c0_i32_0 : i32, i32
  }
  func.func @transform_10(%arg0: i32) -> (i32, i32) {
    %c0_i32 = arith.constant 0 : i32
    %c0_i32_0 = arith.constant 0 : i32
    %c0_i32_1 = arith.constant 0 : i32
    return %c0_i32, %c0_i32_0 : i32, i32
  }
  func.func @transform_11(%arg0: i32) -> (i32, i32) {
    %c0_i32 = arith.constant 0 : i32
    %c0_i32_0 = arith.constant 0 : i32
    %c0_i32_1 = arith.constant 0 : i32
    return %c0_i32, %c0_i32_0 : i32, i32
  }
  func.func @transform_12(%arg0: i32) -> (i32, i32) {
    %c0_i32 = arith.constant 0 : i32
    %c0_i32_0 = arith.constant 0 : i32
    %c0_i32_1 = arith.constant 0 : i32
    return %c0_i32, %c0_i32_0 : i32, i32
  }
  func.func @transform_13(%arg0: i32) -> (i32, i32) {
    %c0_i32 = arith.constant 0 : i32
    %c0_i32_0 = arith.constant 0 : i32
    %c0_i32_1 = arith.constant 0 : i32
    return %c0_i32, %c0_i32_0 : i32, i32
  }
  func.func @transform_14(%arg0: i32) -> (i32, i32) {
    %c0_i32 = arith.constant 0 : i32
    %c0_i32_0 = arith.constant 0 : i32
    %c0_i32_1 = arith.constant 0 : i32
    return %c0_i32, %c0_i32_0 : i32, i32
  }
  func.func @transform_15(%arg0: i32) -> (i32, i32) {
    %c0_i32 = arith.constant 0 : i32
    %c0_i32_0 = arith.constant 0 : i32
    %c0_i32_1 = arith.constant 0 : i32
    return %c0_i32, %c0_i32_0 : i32, i32
  }
  func.func @transform_16(%arg0: i32) -> (i32, i32) {
    %c0_i32 = arith.constant 0 : i32
    %c0_i32_0 = arith.constant 0 : i32
    %c0_i32_1 = arith.constant 0 : i32
    return %c0_i32, %c0_i32_0 : i32, i32
  }
  func.func @transform_17(%arg0: i32) -> (i32, i32) {
    %c0_i32 = arith.constant 0 : i32
    %c0_i32_0 = arith.constant 0 : i32
    %c0_i32_1 = arith.constant 0 : i32
    return %c0_i32, %c0_i32_0 : i32, i32
  }
  func.func @transform_18(%arg0: i32) -> (i32, i32) {
    %c0_i32 = arith.constant 0 : i32
    %c0_i32_0 = arith.constant 0 : i32
    %c0_i32_1 = arith.constant 0 : i32
    return %c0_i32, %c0_i32_0 : i32, i32
  }
  func.func @transform_19(%arg0: i32) -> (i32, i32) {
    %c0_i32 = arith.constant 0 : i32
    %c0_i32_0 = arith.constant 0 : i32
    %c0_i32_1 = arith.constant 0 : i32
    return %c0_i32, %c0_i32_0 : i32, i32
  }
  func.func @transform_20(%arg0: i32) -> (i32, i32) {
    %c0_i32 = arith.constant 0 : i32
    %c0_i32_0 = arith.constant 0 : i32
    %c0_i32_1 = arith.constant 0 : i32
    return %c0_i32, %c0_i32_0 : i32, i32
  }
  func.func @transform_21(%arg0: i32) -> (i32, i32, i32) {
    %c0_i32 = arith.constant 0 : i32
    %c0_i32_0 = arith.constant 0 : i32
    %c0_i32_1 = arith.constant 0 : i32
    return %arg0, %c0_i32, %c0_i32_0 : i32, i32, i32
  }
  func.func @transform_22(%arg0: i32) -> (i32, i32, i32) {
    %c0_i32 = arith.constant 0 : i32
    %c0_i32_0 = arith.constant 0 : i32
    %c0_i32_1 = arith.constant 0 : i32
    return %arg0, %c0_i32, %c0_i32_0 : i32, i32, i32
  }
  func.func @transform_23(%arg0: i32) -> (i32, i32, i32) {
    %c0_i32 = arith.constant 0 : i32
    %c0_i32_0 = arith.constant 0 : i32
    %c0_i32_1 = arith.constant 0 : i32
    return %arg0, %c0_i32, %c0_i32_0 : i32, i32, i32
  }
}

module attributes {stable_mosaic.version = 11 : i64} {
  func.func @_head_vel_kernel(%arg0: i32, %arg1: memref<1x8x32xf32, #tpu.memory_space<vmem>>, %arg2: memref<1x8x3xf32, #tpu.memory_space<vmem>>, %arg3: memref<1x8x3xf32, #tpu.memory_space<vmem>>, %arg4: memref<1x8x1xf32, #tpu.memory_space<vmem>>, %arg5: memref<32x64xf32, #tpu.memory_space<vmem>>, %arg6: memref<1x64xf32, #tpu.memory_space<vmem>>, %arg7: memref<64x32xf32, #tpu.memory_space<vmem>>, %arg8: memref<1x32xf32, #tpu.memory_space<vmem>>, %arg9: memref<32x7xf32, #tpu.memory_space<vmem>>, %arg10: memref<1x8x7xf32, #tpu.memory_space<vmem>>, %arg11: memref<1x8x3xf32, #tpu.memory_space<vmem>>) attributes {dimension_semantics = [#tpu.dimension_semantics<parallel>], iteration_bounds = array<i64: 2>, scalar_prefetch = 0 : i64, scratch_operands = 0 : i64, tpu.core_type = #tpu.core_type<tc>, window_params = [{transform_indices = @transform_0, window_bounds = array<i64: 1, 8, 32>}, {transform_indices = @transform_1, window_bounds = array<i64: 1, 8, 3>}, {transform_indices = @transform_2, window_bounds = array<i64: 1, 8, 3>}, {transform_indices = @transform_3, window_bounds = array<i64: 1, 8, 1>}, {pipeline_mode = #tpu.pipeline_mode<synchronous>, transform_indices = @transform_4, window_bounds = array<i64: 32, 64>}, {pipeline_mode = #tpu.pipeline_mode<synchronous>, transform_indices = @transform_5, window_bounds = array<i64: 1, 64>}, {pipeline_mode = #tpu.pipeline_mode<synchronous>, transform_indices = @transform_6, window_bounds = array<i64: 64, 32>}, {pipeline_mode = #tpu.pipeline_mode<synchronous>, transform_indices = @transform_7, window_bounds = array<i64: 1, 32>}, {pipeline_mode = #tpu.pipeline_mode<synchronous>, transform_indices = @transform_8, window_bounds = array<i64: 32, 7>}, {transform_indices = @transform_9, window_bounds = array<i64: 1, 8, 7>}, {transform_indices = @transform_10, window_bounds = array<i64: 1, 8, 3>}]} {
    %c0 = arith.constant 0 : index
    %c0_0 = arith.constant 0 : index
    %c0_1 = arith.constant 0 : index
    %0 = vector.load %arg4[%c0, %c0_0, %c0_1] : memref<1x8x1xf32, #tpu.memory_space<vmem>>, vector<1x8x1xf32>
    %1 = vector.shape_cast %0 : vector<1x8x1xf32> to vector<8x1xf32>
    %c0_2 = arith.constant 0 : index
    %c0_3 = arith.constant 0 : index
    %c0_4 = arith.constant 0 : index
    %2 = vector.load %arg1[%c0_2, %c0_3, %c0_4] : memref<1x8x32xf32, #tpu.memory_space<vmem>>, vector<1x8x32xf32>
    %3 = vector.shape_cast %2 : vector<1x8x32xf32> to vector<8x32xf32>
    %c0_5 = arith.constant 0 : index
    %c0_6 = arith.constant 0 : index
    %4 = vector.load %arg5[%c0_5, %c0_6] : memref<32x64xf32, #tpu.memory_space<vmem>>, vector<32x64xf32>
    %cst = arith.constant dense<0.000000e+00> : vector<8x64xf32>
    %5 = tpu.matmul %3, %4, %cst {dimension_numbers = #tpu.dot_dimension_numbers<[1], [0], [0], [1], [0, 0, 1, 1], [], []>} : vector<8x32xf32>, vector<32x64xf32>, vector<8x64xf32> -> vector<8x64xf32>
    %c0_7 = arith.constant 0 : index
    %c0_8 = arith.constant 0 : index
    %6 = vector.load %arg6[%c0_7, %c0_8] : memref<1x64xf32, #tpu.memory_space<vmem>>, vector<1x64xf32>
    %7 = vector.broadcast %6 : vector<1x64xf32> to vector<8x64xf32>
    %8 = arith.addf %5, %7 : vector<8x64xf32>
    %cst_9 = arith.constant 0.000000e+00 : f32
    %9 = vector.broadcast %cst_9 : f32 to vector<8x64xf32>
    %10 = arith.maximumf %8, %9 : vector<8x64xf32>
    %c0_10 = arith.constant 0 : index
    %c0_11 = arith.constant 0 : index
    %11 = vector.load %arg7[%c0_10, %c0_11] : memref<64x32xf32, #tpu.memory_space<vmem>>, vector<64x32xf32>
    %cst_12 = arith.constant dense<0.000000e+00> : vector<8x32xf32>
    %12 = tpu.matmul %10, %11, %cst_12 {dimension_numbers = #tpu.dot_dimension_numbers<[1], [0], [0], [1], [0, 0, 1, 1], [], []>} : vector<8x64xf32>, vector<64x32xf32>, vector<8x32xf32> -> vector<8x32xf32>
    %c0_13 = arith.constant 0 : index
    %c0_14 = arith.constant 0 : index
    %13 = vector.load %arg8[%c0_13, %c0_14] : memref<1x32xf32, #tpu.memory_space<vmem>>, vector<1x32xf32>
    %14 = vector.broadcast %13 : vector<1x32xf32> to vector<8x32xf32>
    %15 = arith.addf %12, %14 : vector<8x32xf32>
    %cst_15 = arith.constant 0.000000e+00 : f32
    %16 = vector.broadcast %cst_15 : f32 to vector<8x32xf32>
    %17 = arith.maximumf %15, %16 : vector<8x32xf32>
    %c0_16 = arith.constant 0 : index
    %c0_17 = arith.constant 0 : index
    %18 = vector.load %arg9[%c0_16, %c0_17] : memref<32x7xf32, #tpu.memory_space<vmem>>, vector<32x7xf32>
    %cst_18 = arith.constant dense<0.000000e+00> : vector<8x7xf32>
    %19 = tpu.matmul %17, %18, %cst_18 {dimension_numbers = #tpu.dot_dimension_numbers<[1], [0], [0], [1], [0, 0, 1, 1], [], []>} : vector<8x32xf32>, vector<32x7xf32>, vector<8x7xf32> -> vector<8x7xf32>
    %20 = vector.broadcast %1 : vector<8x1xf32> to vector<8x7xf32>
    %21 = arith.mulf %19, %20 : vector<8x7xf32>
    %c0_19 = arith.constant 0 : index
    %c0_20 = arith.constant 0 : index
    %c0_21 = arith.constant 0 : index
    %22 = vector.load %arg10[%c0_19, %c0_20, %c0_21] : memref<1x8x7xf32, #tpu.memory_space<vmem>>, vector<1x8x7xf32>
    %23 = vector.shape_cast %22 : vector<1x8x7xf32> to vector<8x7xf32>
    %24 = vector.shape_cast %21 : vector<8x7xf32> to vector<1x8x7xf32>
    tpu.vector_store %arg10[%c0_19, %c0_20, %c0_21], %24 {strides = array<i32>} : memref<1x8x7xf32, #tpu.memory_space<vmem>>, vector<1x8x7xf32>,
    %c0_22 = arith.constant 0 : index
    %c0_23 = arith.constant 0 : index
    %c0_24 = arith.constant 0 : index
    %25 = vector.load %arg2[%c0_22, %c0_23, %c0_24] : memref<1x8x3xf32, #tpu.memory_space<vmem>>, vector<1x8x3xf32>
    %26 = vector.shape_cast %25 : vector<1x8x3xf32> to vector<8x3xf32>
    %c0_25 = arith.constant 0 : index
    %c0_26 = arith.constant 0 : index
    %c0_27 = arith.constant 0 : index
    %27 = vector.load %arg3[%c0_25, %c0_26, %c0_27] : memref<1x8x3xf32, #tpu.memory_space<vmem>>, vector<1x8x3xf32>
    %28 = vector.shape_cast %27 : vector<1x8x3xf32> to vector<8x3xf32>
    %29 = arith.subf %26, %28 : vector<8x3xf32>
    %30 = vector.broadcast %1 : vector<8x1xf32> to vector<8x3xf32>
    %31 = arith.mulf %29, %30 : vector<8x3xf32>
    %cst_28 = arith.constant dense<0.000000e+00> : vector<1xf32>
    %32 = vector.multi_reduction <add>, %1, %cst_28 [0] : vector<8x1xf32> to vector<1xf32>
    %33 = vector.shape_cast %32 : vector<1xf32> to vector<1x1xf32>
    %cst_29 = arith.constant 1.000000e+00 : f32
    %34 = vector.broadcast %cst_29 : f32 to vector<1x1xf32>
    %35 = arith.maximumf %33, %34 : vector<1x1xf32>
    %cst_30 = arith.constant dense<0.000000e+00> : vector<3xf32>
    %36 = vector.multi_reduction <add>, %31, %cst_30 [0] : vector<8x3xf32> to vector<3xf32>
    %37 = vector.shape_cast %36 : vector<3xf32> to vector<1x3xf32>
    %38 = vector.broadcast %35 : vector<1x1xf32> to vector<1x3xf32>
    %39 = arith.divf %37, %38 : vector<1x3xf32>
    %40 = vector.broadcast %39 : vector<1x3xf32> to vector<8x3xf32>
    %41 = vector.broadcast %1 : vector<8x1xf32> to vector<8x3xf32>
    %42 = arith.mulf %40, %41 : vector<8x3xf32>
    %43 = arith.subf %31, %42 : vector<8x3xf32>
    %c0_31 = arith.constant 0 : index
    %c0_32 = arith.constant 0 : index
    %c0_33 = arith.constant 0 : index
    %44 = vector.load %arg11[%c0_31, %c0_32, %c0_33] : memref<1x8x3xf32, #tpu.memory_space<vmem>>, vector<1x8x3xf32>
    %45 = vector.shape_cast %44 : vector<1x8x3xf32> to vector<8x3xf32>
    %46 = vector.shape_cast %43 : vector<8x3xf32> to vector<1x8x3xf32>
    tpu.vector_store %arg11[%c0_31, %c0_32, %c0_33], %46 {strides = array<i32>} : memref<1x8x3xf32, #tpu.memory_space<vmem>>, vector<1x8x3xf32>,
    return
  }
  func.func @transform_0(%arg0: i32) -> (i32, i32, i32) {
    %c0_i32 = arith.constant 0 : i32
    %c0_i32_0 = arith.constant 0 : i32
    %c0_i32_1 = arith.constant 0 : i32
    return %arg0, %c0_i32, %c0_i32_0 : i32, i32, i32
  }
  func.func @transform_1(%arg0: i32) -> (i32, i32, i32) {
    %c0_i32 = arith.constant 0 : i32
    %c0_i32_0 = arith.constant 0 : i32
    %c0_i32_1 = arith.constant 0 : i32
    return %arg0, %c0_i32, %c0_i32_0 : i32, i32, i32
  }
  func.func @transform_2(%arg0: i32) -> (i32, i32, i32) {
    %c0_i32 = arith.constant 0 : i32
    %c0_i32_0 = arith.constant 0 : i32
    %c0_i32_1 = arith.constant 0 : i32
    return %arg0, %c0_i32, %c0_i32_0 : i32, i32, i32
  }
  func.func @transform_3(%arg0: i32) -> (i32, i32, i32) {
    %c0_i32 = arith.constant 0 : i32
    %c0_i32_0 = arith.constant 0 : i32
    %c0_i32_1 = arith.constant 0 : i32
    return %arg0, %c0_i32, %c0_i32_0 : i32, i32, i32
  }
  func.func @transform_4(%arg0: i32) -> (i32, i32) {
    %c0_i32 = arith.constant 0 : i32
    %c0_i32_0 = arith.constant 0 : i32
    %c0_i32_1 = arith.constant 0 : i32
    return %c0_i32, %c0_i32_0 : i32, i32
  }
  func.func @transform_5(%arg0: i32) -> (i32, i32) {
    %c0_i32 = arith.constant 0 : i32
    %c0_i32_0 = arith.constant 0 : i32
    %c0_i32_1 = arith.constant 0 : i32
    return %c0_i32, %c0_i32_0 : i32, i32
  }
  func.func @transform_6(%arg0: i32) -> (i32, i32) {
    %c0_i32 = arith.constant 0 : i32
    %c0_i32_0 = arith.constant 0 : i32
    %c0_i32_1 = arith.constant 0 : i32
    return %c0_i32, %c0_i32_0 : i32, i32
  }
  func.func @transform_7(%arg0: i32) -> (i32, i32) {
    %c0_i32 = arith.constant 0 : i32
    %c0_i32_0 = arith.constant 0 : i32
    %c0_i32_1 = arith.constant 0 : i32
    return %c0_i32, %c0_i32_0 : i32, i32
  }
  func.func @transform_8(%arg0: i32) -> (i32, i32) {
    %c0_i32 = arith.constant 0 : i32
    %c0_i32_0 = arith.constant 0 : i32
    %c0_i32_1 = arith.constant 0 : i32
    return %c0_i32, %c0_i32_0 : i32, i32
  }
  func.func @transform_9(%arg0: i32) -> (i32, i32, i32) {
    %c0_i32 = arith.constant 0 : i32
    %c0_i32_0 = arith.constant 0 : i32
    %c0_i32_1 = arith.constant 0 : i32
    return %arg0, %c0_i32, %c0_i32_0 : i32, i32, i32
  }
  func.func @transform_10(%arg0: i32) -> (i32, i32, i32) {
    %c0_i32 = arith.constant 0 : i32
    %c0_i32_0 = arith.constant 0 : i32
    %c0_i32_1 = arith.constant 0 : i32
    return %arg0, %c0_i32, %c0_i32_0 : i32, i32, i32
  }
}

</mosaic_0001>

<bundles_post_ra>
// kernel: _lambda_.5
= control target key start
LH: loop header
LB: loop body
LE: loop exit
PB: predicated region body
PF: predicated region fallthrough
CT: control target
= control target key end

     0   :  { %s2570_s24 = smov 0   ;;  %s2899_s0 = inlined_call_operand.vmem [shape: f32[2,8,7], index: 0, kind: input, shape index: {}]   ;;  %s2900_s1 = inlined_call_operand.vmem [shape: f32[2,8,3], index: 1, kind: input, shape index: {}]   ;;  %s2901_s2 = inlined_call_operand.vmem [shape: f32[2,8,1], index: 2, kind: input, shape index: {}]   ;;  %s2902_s3 = inlined_call_operand.vmem [shape: f32[2,64,1], index: 3, kind: input, shape index: {}]   ;;  %s2903_s4 = inlined_call_operand.vmem [shape: f32[64,8], index: 4, kind: input, shape index: {}]   ;;  %s2904_s5 = inlined_call_operand.vmem [shape: f32[64,8], index: 5, kind: input, shape index: {}]   ;;  %s2905_s6 = inlined_call_operand.vmem [shape: f32[7,32], index: 6, kind: input, shape index: {}]   ;;  %s2906_s7 = inlined_call_operand.vmem [shape: f32[1,32], index: 7, kind: input, shape index: {}]   ;;  %s2907_s8 = inlined_call_operand.vmem [shape: f32[1,32], index: 8, kind: input, shape index: {}]   ;;  %s2908_s9 = inlined_call_operand.vmem [shape: f32[1,32], index: 9, kind: input, shape index: {}]   ;;  %s2909_s10 = inlined_call_operand.vmem [shape: f32[32,32], index: 10, kind: input, shape index: {}]   ;;  %s2910_s11 = inlined_call_operand.vmem [shape: f32[1,32], index: 11, kind: input, shape index: {}]   ;;  %s2911_s12 = inlined_call_operand.vmem [shape: f32[32,32], index: 12, kind: input, shape index: {}]   ;;  %s2912_s13 = inlined_call_operand.vmem [shape: f32[32,32], index: 13, kind: input, shape index: {}]   ;;  %s2913_s14 = inlined_call_operand.vmem [shape: f32[32,32], index: 14, kind: input, shape index: {}]   ;;  %s2914_s15 = inlined_call_operand.vmem [shape: f32[1,32], index: 15, kind: input, shape index: {}]   ;;  %s2915_s16 = inlined_call_operand.vmem [shape: f32[2,8,32], index: 16, kind: output, shape index: {0}]   ;;  %s2916_s17 = inlined_call_operand.vmem [shape: f32[2,64,32], index: 17, kind: output, shape index: {1}]  }
   0x1   :  { %2917 = sst [smem:[#allocation2_spill]] %s2899_s0 }
   0x2   :  { %2918 = sst [smem:[#allocation3_spill]] %s2900_s1 }
   0x3 LB: > { %s2067_s25 = sadd.s32 4294967295, %s2474_s24   ;;  %p2071_p0 = scmp.ge.s32.totalorder %s2474_s24, 1  ;;  %s2474_s24 = sphi %s2570_s24, %s28_s24  }
   0x4   : > { %p517_p1 = scmp.lt.s32.totalorder %s2474_s24, 3 }
   0x6   : > { %p518_p2 = pnand %p2071_p0, %p517_p1 }
   0x7   : > { %p585_p3 = scmp.lt.s32.totalorder (!%p518_p2), %s2067_s25, 1  ;;  %v2581_v0 = vld [vmem:[%s2903_s4] sm:$0xff] (!%p518_p2)  ;;  %vm724_vm0 = vcmask (!%p518_p2), 64512   ;;  %v2476_v1 = vmov (!%p518_p2), 0   ;;  %v2477_v2 = vmov (!%p518_p2), 0.0   ;;  %s2919_s1 = sld [smem:[#allocation3_spill]] (!%p518_p2) }
   0x8   : > { %521 = sbr.rel (%p518_p2) target bundleno = 1162 (0x48a), region = 84  ;;  %2402 = vset.pattern.permute.xlu0 (!%p518_p2), %v2476_v1  ;;  %2236 = vmatprep.mubr.msk.f32.mxu1 (!%p518_p2), %vm724_vm0, %v2581_v0  ;;  %v627_v4 = vld [vmem:[%s2905_s6] sm:$0x7f] (!%p518_p2)  ;;  %vm639_vm1 = vcmask (!%p518_p2), 1046528   ;;  %v2605_v6 = vld [vmem:[%s2903_s4 + $0x8] sm:$0xff] (!%p518_p2)  ;;  %vm2478_vm2 = vmmov (!%p518_p2), 0  }
   0x9   : > { %2229 = vmatprep.subr.mxu0 (!%p518_p2), %v2477_v2  ;;  %2403 = vset.pattern.permute.xlu1 (!%p518_p2), %v2476_v1  ;;  %v2612_v7 = vld [vmem:[%s2903_s4 + $0x10] sm:$0xff] (!%p518_p2)  ;;  %v2621_v8 = vld [vmem:[%s2903_s4 + $0x18] sm:$0xff] (!%p518_p2)  ;;  %v2626_v9 = vld [vmem:[%s2903_s4 + $0x20] sm:$0xff] (!%p518_p2)  ;;  %s2920_s23 = sld [smem:[#allocation2_spill]] (!%p518_p2)  ;;  %vm635_vm3 = vcmask (!%p518_p2), 56320   ;;  %v2479_v26 = vmov (!%p518_p2), 0.0|0.0  }
   0xa   : > { %2230 = vmatpush3.msk.msra.mxu0 (!%p518_p2), %vm639_vm1, %v627_v4  ;;  %2231 = vmatprep.mubr.msk.f32.mxu0 (!%p518_p2), %vm2478_vm2, %v2477_v2  ;;  %v2635_v10 = vld [vmem:[%s2903_s4 + $0x28] sm:$0xff] (!%p518_p2)  ;;  %v2640_v11 = vld [vmem:[%s2903_s4 + $0x30] sm:$0xff] (!%p518_p2)  ;;  %v2649_v12 = vld [vmem:[%s2903_s4 + $0x38] sm:$0xff] (!%p518_p2)  ;;  %vm1177_vm4 = vcmask (!%p518_p2), 261120   ;;  %vm1007_vm5 = vcmask (!%p518_p2), 23552  }
   0xb   : > { %v2654_v13 = vld [vmem:[%s2904_s5 + $0x20] sm:$0xff] (!%p518_p2)  ;;  %v2663_v14 = vld [vmem:[%s2904_s5 + $0x28] sm:$0xff] (!%p518_p2)  ;;  %v2668_v15 = vld [vmem:[%s2904_s5 + $0x30] sm:$0xff] (!%p518_p2) }
   0xc   : > { %v2677_v16 = vld [vmem:[%s2904_s5 + $0x38] sm:$0xff] (!%p518_p2)  ;;  %v2688_v20 = vld [vmem:[%s2904_s5] sm:$0xff] (!%p518_p2)  ;;  %v1364_v22 = vld [vmem:[%s2911_s12 + $0x8] sm:$0xff] (!%p518_p2) }
   0xd   : > { %v1363_v21 = vld [vmem:[%s2911_s12] sm:$0xff] (!%p518_p2)  ;;  %v2701_v23 = vld [vmem:[%s2904_s5 + $0x8] sm:$0xff] (!%p518_p2)  ;;  %v2706_v25 = vld [vmem:[%s2904_s5 + $0x10] sm:$0xff] (!%p518_p2) }
   0xe   : > { %v2361_v24 = vpack.c.bf16 (!%p518_p2), %v1364_v22, %v1363_v21  ;;  %v2715_v27 = vld [vmem:[%s2904_s5 + $0x18] sm:$0xff] (!%p518_p2)  ;;  %v1365_v28 = vld [vmem:[%s2911_s12 + $0x10] sm:$0xff] (!%p518_p2)  ;;  %v2080_v47 = vld [vmem:[%s2906_s7] ss:$0 sm:$0xff] (!%p518_p2) }
   0xf   : > { %s2922_s25 = smov (!%p585_p3, %s2067_s25), 1  ;;  %v1366_v29 = vld [vmem:[%s2911_s12 + $0x18] sm:$0xff]  ;;  %v1440_v51 = vld [vmem:[%s2912_s13] sm:$0xff]  ;;  %v1441_v52 = vld [vmem:[%s2912_s13 + $0x8] sm:$0xff] }
  0x10   : > { %s2589_s28 = sshll.u32 %s2922_s25, 3  ;;  %v2364_v30 = vpack.c.bf16 %v1366_v29, %v1365_v28  ;;  %v2367_v55 = vpack.c.bf16 %v1441_v52, %v1440_v51  ;;  %v1442_v59 = vld [vmem:[%s2912_s13 + $0x10] sm:$0xff]  ;;  %v1443_v60 = vld [vmem:[%s2912_s13 + $0x18] sm:$0xff] }
  0x11   : > { %s596_s30 = scalar_lea.vmem %s2901_s2, %s2589_s28  ;;  %s592_s20 = scalar_lea.vmem %s2919_s1, %s2589_s28 }
  0x12   : > { %v611_v3 = vld [vmem:[%s596_s30] sm:$0xff]  ;;  %s588_s26 = scalar_lea.vmem %s2920_s23, %s2589_s28  ;;  %s605_s27 = scalar_lea.vmem %s2915_s16, %s2589_s28 }
  0x13   : > { %623 = vperm.xlu0 %2402, %v611_v3   ;;  %v715_v5 = vld [vmem:[%s592_s20] sm:$0xff]  ;;  %v2370_v3 = vpack.c.bf16 %v1443_v60, %v1442_v59  ;;  %s2155_s28 = sshll.u32 %s2922_s25, 6  ;;  %v1167_v59 = vld [vmem:[%s2909_s10 + $0x8] sm:$0xff] }
  0x14   : > { %2234 = vmatprep.subr.mxu1 %v715_v5  ;;  %2248 = vmatprep.subr.mxu0 %v715_v5  ;;  %v620_v17 = vld [vmem:[%s588_s26] sm:$0xff]  ;;  %s601_s20 = scalar_lea.vmem %s2902_s3, %s2155_s28  ;;  %s2872_s23 = scalar_lea.vmem %s2916_s17, %s2155_s28 }
  0x15   : > { %2235 = vmatpush3.msra.mxu1 %v715_v5  ;;  %v618_v52 = vld [vmem:[%s601_s20 + $0x30] sm:$0xff] }
  0x16   : > { %2237 = vmatmul.mubr.msk.f32.vlgmr.msra.gmra.mrb[0].mxu1 %vm724_vm0, %v2605_v6  ;;  %2380 = vmatprep.subr.mxu1 %v715_v5 }
  0x17   : > { %2239 = vmatprep.mubr.msk.f32.mxu1 %vm724_vm0, %v2612_v7  ;;  %2381 = vmatpush3.msra.mxu1 %v715_v5 }
  0x1a   : > { %2240 = vmatmul.mubr.msk.f32.gmra.mrb[2].mxu1 %vm724_vm0, %v2621_v8 }
  0x1b   : > { %2242 = vmatprep.mubr.msk.f32.mxu1 %vm724_vm0, %v2626_v9 }
  0x1e   : > { %2243 = vmatmul.mubr.msk.f32.gmra.mrb[4].mxu1 %vm724_vm0, %v2635_v10 }
  0x1f   : > { %2245 = vmatprep.mubr.msk.f32.mxu1 %vm724_vm0, %v2640_v11 }
  0x22   : > { %2246 = vmatmul.mubr.msk.f32.gmra.mrb[6].mxu1 %vm724_vm0, %v2649_v12 }
  0x23   : > { %2256 = vmatprep.mubr.msk.f32.mxu1 %vm724_vm0, %v2654_v13 }
  0x26   : > { %2257 = vmatmul.mubr.msk.f32.vlgmr.msra.gmra.mrb[8].mxu1 %vm724_vm0, %v2663_v14 }
  0x27   : > { %2259 = vmatprep.mubr.msk.f32.mxu1 %vm724_vm0, %v2668_v15 }
  0x2a   : > { %2260 = vmatmul.mubr.msk.f32.gmra.mrb[10].mxu1 %vm724_vm0, %v2677_v16 }
  0x92   : > { %v624_v18 = vpop.permute.xlu0 %623 }
  0x93   : > { %v626_v19 = vmul.f32 %v624_v18, %v620_v17 }
  0x95   : > { %2232 = vmatmul.mubr.msk.f32.vlgmr.msra.gmra.mrb[0].mxu0 %vm635_vm3, %v626_v19 }
  0x96   : > { %2249 = vmatpush3.msra.mxu0 %v715_v5  ;;  %2250 = vmatprep.mubr.msk.f32.mxu0 %vm724_vm0, %v2688_v20 }
  0x97   : > { %2360 = vmatprep.subr.bf16.mxu0 %v2479_v26 }
  0x99   : > { %2251 = vmatmul.mubr.msk.f32.vlgmr.msra.gmra.mrb[2].mxu0 %vm724_vm0, %v2701_v23 }
  0x9a   : > { %2253 = vmatprep.mubr.msk.f32.mxu0 %vm724_vm0, %v2706_v25  ;;  %2362 = vmatpush3.bf16.msra.mxu0 %v2361_v24 }
  0x9b   : > { %2363 = vmatprep.subr.bf16.mxu0 %v2479_v26 }
  0x9d   : > { %2254 = vmatmul.mubr.msk.f32.gmra.mrb[4].mxu0 %vm724_vm0, %v2715_v27 }
  0x9e   : > { %2290 = vmatprep.mubr.msk.f32.mxu0 %vm2478_vm2, %v2477_v2  ;;  %2365 = vmatpush3.bf16.msra.mxu0 %v2364_v30 }
  0x9f   : > { %2366 = vmatprep.subr.bf16.mxu0 %v2479_v26 }
  0xe9   : > { %v2238_v31 = vpop.f32.mrb[0].mxu1 }
  0xea   : > { %v815_v32 = vpop.f32.mrb[1].mxu1 }
  0xed   : > { %v2241_v33 = vpop.f32.mrb[2].mxu1 }
  0xee   : > { %v825_v34 = vpop.f32.mrb[3].mxu1 }
  0xf1   : > { %v2244_v35 = vpop.f32.mrb[4].mxu1 }
  0xf2   : > { %v835_v36 = vpop.f32.mrb[5].mxu1 }
  0xf5   : > { %v2247_v37 = vpop.f32.mrb[6].mxu1 }
  0xf6   : > { %v845_v38 = vpop.f32.mrb[7].mxu1 }
  0xf9   : > { %v2258_v39 = vpop.f32.mrb[8].mxu1 }
  0xfa   : > { %v996_v40 = vsub.f32 %v2244_v35, %v2258_v39  ;;  %v972_v41 = vpop.f32.mrb[9].mxu1  ;;  %v612_v35 = vld [vmem:[%s601_s20] sm:$0xff] }
  0xfb   : > { %v995_v42 = vsub.f32 %v835_v36, %v972_v41  ;;  %v615_v41 = vld [vmem:[%s601_s20 + $0x18] sm:$0xff] }
  0xfc   : > { %v1004_v28 = vmul.f32 %v996_v40, %v996_v40 }
  0xfd   : > { %v2261_v43 = vpop.f32.mrb[10].mxu1  ;;  %v1003_v4 = vmul.f32 %v995_v42, %v995_v42 }
  0xfe   : > { %v998_v44 = vsub.f32 %v2247_v37, %v2261_v43  ;;  %v982_v45 = vpop.f32.mrb[11].mxu1 }
  0xff   : > { %v997_v46 = vsub.f32 %v845_v38, %v982_v45  ;;  %v1020_v24 = vsel %vm1007_vm5, %v1003_v4, 0.0 }
 0x101   : > { %v1005_v30 = vmul.f32 %v997_v46, %v997_v46 }
 0x168   : > { %v709_v48 = vpop.f32.mrb[0].mxu0 }
 0x169   : > { %v710_v49 = vadd.f32 %v2080_v47, %v709_v48  ;;  %v2233_v50 = vpop.f32.mrb[1].mxu0  ;;  %v616_v47 = vld [vmem:[%s601_s20 + $0x20] sm:$0xff]  ;;  %v617_v48 = vld [vmem:[%s601_s20 + $0x28] sm:$0xff] }
 0x16b   : > { %v713_v53 = vmax.f32 %v710_v49, 0.0 }
 0x16c   : > { %v2252_v54 = vpop.f32.mrb[2].mxu0 }
 0x16d   : > { %v714_v56 = vmul.f32 %v713_v53, %v624_v18  ;;  %v992_v57 = vsub.f32 %v2238_v31, %v2252_v54  ;;  %v952_v58 = vpop.f32.mrb[3].mxu0  ;;  %v1023_v31 = vsel %vm1007_vm5, %v1004_v28, 0.0 }
 0x16e   : > { %v991_v61 = vsub.f32 %v815_v32, %v952_v58  ;;  %v1006_v32 = vmul.f32 %v998_v44, %v998_v44  ;;  %v614_v44 = vld [vmem:[%s601_s20 + $0x10] sm:$0xff]  ;;  %v1166_v58 = vld [vmem:[%s2909_s10] sm:$0xff] }
 0x16f   : > { %1936 = vst.msk [vmem:[%s605_s27] sm:$0xff] %vm1177_vm4, %v714_v56  ;;  %v1000_v62 = vmul.f32 %v992_v57, %v992_v57  ;;  %2291 = vmatmul.mubr.msk.f32.vlgmr.msra.gmra.mrb[6].mxu0 %vm1177_vm4, %v714_v56  ;;  %v2352_v60 = vpack.c.bf16 %v1167_v59, %v1166_v58 }
 0x170   : > { %v999_v63 = vmul.f32 %v991_v61, %v991_v61  ;;  %2368 = vmatpush3.bf16.msra.mxu0 %v2367_v55  ;;  %v2255_v1 = vpop.f32.mrb[4].mxu0  ;;  %2301 = vmatprep.mubr.msk.f32.mxu0 %vm2478_vm2, %v2477_v2  ;;  %v619_v55 = vld [vmem:[%s601_s20 + $0x38] sm:$0xff]  ;;  %v1168_v61 = vld [vmem:[%s2909_s10 + $0x10] sm:$0xff] }
 0x171   : > { %v994_v5 = vsub.f32 %v2241_v33, %v2255_v1  ;;  %v962_v17 = vpop.f32.mrb[5].mxu0  ;;  %2369 = vmatprep.subr.bf16.mxu0 %v2479_v26  ;;  %v1011_v18 = vsel %vm1007_vm5, %v1000_v62, 0.0  ;;  %v1026_v33 = vsel %vm1007_vm5, %v1005_v30, 0.0  ;;  %2353 = vmatprep.subr.bf16.mxu1 %v2352_v60  ;;  %v1169_v62 = vld [vmem:[%s2909_s10 + $0x18] sm:$0xff] }
 0x172   : > { %v993_v19 = vsub.f32 %v825_v34, %v962_v17  ;;  %1012 = vadd.xlane.f32.xlu1 %v1011_v18  ;;  %v1008_v21 = vsel %vm1007_vm5, %v999_v63, 0.0  ;;  %v1029_v34 = vsel %vm1007_vm5, %v1006_v32, 0.0  ;;  %2355 = vmatpush3.bf16.msra.mxu1 %v2352_v60  ;;  %v2356_v63 = vpack.c.bf16 %v1169_v62, %v1168_v61 }
 0x173   : > { %1009 = vadd.xlane.f32.xlu0 %v1008_v21  ;;  %v1002_v22 = vmul.f32 %v994_v5, %v994_v5 }
 0x174   : > { %2371 = vmatpush3.bf16.msra.mxu0 %v2370_v3  ;;  %v1001_v2 = vmul.f32 %v993_v19, %v993_v19  ;;  %2357 = vmatprep.subr.bf16.mxu1 %v2356_v63 }
 0x175   : > { %v1017_v26 = vsel %vm1007_vm5, %v1002_v22, 0.0 }
 0x176   : > { %1021 = vadd.xlane.f32.xlu1 %v1020_v24  ;;  %v1014_v29 = vsel %vm1007_vm5, %v1001_v2, 0.0  ;;  %2359 = vmatpush3.bf16.msra.mxu1 %v2356_v63 }
 0x177   : > { %2302 = vmatmul.mubr.msk.f32.vlgmr.msra.gmra.mrb[8].mxu0 %vm1177_vm4, %v714_v56 }
 0x178   : > { %2306 = vmatprep.mubr.msk.f32.mxu0 %vm724_vm0, %v2581_v0  ;;  %v613_v0 = vld [vmem:[%s601_s20 + $0x8] sm:$0xff] }
 0x17a   : > { %1018 = vadd.xlane.f32.xlu1 %v1017_v26 }
 0x17e   : > { %1015 = vadd.xlane.f32.xlu1 %v1014_v29 }
 0x182   : > { %1024 = vadd.xlane.f32.xlu1 %v1023_v31 }
 0x186   : > { %1027 = vadd.xlane.f32.xlu1 %v1026_v33 }
 0x18a   : > { %1030 = vadd.xlane.f32.xlu1 %v1029_v34 }
 0x1ff   : > { %v1013_v36 = vpop.xlane.xlu1 %1012 }
 0x200   : > { %v1033_v37 = vmul.f32 %v1013_v36, %v613_v0  ;;  %v1010_v38 = vpop.xlane.xlu0 %1009 }
 0x201   : > { %v1032_v39 = vmul.f32 %v1010_v38, %v612_v35 }
 0x202   : > { %1048 = vperm.xlu0 %2402, %v1033_v37  }
 0x203   : > { %v1022_v40 = vpop.xlane.xlu1 %1021  ;;  %1043 = vperm.xlu1 %2403, %v1032_v39  }
 0x204   : > { %v1036_v50 = vmul.f32 %v1022_v40, %v616_v47 }
 0x207   : > { %v1019_v42 = vpop.xlane.xlu1 %1018 }
 0x208   : > { %v1035_v43 = vmul.f32 %v1019_v42, %v615_v41 }
 0x20a   : > { %1058 = vperm.xlu1 %2403, %v1035_v43  }
 0x20b   : > { %v1016_v45 = vpop.xlane.xlu1 %1015 }
 0x20c   : > { %v1034_v46 = vmul.f32 %v1016_v45, %v614_v44 }
 0x20e   : > { %1053 = vperm.xlu1 %2403, %v1034_v46  }
 0x20f   : > { %v1025_v49 = vpop.xlane.xlu1 %1024 }
 0x210   : > { %v1037_v51 = vmul.f32 %v1025_v49, %v617_v48 }
 0x212   : > { %1063 = vperm.xlu1 %2403, %v1036_v50   ;;  %1068 = vperm.xlu0 %2402, %v1037_v51  }
 0x213   : > { %v1028_v53 = vpop.xlane.xlu1 %1027 }
 0x214   : > { %v1038_v54 = vmul.f32 %v1028_v53, %v618_v52 }
 0x216   : > { %1073 = vperm.xlu1 %2403, %v1038_v54  }
 0x217   : > { %v1031_v56 = vpop.xlane.xlu1 %1030 }
 0x218   : > { %v1039_v57 = vmul.f32 %v1031_v56, %v619_v55 }
 0x21a   : > { %1726 = vperm.xlu1 %2403, %v612_v35   ;;  %1078 = vperm.xlu0 %2402, %v1039_v57  }
 0x21e   : > { %1736 = vperm.xlu1 %2403, %v614_v44   ;;  %1731 = vperm.xlu0 %2402, %v613_v0  }
 0x222   : > { %1746 = vperm.xlu1 %2403, %v616_v47   ;;  %1741 = vperm.xlu0 %2402, %v615_v41  }
 0x226   : > { %1756 = vperm.xlu1 %2403, %v618_v52   ;;  %1751 = vperm.xlu0 %2402, %v617_v48  }
 0x22a   : > { %1761 = vperm.xlu0 %2402, %v619_v55  }
 0x242   : > { %v1436_v1 = vpop.f32.mrb[6].mxu0 }
 0x243   : > { %v2292_v3 = vpop.f32.mrb[7].mxu0 }
 0x24a   : > { %v1510_v4 = vpop.f32.mrb[8].mxu0 }
 0x24b   : > { %v2303_v5 = vpop.f32.mrb[9].mxu0  ;;  %2304 = vmatprep.subr.mxu0 %v1510_v4 }
 0x24c   : > { %2305 = vmatpush3.msra.mxu0 %v1510_v4 }
 0x24d   : > { %2307 = vmatmul.mubr.msk.f32.vlgmr.msra.gmra.mrb[10].mxu0 %vm724_vm0, %v2605_v6  ;;  %2318 = vmatprep.subr.mxu0 %v1436_v1  ;;  %v2099_v6 = vld [vmem:[%s2907_s8] ss:$0 sm:$0xff] }
 0x24e   : > { %2319 = vmatpush3.msra.mxu0 %v1436_v1  ;;  %2309 = vmatprep.mubr.msk.f32.mxu0 %vm724_vm0, %v2612_v7  ;;  %v2100_v7 = vld [vmem:[%s2908_s9] ss:$0 sm:$0xff] }
 0x251   : > { %2310 = vmatmul.mubr.msk.f32.gmra.mrb[12].mxu0 %vm724_vm0, %v2621_v8 }
 0x252   : > { %2312 = vmatprep.mubr.msk.f32.mxu0 %vm724_vm0, %v2626_v9 }
 0x255   : > { %2313 = vmatmul.mubr.msk.f32.gmra.mrb[14].mxu0 %vm724_vm0, %v2635_v10 }
 0x256   : > { %2315 = vmatprep.mubr.msk.f32.mxu0 %vm724_vm0, %v2640_v11 }
 0x259   : > { %2316 = vmatmul.mubr.msk.f32.gmra.mrb[16].mxu0 %vm724_vm0, %v2649_v12 }
 0x25a   : > { %2320 = vmatprep.mubr.msk.f32.mxu0 %vm724_vm0, %v2688_v20 }
 0x25d   : > { %2321 = vmatmul.mubr.msk.f32.vlgmr.msra.gmra.mrb[10].mxu0 %vm724_vm0, %v2701_v23 }
 0x25e   : > { %2323 = vmatprep.mubr.msk.f32.mxu0 %vm724_vm0, %v2706_v25 }
 0x261   : > { %2324 = vmatmul.mubr.msk.f32.gmra.mrb[12].mxu0 %vm724_vm0, %v2715_v27 }
 0x262   : > { %2326 = vmatprep.mubr.msk.f32.mxu0 %vm724_vm0, %v2654_v13 }
 0x265   : > { %2327 = vmatmul.mubr.msk.f32.gmra.mrb[14].mxu0 %vm724_vm0, %v2663_v14 }
 0x266   : > { %2329 = vmatprep.mubr.msk.f32.mxu0 %vm724_vm0, %v2668_v15 }
 0x269   : > { %2330 = vmatmul.mubr.msk.f32.gmra.mrb[16].mxu0 %vm724_vm0, %v2677_v16 }
 0x281   : > { %v1049_v8 = vpop.permute.xlu0 %1048 }
 0x282   : > { %v1088_v9 = vmul.f32 %v2099_v6, %v1049_v8  ;;  %v1044_v10 = vpop.permute.xlu1 %1043  ;;  %v1772_v8 = vld [vmem:[%s2913_s14] sm:$0xff] }
 0x283   : > { %v1087_v11 = vmul.f32 %v2099_v6, %v1044_v10 }
 0x284   : > { %v1103_v12 = vadd.f32 %v2100_v7, %v1088_v9  ;;  %v1773_v9 = vld [vmem:[%s2913_s14 + $0x8] sm:$0xff] }
 0x285   : > { %v1102_v13 = vadd.f32 %v2100_v7, %v1087_v11  ;;  %v2372_v10 = vpack.c.bf16 %v1773_v9, %v1772_v8  ;;  %v1774_v11 = vld [vmem:[%s2913_s14 + $0x10] sm:$0xff] }
 0x286   : > { %v2102_v14 = vmul.f32 -1.442695, %v1103_v12 }
 0x287   : > { %v2101_v20 = vmul.f32 -1.442695, %v1102_v13  ;;  %2373 = vmatprep.subr.bf16.mxu1 %v2372_v10 }
 0x288   : > { %2404 = vpow2.f32 %v2102_v14 }
 0x289   : > { %2406 = vpow2.f32 %v2101_v20  ;;  %v1059_v15 = vpop.permute.xlu1 %1058 }
 0x28a   : > { %v1090_v16 = vmul.f32 %v2099_v6, %v1059_v15 }
 0x28c   : > { %v1105_v23 = vadd.f32 %v2100_v7, %v1090_v16 }
 0x28d   : > { %v1054_v25 = vpop.permute.xlu1 %1053 }
 0x28e   : > { %v2104_v27 = vmul.f32 -1.442695, %v1105_v23  ;;  %v1089_v17 = vmul.f32 %v2099_v6, %v1054_v25 }
 0x290   : > { %2408 = vpow2.f32 %v2104_v27  ;;  %v1104_v18 = vadd.f32 %v2100_v7, %v1089_v17 }
 0x291   : > { %v1069_v19 = vpop.permute.xlu0 %1068  ;;  %v1064_v21 = vpop.permute.xlu1 %1063 }
 0x292   : > { %v2405_v22 = vpop.eup %2404  ;;  %v2103_v24 = vmul.f32 -1.442695, %v1104_v18  ;;  %v1092_v2 = vmul.f32 %v2099_v6, %v1069_v19  ;;  %v1091_v26 = vmul.f32 %v2099_v6, %v1064_v21 }
 0x293   : > { %v2407_v28 = vpop.eup %2406  ;;  %v1135_v29 = vadd.f32 1.0, %v2405_v22 }
 0x294   : > { %v1134_v30 = vadd.f32 1.0, %v2407_v28  ;;  %2410 = vpow2.f32 %v2103_v24  ;;  %v1107_v31 = vadd.f32 %v2100_v7, %v1092_v2  ;;  %v1106_v32 = vadd.f32 %v2100_v7, %v1091_v26 }
 0x295   : > { %2412 = vrcp.f32 %v1135_v29  ;;  %v1074_v33 = vpop.permute.xlu1 %1073 }
 0x296   : > { %2414 = vrcp.f32 %v1134_v30  ;;  %v2106_v34 = vmul.f32 -1.442695, %v1107_v31  ;;  %v2105_v0 = vmul.f32 -1.442695, %v1106_v32  ;;  %v1093_v35 = vmul.f32 %v2099_v6, %v1074_v33 }
 0x298   : > { %2416 = vpow2.f32 %v2106_v34  ;;  %v1108_v36 = vadd.f32 %v2100_v7, %v1093_v35 }
 0x299   : > { %2418 = vpow2.f32 %v2105_v0  ;;  %v1079_v37 = vpop.permute.xlu0 %1078 }
 0x29a   : > { %v2409_v38 = vpop.eup %2408  ;;  %v2107_v39 = vmul.f32 -1.442695, %v1108_v36  ;;  %v1094_v40 = vmul.f32 %v2099_v6, %v1079_v37 }
 0x29b   : > { %v1137_v41 = vadd.f32 1.0, %v2409_v38 }
 0x29c   : > { %2420 = vpow2.f32 %v2107_v39  ;;  %v1109_v42 = vadd.f32 %v2100_v7, %v1094_v40 }
 0x29d   : > { %2422 = vrcp.f32 %v1137_v41 }
 0x29e   : > { %v2411_v43 = vpop.eup %2410  ;;  %v2108_v44 = vmul.f32 -1.442695, %v1109_v42 }
 0x29f   : > { %v2413_v45 = vpop.eup %2412  ;;  %v1136_v46 = vadd.f32 1.0, %v2411_v43 }
 0x2a0   : > { %v2415_v47 = vpop.eup %2414  ;;  %2424 = vpow2.f32 %v2108_v44  ;;  %v1159_v50 = vmul.f32 %v2413_v45, %v1103_v12  ;;  %v1775_v12 = vld [vmem:[%s2913_s14 + $0x18] sm:$0xff] }
 0x2a1   : > { %v1158_v48 = vmul.f32 %v2415_v47, %v1102_v13  ;;  %2426 = vrcp.f32 %v1136_v46  ;;  %v2376_v13 = vpack.c.bf16 %v1775_v12, %v1774_v11 }
 0x2a2   : > { %v2417_v49 = vpop.eup %2416 }
 0x2a3   : > { %v2419_v51 = vpop.eup %2418  ;;  %v1139_v52 = vadd.f32 1.0, %v2417_v49  ;;  %2270 = vmatprep.mubr.msk.f32.mxu1 %vm1177_vm4, %v1158_v48 }
 0x2a4   : > { %v1138_v53 = vadd.f32 1.0, %v2419_v51  ;;  %2271 = vmatmul.mubr.msk.f32.vlgmr.msra.gmra.mrb[12].mxu1 %vm1177_vm4, %v1159_v50 }
 0x2a5   : > { %2428 = vrcp.f32 %v1139_v52  ;;  %2375 = vmatpush3.bf16.msra.mxu1 %v2372_v10 }
 0x2a6   : > { %v2421_v54 = vpop.eup %2420  ;;  %2430 = vrcp.f32 %v1138_v53  ;;  %2377 = vmatprep.subr.bf16.mxu1 %v2376_v13 }
 0x2a7   : > { %v1140_v55 = vadd.f32 1.0, %v2421_v54  ;;  %v2423_v56 = vpop.eup %2422 }
 0x2a8   : > { %v1161_v61 = vmul.f32 %v2423_v56, %v1105_v23 }
 0x2a9   : > { %2432 = vrcp.f32 %v1140_v55  ;;  %2379 = vmatpush3.bf16.msra.mxu1 %v2376_v13 }
 0x2aa   : > { %v2425_v57 = vpop.eup %2424 }
 0x2ab   : > { %v2427_v58 = vpop.eup %2426  ;;  %v1141_v59 = vadd.f32 1.0, %v2425_v57 }
 0x2ac   : > { %v1160_v60 = vmul.f32 %v2427_v58, %v1104_v18  ;;  %v2109_v18 = vld [vmem:[%s2910_s11] ss:$0 sm:$0xff] }
 0x2ad   : > { %2434 = vrcp.f32 %v1141_v59 }
 0x2ae   : > { %2273 = vmatprep.mubr.msk.f32.mxu1 %vm1177_vm4, %v1160_v60 }
 0x2af   : > { %v2429_v62 = vpop.eup %2428  ;;  %2274 = vmatmul.mubr.msk.f32.gmra.mrb[14].mxu1 %vm1177_vm4, %v1161_v61 }
 0x2b0   : > { %v2431_v63 = vpop.eup %2430  ;;  %v1163_v1 = vmul.f32 %v2429_v62, %v1107_v31 }
 0x2b1   : > { %v1162_v3 = vmul.f32 %v2431_v63, %v1106_v32 }
 0x2b3   : > { %v2433_v4 = vpop.eup %2432  ;;  %2276 = vmatprep.mubr.msk.f32.mxu1 %vm1177_vm4, %v1162_v3 }
 0x2b4   : > { %v1164_v5 = vmul.f32 %v2433_v4, %v1108_v36  ;;  %2277 = vmatmul.mubr.msk.f32.gmra.mrb[16].mxu1 %vm1177_vm4, %v1163_v1 }
 0x2b6   : > { %2279 = vmatprep.mubr.msk.f32.mxu1 %vm1177_vm4, %v1164_v5 }
 0x2b7   : > { %v2435_v6 = vpop.eup %2434 }
 0x2b8   : > { %v1165_v7 = vmul.f32 %v2435_v6, %v1109_v42 }
 0x2ba   : > { %2280 = vmatmul.mubr.msk.f32.gmra.mrb[18].mxu1 %vm1177_vm4, %v1165_v7 }
 0x330   : > { %v2835_v14 = vpop.f32.mrb[10].mxu0 }
 0x331   : > { %v2837_v20 = vpop.f32.mrb[11].mxu0 }
 0x334   : > { %v2839_v15 = vpop.f32.mrb[12].mxu0 }
 0x335   : > { %v2841_v16 = vpop.f32.mrb[13].mxu0 }
 0x338   : > { %v2843_v23 = vpop.f32.mrb[14].mxu0 }
 0x339   : > { %v2845_v25 = vpop.f32.mrb[15].mxu0 }
 0x33c   : > { %v2847_v27 = vpop.f32.mrb[16].mxu0 }
 0x33d   : > { %v2849_v17 = vpop.f32.mrb[17].mxu0 }
 0x377   : > { %v2272_v19 = vpop.f32.mrb[12].mxu1 }
 0x378   : > { %v1274_v21 = vadd.f32 %v2272_v19, %v2109_v18  ;;  %v1268_v22 = vpop.f32.mrb[13].mxu1  ;;  %v1732_v19 = vpop.permute.xlu0 %1731 }
 0x379   : > { %v1269_v24 = vadd.f32 %v2109_v18, %v1268_v22  ;;  %v1765_v22 = vmul.f32 %v2835_v14, %v1732_v19 }
 0x37a   : > { %v2119_v2 = vmul.f32 -1.442695, %v1274_v21 }
 0x37b   : > { %v2118_v26 = vmul.f32 -1.442695, %v1269_v24 }
 0x37c   : > { %2436 = vpow2.f32 %v2119_v2 }
 0x37d   : > { %2438 = vpow2.f32 %v2118_v26  ;;  %v2152_v26 = vld [vmem:[%s2914_s15] ss:$0 sm:$0xff] }
 0x382   : > { %v2275_v28 = vpop.f32.mrb[14].mxu1 }
 0x383   : > { %v1284_v29 = vadd.f32 %v2275_v28, %v2109_v18  ;;  %v1278_v30 = vpop.f32.mrb[15].mxu1 }
 0x384   : > { %v1279_v31 = vadd.f32 %v2109_v18, %v1278_v30 }
 0x385   : > { %v2121_v32 = vmul.f32 -1.442695, %v1284_v29 }
 0x386   : > { %v2437_v33 = vpop.eup %2436  ;;  %v2120_v34 = vmul.f32 -1.442695, %v1279_v31 }
 0x387   : > { %v2439_v0 = vpop.eup %2438  ;;  %v1332_v35 = vadd.f32 1.0, %v2437_v33  ;;  %2440 = vpow2.f32 %v2121_v32  ;;  %v2278_v36 = vpop.f32.mrb[16].mxu1 }
 0x388   : > { %v1331_v37 = vadd.f32 1.0, %v2439_v0  ;;  %2442 = vpow2.f32 %v2120_v34  ;;  %v1294_v38 = vadd.f32 %v2278_v36, %v2109_v18  ;;  %v1288_v39 = vpop.f32.mrb[17].mxu1  ;;  %v1742_v33 = vpop.permute.xlu0 %1741 }
 0x389   : > { %2444 = vrcp.f32 %v1332_v35  ;;  %v1289_v40 = vadd.f32 %v2109_v18, %v1288_v39  ;;  %v1767_v0 = vmul.f32 %v2839_v15, %v1742_v33 }
 0x38a   : > { %2446 = vrcp.f32 %v1331_v37  ;;  %v2123_v41 = vmul.f32 -1.442695, %v1294_v38 }
 0x38b   : > { %v2122_v42 = vmul.f32 -1.442695, %v1289_v40 }
 0x38c   : > { %2448 = vpow2.f32 %v2123_v41 }
 0x38d   : > { %2450 = vpow2.f32 %v2122_v42  ;;  %v2281_v43 = vpop.f32.mrb[18].mxu1 }
 0x38e   : > { %v1304_v44 = vadd.f32 %v2281_v43, %v2109_v18  ;;  %v1298_v45 = vpop.f32.mrb[19].mxu1 }
 0x38f   : > { %v1299_v46 = vadd.f32 %v2109_v18, %v1298_v45 }
 0x390   : > { %v2125_v47 = vmul.f32 -1.442695, %v1304_v44 }
 0x391   : > { %v2441_v48 = vpop.eup %2440  ;;  %v2124_v49 = vmul.f32 -1.442695, %v1299_v46 }
 0x392   : > { %v2443_v50 = vpop.eup %2442  ;;  %v1334_v51 = vadd.f32 1.0, %v2441_v48  ;;  %2452 = vpow2.f32 %v2125_v47 }
 0x393   : > { %v2445_v52 = vpop.eup %2444  ;;  %v1333_v53 = vadd.f32 1.0, %v2443_v50  ;;  %2454 = vpow2.f32 %v2124_v49 }
 0x394   : > { %v2447_v54 = vpop.eup %2446  ;;  %2456 = vrcp.f32 %v1334_v51  ;;  %v1356_v57 = vmul.f32 %v2445_v52, %v1274_v21  ;;  %v1727_v21 = vpop.permute.xlu1 %1726 }
 0x395   : > { %v1355_v55 = vmul.f32 %v2447_v54, %v1269_v24  ;;  %2458 = vrcp.f32 %v1333_v53  ;;  %v1764_v24 = vmul.f32 %v1727_v21, %v2837_v20 }
 0x396   : > { %v2449_v56 = vpop.eup %2448 }
 0x397   : > { %v2451_v58 = vpop.eup %2450  ;;  %v1336_v59 = vadd.f32 1.0, %v2449_v56  ;;  %2340 = vmatprep.mubr.msk.f32.mxu1 %vm1177_vm4, %v1355_v55 }
 0x398   : > { %v1335_v60 = vadd.f32 1.0, %v2451_v58  ;;  %2341 = vmatmul.mubr.msk.f32.vlgmr.msra.gmra.mrb[20].mxu1 %vm1177_vm4, %v1356_v57  ;;  %v1737_v34 = vpop.permute.xlu1 %1736 }
 0x399   : > { %2460 = vrcp.f32 %v1336_v59  ;;  %v1766_v35 = vmul.f32 %v1737_v34, %v2841_v16 }
 0x39a   : > { %2462 = vrcp.f32 %v1335_v60 }
 0x39c   : > { %v2453_v61 = vpop.eup %2452  ;;  %v1747_v42 = vpop.permute.xlu1 %1746 }
 0x39d   : > { %v2455_v62 = vpop.eup %2454  ;;  %v1338_v63 = vadd.f32 1.0, %v2453_v61  ;;  %v1768_v45 = vmul.f32 %v1747_v42, %v2845_v25 }
 0x39e   : > { %v2457_v1 = vpop.eup %2456  ;;  %v1337_v3 = vadd.f32 1.0, %v2455_v62 }
 0x39f   : > { %v2459_v4 = vpop.eup %2458  ;;  %2464 = vrcp.f32 %v1338_v63  ;;  %v1358_v6 = vmul.f32 %v2457_v1, %v1284_v29 }
 0x3a0   : > { %v1357_v5 = vmul.f32 %v2459_v4, %v1279_v31  ;;  %2466 = vrcp.f32 %v1337_v3 }
 0x3a2   : > { %2343 = vmatprep.mubr.msk.f32.mxu1 %vm1177_vm4, %v1357_v5 }
 0x3a3   : > { %v2461_v7 = vpop.eup %2460  ;;  %2344 = vmatmul.mubr.msk.f32.gmra.mrb[22].mxu1 %vm1177_vm4, %v1358_v6 }
 0x3a4   : > { %v2463_v8 = vpop.eup %2462  ;;  %v1360_v10 = vmul.f32 %v2461_v7, %v1294_v38 }
 0x3a5   : > { %v1359_v9 = vmul.f32 %v2463_v8, %v1289_v40  ;;  %v1752_v40 = vpop.permute.xlu0 %1751 }
 0x3a6   : > { %v1769_v43 = vmul.f32 %v2843_v23, %v1752_v40  ;;  %v1757_v23 = vpop.permute.xlu1 %1756 }
 0x3a7   : > { %2346 = vmatprep.mubr.msk.f32.mxu1 %vm1177_vm4, %v1359_v9  ;;  %v1770_v54 = vmul.f32 %v1757_v23, %v2849_v17 }
 0x3a8   : > { %2347 = vmatmul.mubr.msk.f32.gmra.mrb[24].mxu1 %vm1177_vm4, %v1360_v10 }
 0x3a9   : > { %v2465_v11 = vpop.eup %2464  ;;  %v1762_v51 = vpop.permute.xlu0 %1761 }
 0x3aa   : > { %v2467_v12 = vpop.eup %2466  ;;  %v1362_v18 = vmul.f32 %v2465_v11, %v1304_v44  ;;  %v1771_v25 = vmul.f32 %v2847_v27, %v1762_v51 }
 0x3ab   : > { %v1361_v13 = vmul.f32 %v2467_v12, %v1299_v46 }
 0x3ad   : > { %2349 = vmatprep.mubr.msk.f32.mxu1 %vm1177_vm4, %v1361_v13 }
 0x3ae   : > { %2350 = vmatmul.mubr.msk.f32.gmra.mrb[26].mxu1 %vm1177_vm4, %v1362_v18 }
 0x46b   : > { %v2342_v2 = vpop.f32.mrb[20].mxu1 }
 0x46c   : > { %v1906_v28 = vadd.f32 %v2342_v2, %v1765_v22  ;;  %v1866_v29 = vpop.f32.mrb[21].mxu1 }
 0x46d   : > { %v1905_v30 = vadd.f32 %v1866_v29, %v1764_v24 }
 0x46e   : > { %v1921_v31 = vadd.f32 %v2152_v26, %v1906_v28 }
 0x46f   : > { %v1920_v14 = vadd.f32 %v2152_v26, %v1905_v30 }
 0x470   : > { %v1929_v32 = vmul.f32 %v1921_v31, %v1732_v19 }
 0x471   : > { %v1928_v20 = vmul.f32 %v1920_v14, %v1727_v21 }
 0x472   : > { %1938 = vst.msk [vmem:[%s2872_s23 + $0x8] sm:$0xff] %vm1177_vm4, %v1929_v32 }
 0x473   : > { %1937 = vst.msk [vmem:[%s2872_s23] sm:$0xff] %vm1177_vm4, %v1928_v20 }
 0x476   : > { %v2345_v36 = vpop.f32.mrb[22].mxu1 }
 0x477   : > { %v1908_v37 = vadd.f32 %v2345_v36, %v1767_v0  ;;  %v1876_v38 = vpop.f32.mrb[23].mxu1 }
 0x478   : > { %v1907_v39 = vadd.f32 %v1876_v38, %v1766_v35 }
 0x479   : > { %v1923_v41 = vadd.f32 %v2152_v26, %v1908_v37 }
 0x47a   : > { %v1922_v44 = vadd.f32 %v2152_v26, %v1907_v39 }
 0x47b   : > { %v1931_v46 = vmul.f32 %v1923_v41, %v1742_v33  ;;  %v2348_v47 = vpop.f32.mrb[24].mxu1 }
 0x47c   : > { %v1930_v15 = vmul.f32 %v1922_v44, %v1737_v34  ;;  %v1910_v48 = vadd.f32 %v2348_v47, %v1769_v43  ;;  %v1886_v16 = vpop.f32.mrb[25].mxu1 }
 0x47d   : > { %1940 = vst.msk [vmem:[%s2872_s23 + $0x18] sm:$0xff] %vm1177_vm4, %v1931_v46  ;;  %v1909_v49 = vadd.f32 %v1886_v16, %v1768_v45 }
 0x47e   : > { %1939 = vst.msk [vmem:[%s2872_s23 + $0x10] sm:$0xff] %vm1177_vm4, %v1930_v15  ;;  %v1925_v50 = vadd.f32 %v2152_v26, %v1910_v48 }
 0x47f   : > { %v1924_v52 = vadd.f32 %v2152_v26, %v1909_v49 }
 0x480   : > { %v1933_v53 = vmul.f32 %v1925_v50, %v1752_v40 }
 0x481   : > { %v1932_v55 = vmul.f32 %v1924_v52, %v1747_v42  ;;  %v2351_v56 = vpop.f32.mrb[26].mxu1 }
 0x482   : > { %1942 = vst.msk [vmem:[%s2872_s23 + $0x28] sm:$0xff] %vm1177_vm4, %v1933_v53  ;;  %v1912_v57 = vadd.f32 %v2351_v56, %v1771_v25  ;;  %v1896_v58 = vpop.f32.mrb[27].mxu1 }
 0x483   : > { %1941 = vst.msk [vmem:[%s2872_s23 + $0x20] sm:$0xff] %vm1177_vm4, %v1932_v55  ;;  %v1911_v59 = vadd.f32 %v1896_v58, %v1770_v54 }
 0x484   : > { %v1927_v60 = vadd.f32 %v2152_v26, %v1912_v57 }
 0x485   : > { %v1926_v61 = vadd.f32 %v2152_v26, %v1911_v59 }
 0x486   : > { %v1935_v62 = vmul.f32 %v1927_v60, %v1762_v51 }
 0x487   : > { %v1934_v63 = vmul.f32 %v1926_v61, %v1757_v23 }
 0x488   : > { %1944 = vst.msk [vmem:[%s2872_s23 + $0x38] sm:$0xff] %vm1177_vm4, %v1935_v62 }
 0x489   : > { %1943 = vst.msk [vmem:[%s2872_s23 + $0x30] sm:$0xff] %vm1177_vm4, %v1934_v63 }
 0x48a PF: > { %s28_s24 = sadd.s32 1, %s2474_s24  }
 0x48b   : > { %p25_p4 = scmp.ge.s32.totalorder %s28_s24, 4  }
 0x48d   :  { %27 = sbr.rel (!%p25_p4) target bundleno = 3 (0x3), region = 135 }

// kernel: _lambda_.6
= control target key start
LH: loop header
LB: loop body
LE: loop exit
PB: predicated region body
PF: predicated region fallthrough
CT: control target
= control target key end

     0   :  { %s1898_s30 = smov 0   ;;  %s1900_s10 = smov 0   ;;  %s2069_s0 = inlined_call_operand.vmem [shape: f32[2,8,3], index: 0, kind: input, shape index: {}]   ;;  %s2070_s1 = inlined_call_operand.vmem [shape: f32[2,3,8], index: 1, kind: input, shape index: {}]   ;;  %s2071_s2 = inlined_call_operand.vmem [shape: f32[2,8,1,3], index: 2, kind: input, shape index: {}]   ;;  %s2072_s3 = inlined_call_operand.vmem [shape: f32[2,8,3,1], index: 3, kind: input, shape index: {}]   ;;  %s2073_s4 = inlined_call_operand.vmem [shape: f32[2,8,8,1], index: 4, kind: input, shape index: {}]   ;;  %s2074_s5 = inlined_call_operand.vmem [shape: f32[2,8,1,8], index: 5, kind: input, shape index: {}]   ;;  %s2075_s6 = inlined_call_operand.vmem [shape: f32[1,32], index: 6, kind: input, shape index: {}]   ;;  %s2076_s7 = inlined_call_operand.vmem [shape: f32[32,16], index: 7, kind: input, shape index: {}]   ;;  %s2077_s8 = inlined_call_operand.vmem [shape: f32[1,16], index: 8, kind: input, shape index: {}]   ;;  %s2078_s9 = inlined_call_operand.vmem [shape: f32[2,64,16], index: 9, kind: output, shape index: {}]  }
   0x1   :  { %s1902_s11 = smov 0   ;;  %s1904_s12 = smov 0  }
   0x2   :  { %s1906_s13 = smov 0  }
   0x3 LB: > { %s28_s14 = sadd.s32 1, %s1827_s11  ;;  %s31_s15 = sadd.s32 1, %s1831_s12  ;;  %s1835_s13 = sphi %s1906_s13, %s19_s13   ;;  %s1831_s12 = sphi %s1904_s12, %s2082_s12   ;;  %s1827_s11 = sphi %s1902_s11, %s2081_s11   ;;  %s1823_s10 = sphi %s1900_s10, %s2080_s10   ;;  %s1819_s30 = sphi %s1898_s30, %s2079_s30  }
   0x4   : > { %p29_p0 = scmp.ge.s32.totalorder %s28_s14, 8  ;;  %p1500_p1 = scmp.ge.s32.totalorder %s1835_s13, 1 }
   0x5   : > { %p367_p2 = scmp.lt.s32.totalorder %s1835_s13, 17 }
   0x6   : > { %s2084_s14 = smov (%p29_p0, %s28_s14), 0  ;;  %s2086_s15 = smov (!%p29_p0, %s31_s15), %s1831_s12 }
   0x7   : > { %p368_p3 = pnand %p1500_p1, %p367_p2  ;;  %p33_p4 = scmp.ge.s32.totalorder %s2086_s15, 2 }
   0x8   : > { %p439_p5 = scmp.lt.s32.totalorder (!%p368_p3), %s1823_s10, 1  ;;  %p449_p6 = scmp.lt.s32.totalorder (!%p368_p3), %s1819_s30, 7  ;;  %v1837_v0 = vmov (!%p368_p3), 0   ;;  %vm505_vm0 = vcmask (!%p368_p3), 23552   ;;  %v1838_v7 = vmov (!%p368_p3), 0.0   ;;  %vm1839_vm1 = vmmov (!%p368_p3), 0  }
   0x9   : > { %s2088_s15 = smov (%p33_p4, %s2086_s15), 0  ;;  %371 = sbr.rel (%p368_p3) target bundleno = 864 (0x360), region = 56 }
   0xa   : > { %1765 = vset.pattern.permute.xlu0 (!%p368_p3), %v1837_v0  ;;  %1766 = vset.pattern.permute.xlu1 (!%p368_p3), %v1837_v0  ;;  %vm510_vm2 = vcmask (!%p368_p3), 59392   ;;  %vm527_vm3 = vcmask (!%p368_p3), 1042432   ;;  %v1840_v27 = vmov (!%p368_p3), 7   ;;  %v1841_v60 = vmov (!%p368_p3), 1   ;;  %v661_v62 = vld [vmem:[%s2076_s7] sm:$0xff] (!%p368_p3)  ;;  %v662_v63 = vld [vmem:[%s2076_s7 + $0x8] sm:$0xff] (!%p368_p3) }
   0xb   : > { %1573 = vmatprep.subr.mxu0 (!%p368_p3), %v1838_v7  ;;  %1575 = vmatprep.mubr.msk.f32.mxu0 (!%p368_p3), %vm1839_vm1, %v1838_v7  ;;  %v1842_v61 = vmov (!%p368_p3), 2   ;;  %v1970_v0 = vpack.c.bf16 (!%p368_p3), %v662_v63, %v661_v62  ;;  %vm672_vm7 = vcmask (!%p368_p3), 261120   ;;  %vm1336_vm8 = vcmask (!%p368_p3), 130048  }
   0xc   : > { %1586 = vmatprep.mubr.msk.f32.mxu1 (!%p368_p3), %vm1839_vm1, %v1838_v7 }
  0x10   : > { %s2090_s10 = smov (!%p439_p5, %s1823_s10), 1  ;;  %s2092_s30 = smov (!%p449_p6, %s1819_s30), 7 }
  0x11   : > { %s1501_s16 = sshll.u32 %s2090_s10, 3 }
  0x12   : > { %s1928_s17 = sadd.s32 %s1501_s16, %s2092_s30  ;;  %s442_s24 = scalar_lea.vmem %s2069_s0, %s1501_s16 }
  0x13   : > { %s1505_s18 = sshll.u32 %s1928_s17, 2  ;;  %s453_s27 = scalar_lea.vmem %s2071_s2, %s1928_s17  ;;  %v485_v2 = vld [vmem:[%s442_s24] sm:$0xff] }
  0x14   : > { %s461_s21 = scalar_lea.vmem %s2072_s3, %s1505_s18  ;;  %v1511_v3 = vld [vmem:[%s453_s27] ss:$0 sm:$0xff]  ;;  %s1507_s28 = sshll.u32 %s1928_s17, 3 }
  0x15   : > { %v488_v1 = vld [vmem:[%s461_s21] sm:$0x7]  ;;  %v497_v4 = vsub.f32 %v485_v2, %v1511_v3  ;;  %s469_s16 = scalar_lea.vmem %s2073_s4, %s1507_s28  ;;  %s1502_s18 = sshll.u32 %s2090_s10, 2  ;;  %v1844_v2 = vmov 3   ;;  %v663_v3 = vld [vmem:[%s2076_s7 + $0x10] sm:$0xff] }
  0x16   : > { %500 = vperm.xlu0 %1765, %v488_v1   ;;  %v489_v8 = vld [vmem:[%s469_s16] sm:$0xff]  ;;  %s446_s21 = scalar_lea.vmem %s2070_s1, %s1502_s18  ;;  %s476_s23 = scalar_lea.vmem %s2074_s5, %s1928_s17  ;;  %v1843_v1 = vmov 0.0|0.0  }
  0x17   : > { %v504_v5 = vmul.f32 %v497_v4, %v497_v4  ;;  %633 = vperm.xlu1 %1766, %v489_v8   ;;  %v486_v9 = vld [vmem:[%s446_s21] sm:$0x7]  ;;  %1666 = vmatprep.subr.bf16.mxu1 %v1843_v1  ;;  %v1846_v8 = vmov 5   ;;  %s484_s24 = scalar_lea.vmem %s2078_s9, %s1507_s28 }
  0x18   : > { %v1518_v56 = vld [vmem:[%s476_s23] ss:$0 sm:$0xff]  ;;  %1668 = vmatpush3.bf16.msra.mxu1 %v1970_v0 }
  0x19   : > { %v506_v6 = vsel %vm505_vm0, %v504_v5, 0.0  ;;  %1669 = vmatprep.subr.bf16.mxu1 %v1843_v1 }
  0x1a   : > { %1774 = vset.pattern.permute.xlu0 %v1840_v27 }
  0x35   : > { %507 = vadd.xlane.f32.xlu0 %v506_v6  ;;  %v1845_v6 = vmov 4  }
  0x95   : > { %v501_v10 = vpop.permute.xlu0 %500 }
  0x96   : > { %v503_v11 = vsub.f32 %v486_v9, %v501_v10  ;;  %v634_v54 = vpop.permute.xlu1 %633  ;;  %v1847_v9 = vmov 6   ;;  %v1994_v10 = vld [vmem:[%s2075_s6] ss:$0 sm:$0xff] }
  0x98   : > { %v509_v12 = vmul.f32 %v503_v11, %v503_v11 }
  0x9a   : > { %v511_v13 = vsel %vm510_vm2, %v509_v12, 0.0 }
  0x9b   : > { %v512_v14 = vrot.slane %v511_v13, 4 }
  0x9d   : > { %v513_v15 = vadd.f32 %v512_v14, %v511_v13 }
  0x9f   : > { %v514_v16 = vrot.slane %v513_v15, 2 }
  0xa1   : > { %v515_v17 = vadd.f32 %v514_v16, %v513_v15 }
  0xa3   : > { %v516_v18 = vrot.slane %v515_v17, 1 }
  0xa5   : > { %v517_v19 = vadd.f32 %v516_v18, %v515_v17 }
  0xa7   : > { %v521_v20 = vadd.f32 1e-08, %v517_v19 }
  0xa9   : > { %1775 = vrsqrt.f32 %v521_v20 }
  0xb3   : > { %v1776_v21 = vpop.eup %1775 }
  0xb4   : > { %v523_v22 = vmul.f32 %v1776_v21, %v503_v11 }
  0xb6   : > { %1574 = vmatpush3.msk.msra.mxu0 %vm527_vm3, %v523_v22 }
  0xb7   : > { %1672 = vmatprep.subr.bf16.mxu0 %v1843_v1 }
  0xc2   : > { %v508_v23 = vpop.xlane.xlu0 %507 }
  0xc3   : > { %v518_v24 = vadd.f32 1e-08, %v508_v23 }
  0xc5   : > { %1777 = vrsqrt.f32 %v518_v24 }
  0xcf   : > { %v1778_v25 = vpop.eup %1777 }
  0xd0   : > { %v520_v26 = vmul.f32 %v1778_v25, %v497_v4  ;;  %v664_v4 = vld [vmem:[%s2076_s7 + $0x18] sm:$0xff] }
  0xd1   : > { %v1983_v5 = vpack.c.bf16 %v664_v4, %v663_v3 }
  0xd2   : > { %1576 = vmatmul.mubr.msk.f32.vlgmr.msra.gmra.mrb[0].mxu0 %vm505_vm0, %v520_v26 }
  0xd3   : > { %1597 = vmatprep.mubr.msk.f32.mxu0 %vm1839_vm1, %v1838_v7  ;;  %1674 = vmatpush3.bf16.msra.mxu0 %v1970_v0 }
  0xd4   : > { %1675 = vmatprep.subr.bf16.mxu0 %v1843_v1  ;;  %1671 = vmatpush3.bf16.msra.mxu1 %v1983_v5 }
  0xd5   : > { %1678 = vmatprep.subr.bf16.mxu1 %v1843_v1 }
  0xd7   : > { %1677 = vmatpush3.bf16.msra.mxu0 %v1983_v5 }
  0xd8   : > { %1684 = vmatprep.subr.bf16.mxu0 %v1843_v1 }
 0x1a5   : > { %v597_v28 = vpop.f32.mrb[0].mxu0 }
 0x1a6   : > { %v1514_v29 = vclamps-f32 %v597_v28, 0.999999  ;;  %v1577_v30 = vpop.f32.mrb[1].mxu0 }
 0x1a8   : > { %v603_v31 = vand.u32 2147483647, %v1514_v29  ;;  %vm628_vm6 = vcmp.lt.f32.partialorder %v1514_v29, 0.0 }
 0x1aa   : > { %v604_v32 = vmul.f32 -0.0012624911, %v603_v31  ;;  %v618_v33 = vsub.f32 1.0, %v603_v31 }
 0x1ac   : > { %v605_v34 = vadd.f32 0.00667009, %v604_v32  ;;  %v619_v35 = vmax.f32 %v618_v33, 0.0 }
 0x1ae   : > { %v606_v36 = vmul.f32 %v605_v34, %v603_v31  ;;  %1779 = vrsqrt.f32 %v619_v35  ;;  %vm622_vm4 = vcmp.eq.f32.partialorder %v619_v35, inf  ;;  %v625_v50 = vand.u32 2147483648, %v619_v35 }
 0x1af   : > { %vm624_vm5 = vcmp.eq.f32.partialorder %v619_v35, 0.0 }
 0x1b0   : > { %v1515_v37 = vadd.f32 -0.017088126, %v606_v36 }
 0x1b2   : > { %v608_v38 = vmul.f32 %v1515_v37, %v603_v31 }
 0x1b4   : > { %v609_v39 = vadd.f32 0.03089188, %v608_v38 }
 0x1b6   : > { %v610_v40 = vmul.f32 %v609_v39, %v603_v31 }
 0x1b8   : > { %v1516_v41 = vadd.f32 -0.050174303, %v610_v40  ;;  %v1780_v43 = vpop.eup %1779 }
 0x1b9   : > { %v621_v46 = vmul.f32 %v1780_v43, %v619_v35 }
 0x1ba   : > { %v612_v42 = vmul.f32 %v1516_v41, %v603_v31 }
 0x1bb   : > { %v623_v49 = vsel %vm622_vm4, %v619_v35, %v621_v46 }
 0x1bc   : > { %v613_v44 = vadd.f32 0.08897899, %v612_v42  ;;  %v626_v52 = vsel %vm624_vm5, %v625_v50, %v623_v49 }
 0x1be   : > { %v614_v45 = vmul.f32 %v613_v44, %v603_v31 }
 0x1c0   : > { %v1517_v47 = vadd.f32 -0.2145988, %v614_v45 }
 0x1c2   : > { %v616_v48 = vmul.f32 %v1517_v47, %v603_v31 }
 0x1c4   : > { %v617_v51 = vadd.f32 1.5707963, %v616_v48 }
 0x1c6   : > { %v627_v53 = vmul.f32 %v626_v52, %v617_v51 }
 0x1c8   : > { %v629_v55 = vsub.f32 3.1415927, %v627_v53 }
 0x1ca   : > { %v630_v57 = vsel %vm628_vm6, %v629_v55, %v627_v53 }
 0x1cb   : > { %v636_v58 = vmul.f32 %v634_v54, %v630_v57 }
 0x1cd   : > { %v643_v59 = vmul.f32 %v1518_v56, %v636_v58 }
 0x1cf   : > { %647 = vperm.xlu1 %1766, %v643_v59  }
 0x1d3   : > { %1767 = vset.pattern.permute.xlu1 %v1841_v60  ;;  %v1520_v60 = vld [vmem:[%s2077_s8] ss:$0 sm:$0xff] }
 0x1d4   : > { %749 = vperm.xlu1 %1767, %v643_v59  }
 0x1d8   : > { %1768 = vset.pattern.permute.xlu1 %v1842_v61 }
 0x1d9   : > { %833 = vperm.xlu1 %1768, %v643_v59  }
 0x1dd   : > { %1769 = vset.pattern.permute.xlu1 %v1844_v2 }
 0x1de   : > { %917 = vperm.xlu1 %1769, %v643_v59  }
 0x1e2   : > { %1770 = vset.pattern.permute.xlu1 %v1845_v6 }
 0x1e3   : > { %1001 = vperm.xlu1 %1770, %v643_v59  }
 0x1e7   : > { %1771 = vset.pattern.permute.xlu1 %v1846_v8 }
 0x1e8   : > { %1085 = vperm.xlu1 %1771, %v643_v59  }
 0x1ec   : > { %1772 = vset.pattern.permute.xlu1 %v1847_v9 }
 0x1ed   : > { %1169 = vperm.xlu1 %1772, %v643_v59  }
 0x1f1   : > { %1773 = vset.pattern.permute.xlu1 %v1840_v27 }
 0x1f2   : > { %1253 = vperm.xlu1 %1773, %v643_v59  }
 0x24e   : > { %v648_v11 = vpop.permute.xlu1 %647 }
 0x24f   : > { %v656_v12 = vsub.f32 %v648_v11, %v1994_v10 }
 0x251   : > { %v657_v13 = vmul.f32 %v656_v12, %v656_v12 }
 0x253   : > { %v658_v14 = vmul.f32 -10.0, %v657_v13  ;;  %v750_v15 = vpop.permute.xlu1 %749 }
 0x254   : > { %v752_v16 = vsub.f32 %v750_v15, %v1994_v10 }
 0x255   : > { %v659_v17 = vmul.f32 1.442695, %v658_v14 }
 0x256   : > { %v753_v18 = vmul.f32 %v752_v16, %v752_v16 }
 0x257   : > { %1781 = vpow2.f32 %v659_v17 }
 0x258   : > { %v754_v19 = vmul.f32 -10.0, %v753_v18  ;;  %v834_v20 = vpop.permute.xlu1 %833 }
 0x259   : > { %v836_v21 = vsub.f32 %v834_v20, %v1994_v10 }
 0x25a   : > { %v755_v22 = vmul.f32 1.442695, %v754_v19 }
 0x25b   : > { %v837_v23 = vmul.f32 %v836_v21, %v836_v21 }
 0x25c   : > { %1783 = vpow2.f32 %v755_v22 }
 0x25d   : > { %v838_v24 = vmul.f32 -10.0, %v837_v23  ;;  %v918_v25 = vpop.permute.xlu1 %917 }
 0x25e   : > { %v920_v26 = vsub.f32 %v918_v25, %v1994_v10 }
 0x25f   : > { %v839_v27 = vmul.f32 1.442695, %v838_v24 }
 0x260   : > { %v921_v28 = vmul.f32 %v920_v26, %v920_v26 }
 0x261   : > { %v1782_v29 = vpop.eup %1781  ;;  %1785 = vpow2.f32 %v839_v27 }
 0x262   : > { %v922_v30 = vmul.f32 -10.0, %v921_v28  ;;  %1587 = vmatmul.mubr.msk.f32.vlgmr.msra.gmra.mrb[0].mxu1 %vm672_vm7, %v1782_v29  ;;  %v1002_v31 = vpop.permute.xlu1 %1001 }
 0x263   : > { %v1004_v32 = vsub.f32 %v1002_v31, %v1994_v10  ;;  %1680 = vmatpush3.bf16.msra.mxu1 %v1970_v0  ;;  %1608 = vmatprep.mubr.msk.f32.mxu1 %vm1839_vm1, %v1838_v7 }
 0x264   : > { %v923_v33 = vmul.f32 1.442695, %v922_v30  ;;  %1681 = vmatprep.subr.bf16.mxu1 %v1843_v1 }
 0x265   : > { %v1005_v34 = vmul.f32 %v1004_v32, %v1004_v32 }
 0x266   : > { %v1784_v35 = vpop.eup %1783  ;;  %1787 = vpow2.f32 %v923_v33 }
 0x267   : > { %v1006_v36 = vmul.f32 -10.0, %v1005_v34  ;;  %1598 = vmatmul.mubr.msk.f32.vlgmr.msra.gmra.mrb[2].mxu0 %vm672_vm7, %v1784_v35  ;;  %v1086_v37 = vpop.permute.xlu1 %1085  ;;  %1683 = vmatpush3.bf16.msra.mxu1 %v1983_v5 }
 0x268   : > { %v1088_v38 = vsub.f32 %v1086_v37, %v1994_v10  ;;  %1686 = vmatpush3.bf16.msra.mxu0 %v1970_v0  ;;  %1690 = vmatprep.subr.bf16.mxu1 %v1843_v1 }
 0x269   : > { %v1007_v39 = vmul.f32 1.442695, %v1006_v36  ;;  %1687 = vmatprep.subr.bf16.mxu0 %v1843_v1  ;;  %1619 = vmatprep.mubr.msk.f32.mxu0 %vm1839_vm1, %v1838_v7 }
 0x26a   : > { %v1089_v40 = vmul.f32 %v1088_v38, %v1088_v38 }
 0x26b   : > { %v1786_v41 = vpop.eup %1785  ;;  %1789 = vpow2.f32 %v1007_v39 }
 0x26c   : > { %v1090_v42 = vmul.f32 -10.0, %v1089_v40  ;;  %1609 = vmatmul.mubr.msk.f32.vlgmr.msra.gmra.mrb[2].mxu1 %vm672_vm7, %v1786_v41  ;;  %v1170_v43 = vpop.permute.xlu1 %1169  ;;  %1689 = vmatpush3.bf16.msra.mxu0 %v1983_v5 }
 0x26d   : > { %v1172_v44 = vsub.f32 %v1170_v43, %v1994_v10  ;;  %1692 = vmatpush3.bf16.msra.mxu1 %v1970_v0  ;;  %1696 = vmatprep.subr.bf16.mxu0 %v1843_v1 }
 0x26e   : > { %v1091_v45 = vmul.f32 1.442695, %v1090_v42  ;;  %1693 = vmatprep.subr.bf16.mxu1 %v1843_v1  ;;  %1630 = vmatprep.mubr.msk.f32.mxu1 %vm1839_vm1, %v1838_v7 }
 0x26f   : > { %v1173_v46 = vmul.f32 %v1172_v44, %v1172_v44 }
 0x270   : > { %v1788_v47 = vpop.eup %1787  ;;  %1791 = vpow2.f32 %v1091_v45 }
 0x271   : > { %v1174_v48 = vmul.f32 -10.0, %v1173_v46  ;;  %1620 = vmatmul.mubr.msk.f32.vlgmr.msra.gmra.mrb[4].mxu0 %vm672_vm7, %v1788_v47  ;;  %v1254_v49 = vpop.permute.xlu1 %1253  ;;  %1695 = vmatpush3.bf16.msra.mxu1 %v1983_v5 }
 0x272   : > { %v1256_v50 = vsub.f32 %v1254_v49, %v1994_v10  ;;  %1698 = vmatpush3.bf16.msra.mxu0 %v1970_v0  ;;  %1702 = vmatprep.subr.bf16.mxu1 %v1843_v1 }
 0x273   : > { %v1175_v51 = vmul.f32 1.442695, %v1174_v48  ;;  %1699 = vmatprep.subr.bf16.mxu0 %v1843_v1  ;;  %1641 = vmatprep.mubr.msk.f32.mxu0 %vm1839_vm1, %v1838_v7 }
 0x274   : > { %v1257_v52 = vmul.f32 %v1256_v50, %v1256_v50 }
 0x275   : > { %v1790_v53 = vpop.eup %1789  ;;  %1793 = vpow2.f32 %v1175_v51 }
 0x276   : > { %v1258_v54 = vmul.f32 -10.0, %v1257_v52  ;;  %1631 = vmatmul.mubr.msk.f32.vlgmr.msra.gmra.mrb[4].mxu1 %vm672_vm7, %v1790_v53  ;;  %1701 = vmatpush3.bf16.msra.mxu0 %v1983_v5 }
 0x277   : > { %1704 = vmatpush3.bf16.msra.mxu1 %v1970_v0  ;;  %1708 = vmatprep.subr.bf16.mxu0 %v1843_v1 }
 0x278   : > { %v1259_v55 = vmul.f32 1.442695, %v1258_v54  ;;  %1705 = vmatprep.subr.bf16.mxu1 %v1843_v1  ;;  %1652 = vmatprep.mubr.msk.f32.mxu1 %vm1839_vm1, %v1838_v7 }
 0x27a   : > { %v1792_v56 = vpop.eup %1791  ;;  %1795 = vpow2.f32 %v1259_v55 }
 0x27b   : > { %1642 = vmatmul.mubr.msk.f32.vlgmr.msra.gmra.mrb[6].mxu0 %vm672_vm7, %v1792_v56  ;;  %1707 = vmatpush3.bf16.msra.mxu1 %v1983_v5 }
 0x27c   : > { %1710 = vmatpush3.bf16.msra.mxu0 %v1970_v0  ;;  %1663 = vmatprep.mubr.msk.f32.mxu0 %vm1839_vm1, %v1838_v7 }
 0x27d   : > { %1711 = vmatprep.subr.bf16.mxu0 %v1843_v1 }
 0x27f   : > { %v1794_v57 = vpop.eup %1793 }
 0x280   : > { %1653 = vmatmul.mubr.msk.f32.vlgmr.msra.gmra.mrb[6].mxu1 %vm672_vm7, %v1794_v57  ;;  %1713 = vmatpush3.bf16.msra.mxu0 %v1983_v5 }
 0x284   : > { %v1796_v58 = vpop.eup %1795 }
 0x285   : > { %1664 = vmatmul.mubr.msk.f32.vlgmr.msra.gmra.mrb[8].mxu0 %vm672_vm7, %v1796_v58 }
 0x335   : > { %v742_v59 = vpop.f32.mrb[0].mxu1 }
 0x336   : > { %v1588_v61 = vpop.f32.mrb[1].mxu1  ;;  %v743_v62 = vadd.f32 %v1520_v60, %v742_v59 }
 0x338   : > { %v746_v2 = vmax.f32 %v743_v62, 0.0 }
 0x33a   : > { %v826_v63 = vpop.f32.mrb[2].mxu0 }
 0x33b   : > { %v827_v0 = vadd.f32 %v1520_v60, %v826_v63  ;;  %v1599_v7 = vpop.f32.mrb[3].mxu0 }
 0x33d   : > { %v830_v1 = vmax.f32 %v827_v0, 0.0 }
 0x33f   : > { %v831_v3 = vadd.f32 %v830_v1, %v746_v2  ;;  %v910_v4 = vpop.f32.mrb[2].mxu1 }
 0x340   : > { %v911_v6 = vadd.f32 %v1520_v60, %v910_v4  ;;  %v1610_v8 = vpop.f32.mrb[3].mxu1 }
 0x342   : > { %v914_v5 = vmax.f32 %v911_v6, 0.0 }
 0x344   : > { %v915_v9 = vadd.f32 %v914_v5, %v831_v3  ;;  %v994_v10 = vpop.f32.mrb[4].mxu0 }
 0x345   : > { %v995_v11 = vadd.f32 %v1520_v60, %v994_v10  ;;  %v1621_v12 = vpop.f32.mrb[5].mxu0 }
 0x347   : > { %v998_v13 = vmax.f32 %v995_v11, 0.0 }
 0x349   : > { %v999_v14 = vadd.f32 %v998_v13, %v915_v9  ;;  %v1078_v15 = vpop.f32.mrb[4].mxu1 }
 0x34a   : > { %v1079_v16 = vadd.f32 %v1520_v60, %v1078_v15  ;;  %v1632_v17 = vpop.f32.mrb[5].mxu1 }
 0x34c   : > { %v1082_v18 = vmax.f32 %v1079_v16, 0.0 }
 0x34e   : > { %v1083_v19 = vadd.f32 %v1082_v18, %v999_v14  ;;  %v1162_v20 = vpop.f32.mrb[6].mxu0 }
 0x34f   : > { %v1163_v21 = vadd.f32 %v1520_v60, %v1162_v20  ;;  %v1643_v22 = vpop.f32.mrb[7].mxu0 }
 0x351   : > { %v1166_v23 = vmax.f32 %v1163_v21, 0.0 }
 0x353   : > { %v1167_v24 = vadd.f32 %v1166_v23, %v1083_v19  ;;  %v1246_v25 = vpop.f32.mrb[6].mxu1 }
 0x354   : > { %v1247_v26 = vadd.f32 %v1520_v60, %v1246_v25  ;;  %v1654_v27 = vpop.f32.mrb[7].mxu1 }
 0x356   : > { %v1250_v28 = vmax.f32 %v1247_v26, 0.0 }
 0x358   : > { %v1251_v29 = vadd.f32 %v1250_v28, %v1167_v24  ;;  %v1330_v30 = vpop.f32.mrb[8].mxu0 }
 0x359   : > { %v1331_v31 = vadd.f32 %v1520_v60, %v1330_v30  ;;  %v1665_v32 = vpop.f32.mrb[9].mxu0 }
 0x35b   : > { %v1334_v33 = vmax.f32 %v1331_v31, 0.0 }
 0x35d   : > { %v1335_v34 = vadd.f32 %v1334_v33, %v1251_v29 }
 0x35f   : > { %1337 = vst.msk [vmem:[%s484_s24] sm:$0xff] %vm1336_vm8, %v1335_v34 }
 0x360 PF: > { %s19_s13 = sadd.s32 1, %s1835_s13   ;;  %s2079_s30 = smov %s1827_s11 }
 0x361   : > { %p16_p7 = scmp.ge.s32.totalorder %s19_s13, 18   ;;  %s2080_s10 = smov %s1831_s12 }
 0x362   : > { %s2081_s11 = smov %s2084_s14  ;;  %s2082_s12 = smov %s2088_s15 }
 0x363   :  { %18 = sbr.rel (!%p16_p7) target bundleno = 3 (0x3), region = 101 }

// kernel: _lambda_.8
= control target key start
LH: loop header
LB: loop body
LE: loop exit
PB: predicated region body
PF: predicated region fallthrough
CT: control target
= control target key end

     0   :  { %s4534_s0 = inlined_call_operand.vmem [shape: f32[2,8,32], index: 0, kind: input, shape index: {}]   ;;  %s4535_s1 = inlined_call_operand.vmem [shape: f32[2,64,32], index: 1, kind: input, shape index: {}]   ;;  %s4536_s2 = inlined_call_operand.vmem [shape: f32[2,64,16], index: 2, kind: input, shape index: {}]   ;;  %s4537_s3 = inlined_call_operand.vmem [shape: f32[2,8,3], index: 3, kind: input, shape index: {}]   ;;  %s4538_s4 = inlined_call_operand.vmem [shape: f32[2,8,1], index: 4, kind: input, shape index: {}]   ;;  %s4539_s5 = inlined_call_operand.vmem [shape: f32[2,64,1], index: 5, kind: input, shape index: {}]   ;;  %s4540_s6 = inlined_call_operand.vmem [shape: f32[64,8], index: 6, kind: input, shape index: {}]   ;;  %s4541_s7 = inlined_call_operand.vmem [shape: f32[64,8], index: 7, kind: input, shape index: {}]   ;;  %s4542_s8 = inlined_call_operand.vmem [shape: f32[8,64], index: 8, kind: input, shape index: {}]   ;;  %s4543_s9 = inlined_call_operand.vmem [shape: f32[32,64], index: 9, kind: input, shape index: {}]   ;;  %s4544_s10 = inlined_call_operand.vmem [shape: f32[16,64], index: 10, kind: input, shape index: {}]   ;;  %s4545_s11 = inlined_call_operand.vmem [shape: f32[1,64], index: 11, kind: input, shape index: {}]   ;;  %s4546_s12 = inlined_call_operand.vmem [shape: f32[64,33], index: 12, kind: input, shape index: {}]   ;;  %s4547_s13 = inlined_call_operand.vmem [shape: f32[1,32], index: 13, kind: input, shape index: {}]   ;;  %s4548_s14 = inlined_call_operand.vmem [shape: f32[32,32], index: 14, kind: input, shape index: {}]   ;;  %s4549_s15 = inlined_call_operand.vmem [shape: f32[64,32], index: 15, kind: input, shape index: {}]   ;;  %s4550_s16 = inlined_call_operand.vmem [shape: f32[1,32], index: 16, kind: input, shape index: {}]   ;;  %s4551_s17 = inlined_call_operand.vmem [shape: f32[32,32], index: 17, kind: input, shape index: {}]   ;;  %s4552_s18 = inlined_call_operand.vmem [shape: f32[32,32], index: 18, kind: input, shape index: {}]   ;;  %s4553_s19 = inlined_call_operand.vmem [shape: f32[32,32], index: 19, kind: input, shape index: {}]   ;;  %s4554_s20 = inlined_call_operand.vmem [shape: f32[1,32], index: 20, kind: input, shape index: {}]   ;;  %s4555_s21 = inlined_call_operand.vmem [shape: f32[2,8,32], index: 21, kind: output, shape index: {0}]   ;;  %s4556_s22 = inlined_call_operand.vmem [shape: f32[2,8,3], index: 22, kind: output, shape index: {1}]   ;;  %s4557_s23 = inlined_call_operand.hbm [shape: f32[2,64,32], index: 23, kind: output, shape index: {2}]  }
   0x1   :  { %4575 = sst [smem:[#allocation14_spill]] %s4534_s0 }
   0x2   :  { %4576 = sst [smem:[#allocation15_spill]] %s4535_s1 }
   0x3   :  { %4577 = sst [smem:[#allocation16_spill]] %s4536_s2 }
   0x4   :  { %4578 = sst [smem:[#allocation17_spill]] %s4537_s3 }
   0x5   :  { %4579 = sst [smem:[#allocation18_spill]] %s4538_s4 }
   0x6   :  { %4580 = sst [smem:[#allocation19_spill]] %s4539_s5 }
   0x7   :  { %4581 = sst [smem:[#allocation20_spill]] %s4540_s6 }
   0x8   :  { %4582 = sst [smem:[#allocation21_spill]] %s4541_s7 }
   0x9   :  { %29 = vsyncpa [#allocation3], 0 }
   0xa   :  { %31 = vsyncpa [#allocation3 + $0x1], 0  ;;  %s3780_s4 = smov 0   ;;  %s3782_s30 = smov 0  }
   0xb   :  { %s3784_s24 = smov 0   ;;  %s3786_s25 = smov 0  }
   0xc LB: > { %4583 = sst [smem:[#allocation5_spill]] %s3645_s24  ;;  %s3801_s5 = sadd.s32 4294967295, %s3649_s25   ;;  %s3649_s25 = sphi %s3786_s25, %s4610_s25   ;;  %s3645_s24 = sphi %s3784_s24, %s4612_s24   ;;  %s3641_s30 = sphi %s3782_s30, %s4614_s30   ;;  %s3637_s4 = sphi %s3780_s4, %s4613_s4  }
   0xd   : > { %s2883_s1 = sadd.s32 4294967294, %s3649_s25   ;;  %s3805_s26 = sadd.s32 1, %s3649_s25  }
   0xe   : > { %4584 = sst [smem:[#allocation6_spill]] %s3805_s26  ;;  %s567_s2 = sadd.s32 1, %s3645_s24 }
   0xf   : > { %s564_s6 = ssub.s32 %s3649_s25, %s3805_s26  ;;  %p577_p0 = scmp.ne.s32.totalorder %s3645_s24, %s3641_s30 }
  0x10   : > { %p565_p1 = scmp.eq.s32.totalorder %s564_s6, 0  ;;  %p578_p2 = scmp.eq.s32.totalorder %s3801_s5, 1 }
  0x11   : > { %p583_p3 = scmp.ne.s32.totalorder %s3641_s30, %s3637_s4  ;;  %p584_p4 = scmp.eq.s32.totalorder %s2883_s1, 1 }
  0x12   : > { %s3816_s27 = scalar_select %p565_p1, %s3645_s24, %s567_s2  }
  0x13   : > { %p3818_p5 = por %p578_p2, %p577_p0  ;;  %p3822_p6 = por %p584_p4, %p583_p3 }
  0x14   : > { %4585 = sst [smem:[#allocation7_spill]] %s3816_s27  ;;  %p2886_p7 = scmp.ge.s32.totalorder %s3649_s25, 1 }
  0x15   : > { %s4587_s28 = scalar_select %p3822_p6, 1, 0 }
  0x16   : > { %p692_p8 = scmp.lt.s32.totalorder %s3649_s25, 3 }
  0x17   : > { %4588 = sst [smem:[#allocation8_spill]] %s4587_s28 }
  0x18   : > { %p693_p9 = pnand %p2886_p7, %p692_p8 }
  0x1a   : > { %696 = sbr.rel (%p693_p9) target bundleno = 1372 (0x55c), region = 104 }
  0x21   : > { %v865_v0 = vld [vmem:[%s4543_s9] sm:$0xff]  ;;  %v866_v1 = vld [vmem:[%s4543_s9 + $0x8] sm:$0xff]  ;;  %p786_p10 = scmp.lt.s32.totalorder %s3801_s5, 1  ;;  %v867_v5 = vld [vmem:[%s4543_s9 + $0x10] sm:$0xff]  ;;  %v3651_v9 = vmov 0   ;;  %vm871_vm0 = vcmask 130048  }
  0x22   : > { %v869_v2 = vld [vmem:[%s4544_s10] sm:$0xff]  ;;  %v3360_v3 = vpack.c.bf16 %v866_v1, %v865_v0  ;;  %v870_v4 = vld [vmem:[%s4544_s10 + $0x8] sm:$0xff]  ;;  %v868_v6 = vld [vmem:[%s4543_s9 + $0x18] sm:$0xff]  ;;  %3517 = vset.pattern.permute.xlu0 %v3651_v9  ;;  %3518 = vset.pattern.permute.xlu1 %v3651_v9  ;;  %vm1001_vm1 = vcmask 261120   ;;  %s4589_s28 = sld [smem:[#allocation16_spill]]  ;;  %s4590_s29 = sld [smem:[#allocation15_spill]] }
  0x23   : > { %v3356_v7 = vpack.c.bf16 %v870_v4, %v869_v2  ;;  %v3364_v8 = vpack.c.bf16 %v868_v6, %v867_v5  ;;  %s3848_s0 = scalar_select %p786_p10, %s3801_s5, 1  ;;  %v1250_v34 = vld [vmem:[%s4546_s12] sm:$0xff]  ;;  %v1251_v35 = vld [vmem:[%s4546_s12 + $0x8] sm:$0xff]  ;;  %v1252_v37 = vld [vmem:[%s4546_s12 + $0x10] sm:$0xff]  ;;  %vm1258_vm2 = vcmask 523264   ;;  %vm1420_vm3 = vcmask 64512  }
  0x24   : > { %3361 = vmatprep.subr.bf16.mxu0 %v3360_v3  ;;  %v3368_v36 = vpack.c.bf16 %v1251_v35, %v1250_v34  ;;  %v1253_v38 = vld [vmem:[%s4546_s12 + $0x18] sm:$0xff]  ;;  %v1254_v40 = vld [vmem:[%s4546_s12 + $0x20] sm:$0xff]  ;;  %v1255_v41 = vld [vmem:[%s4546_s12 + $0x28] sm:$0xff]  ;;  %vm3654_vm4 = vmmov 0   ;;  %s4601_s26 = sld [smem:[#allocation14_spill]]  ;;  %vm2675_vm5 = vcmask 23552  }
  0x25   : > { %3363 = vmatpush3.bf16.msra.mxu0 %v3360_v3  ;;  %3357 = vmatprep.subr.bf16.mxu1 %v3356_v7  ;;  %s2994_s24 = sshll.u32 %s3848_s0, 6  ;;  %v3372_v39 = vpack.c.bf16 %v1253_v38, %v1252_v37  ;;  %v3376_v42 = vpack.c.bf16 %v1255_v41, %v1254_v40  ;;  %v1256_v43 = vld [vmem:[%s4546_s12 + $0x30] sm:$0xff]  ;;  %v1257_v44 = vld [vmem:[%s4546_s12 + $0x38] sm:$0xff]  ;;  %v2915_v50 = vld [vmem:[%s4545_s11] ss:$0 sm:$0xff] }
  0x26   : > { %3359 = vmatpush3.bf16.msra.mxu1 %v3356_v7  ;;  %3365 = vmatprep.subr.bf16.mxu0 %v3364_v8  ;;  %v3380_v45 = vpack.c.bf16 %v1257_v44, %v1256_v43 }
  0x27   : > { %3446 = vmatprep.subr.bf16.mxu1 %v3368_v36 }
  0x28   : > { %s3856_s1 = scalar_lea.vmem %s4589_s28, %s2994_s24  ;;  %s3861_s3 = scalar_lea.vmem %s4590_s29, %s2994_s24 }
  0x29   : > { %v830_v10 = vld [vmem:[%s3856_s1] sm:$0xff]  ;;  %v831_v11 = vld [vmem:[%s3856_s1 + $0x8] sm:$0xff]  ;;  %v832_v13 = vld [vmem:[%s3856_s1 + $0x10] sm:$0xff]  ;;  %3367 = vmatpush3.bf16.msra.mxu0 %v3364_v8  ;;  %s4591_s28 = sld [smem:[#allocation19_spill]]  ;;  %s3652_s29 = smov 32  }
  0x2a   : > { %v3866_v12 = vld [vmem:[%s3861_s3] sm:$0xff]  ;;  %3130 = vmatprep.mubr.msk.f32.mxu1 %vm871_vm0, %v830_v10  ;;  %v3874_v14 = vld [vmem:[%s3861_s3 + $0x8] sm:$0xff]  ;;  %v833_v15 = vld [vmem:[%s3856_s1 + $0x18] sm:$0xff]  ;;  %3369 = vmatprep.subr.bf16.mxu0 %v3368_v36 }
  0x2b   : > { %3150 = vmatprep.mubr.msk.f32.mxu0 %vm1001_vm1, %v3866_v12  ;;  %3131 = vmatmul.mubr.msk.f32.vlgmr.msra.gmra.mrb[0].mxu1 %vm871_vm0, %v831_v11  ;;  %v3884_v16 = vld [vmem:[%s3861_s3 + $0x10] sm:$0xff]  ;;  %v834_v17 = vld [vmem:[%s3856_s1 + $0x20] sm:$0xff]  ;;  %v3899_v20 = vld [vmem:[%s3861_s3 + $0x18] sm:$0xff] }
  0x2c   : > { %3133 = vmatprep.mubr.msk.f32.mxu1 %vm871_vm0, %v832_v13  ;;  %3151 = vmatmul.mubr.msk.f32.vlgmr.msra.gmra.mrb[0].mxu0 %vm1001_vm1, %v3874_v14  ;;  %v835_v21 = vld [vmem:[%s3856_s1 + $0x28] sm:$0xff]  ;;  %v3904_v22 = vld [vmem:[%s3861_s3 + $0x20] sm:$0xff]  ;;  %v836_v23 = vld [vmem:[%s3856_s1 + $0x30] sm:$0xff] }
  0x2d   : > { %3153 = vmatprep.mubr.msk.f32.mxu0 %vm1001_vm1, %v3884_v16  ;;  %v3917_v26 = vld [vmem:[%s3861_s3 + $0x28] sm:$0xff]  ;;  %v837_v27 = vld [vmem:[%s3856_s1 + $0x38] sm:$0xff]  ;;  %v3922_v28 = vld [vmem:[%s3861_s3 + $0x30] sm:$0xff]  ;;  %3371 = vmatpush3.bf16.msra.mxu0 %v3368_v36  ;;  %s4592_s1 = sld [smem:[#allocation17_spill]] }
  0x2e   : > { %v3932_v31 = vld [vmem:[%s3861_s3 + $0x38] sm:$0xff]  ;;  %3450 = vmatpush3.bf16.msra.mxu1 %v3368_v36  ;;  %3373 = vmatprep.subr.bf16.mxu0 %v3372_v39 }
  0x2f   : > { %s3879_s2 = scalar_lea.vmem %s4591_s28, %s2994_s24  ;;  %3134 = vmatmul.mubr.msk.f32.gmra.mrb[2].mxu1 %vm871_vm0, %v833_v15  ;;  %3447 = vmatprep.subr.bf16.mxu1 %v3372_v39  ;;  %s3963_s28 = sshll.u32 %s3848_s0, 3 }
  0x30   : > { %v3890_v18 = vld [vmem:[%s3879_s2] sm:$0xff]  ;;  %v3893_v19 = vld [vmem:[%s3879_s2 + $0x10] sm:$0xff]  ;;  %3136 = vmatprep.mubr.msk.f32.mxu1 %vm871_vm0, %v834_v17  ;;  %v841_v24 = vld [vmem:[%s3879_s2 + $0x8] sm:$0xff]  ;;  %3154 = vmatmul.mubr.msk.f32.gmra.mrb[2].mxu0 %vm1001_vm1, %v3899_v20  ;;  %s4597_s0 = sld [smem:[#allocation20_spill]]  ;;  %s789_s27 = scalar_lea.vmem %s4601_s26, %s3963_s28 }
  0x31   : > { %1204 = vperm.xlu0 %3517, %v3890_v18   ;;  %1214 = vperm.xlu1 %3518, %v3893_v19   ;;  %v843_v25 = vld [vmem:[%s3879_s2 + $0x18] sm:$0xff]  ;;  %v844_v29 = vld [vmem:[%s3879_s2 + $0x20] sm:$0xff]  ;;  %v845_v30 = vld [vmem:[%s3879_s2 + $0x28] sm:$0xff]  ;;  %s820_s26 = scalar_lea.vmem %s4556_s22, %s3963_s28  ;;  %s3657_s24 = smov [#allocation2]  }
  0x32   : > { %3156 = vmatprep.mubr.msk.f32.mxu0 %vm1001_vm1, %v3904_v22  ;;  %v846_v32 = vld [vmem:[%s3879_s2 + $0x30] sm:$0xff]  ;;  %v847_v33 = vld [vmem:[%s3879_s2 + $0x38] sm:$0xff]  ;;  %3375 = vmatpush3.bf16.msra.mxu0 %v3372_v39  ;;  %s4593_s2 = sld [smem:[#allocation21_spill]] }
  0x33   : > { %3137 = vmatmul.mubr.msk.f32.gmra.mrb[4].mxu1 %vm871_vm0, %v835_v21  ;;  %3377 = vmatprep.subr.bf16.mxu0 %v3376_v42  ;;  %s803_s6 = scalar_lea.vmem %s4592_s1, %s3963_s28 }
  0x34   : > { %3139 = vmatprep.mubr.msk.f32.mxu1 %vm871_vm0, %v836_v23  ;;  %3157 = vmatmul.mubr.msk.f32.gmra.mrb[4].mxu0 %vm1001_vm1, %v3917_v26  ;;  %v3969_v46 = vld [vmem:[%s803_s6] sm:$0xff] }
  0x35   : > { %1209 = vperm.xlu0 %3517, %v841_v24   ;;  %1219 = vperm.xlu1 %3518, %v843_v25  }
  0x36   : > { %3159 = vmatprep.mubr.msk.f32.mxu0 %vm1001_vm1, %v3922_v28  ;;  %3451 = vmatpush3.bf16.msra.mxu1 %v3372_v39 }
  0x37   : > { %3140 = vmatmul.mubr.msk.f32.gmra.mrb[6].mxu1 %vm871_vm0, %v837_v27  ;;  %3448 = vmatprep.subr.bf16.mxu1 %v3376_v42 }
  0x38   : > { %3160 = vmatmul.mubr.msk.f32.gmra.mrb[6].mxu0 %vm1001_vm1, %v3932_v31 }
  0x39   : > { %1224 = vperm.xlu0 %3517, %v844_v29   ;;  %1229 = vperm.xlu1 %3518, %v845_v30  }
  0x3a   : > { %3379 = vmatpush3.bf16.msra.mxu0 %v3376_v42  ;;  %3452 = vmatpush3.bf16.msra.mxu1 %v3376_v42 }
  0x3b   : > { %3381 = vmatprep.subr.bf16.mxu0 %v3380_v45  ;;  %3449 = vmatprep.subr.bf16.mxu1 %v3380_v45 }
  0x3d   : > { %1234 = vperm.xlu0 %3517, %v846_v32   ;;  %1239 = vperm.xlu1 %3518, %v847_v33  }
  0x3e   : > { %3383 = vmatpush3.bf16.msra.mxu0 %v3380_v45  ;;  %3453 = vmatpush3.bf16.msra.mxu1 %v3380_v45 }
  0x3f   : > { %3204 = vmatprep.subr.mxu0 %v3969_v46  ;;  %3190 = vmatprep.subr.mxu1 %v3969_v46 }
  0x41   : > { %1390 = vrot.lane.b32.xlu1 %v841_v24, %s3652_s29  ;;  %1388 = vrot.lane.b32.xlu0 %v3890_v18, %s3652_s29 }
  0x45   : > { %1394 = vrot.lane.b32.xlu1 %v843_v25, %s3652_s29  ;;  %1392 = vrot.lane.b32.xlu0 %v3893_v19, %s3652_s29 }
  0x49   : > { %1398 = vrot.lane.b32.xlu1 %v845_v30, %s3652_s29  ;;  %1396 = vrot.lane.b32.xlu0 %v844_v29, %s3652_s29 }
  0x4d   : > { %1402 = vrot.lane.b32.xlu1 %v847_v33, %s3652_s29  ;;  %1400 = vrot.lane.b32.xlu0 %v846_v32, %s3652_s29 }
  0xb0   : > { %v4002_v44 = vpop.permute.xlu0 %1204 }
  0xfe   : > { %v3132_v47 = vpop.f32.mrb[0].mxu1 }
  0xff   : > { %v962_v48 = vpop.f32.mrb[1].mxu1  ;;  %v3152_v49 = vpop.f32.mrb[0].mxu0 }
 0x100   : > { %v1098_v51 = vadd.f32 %v3152_v49, %v3132_v47  ;;  %v1092_v52 = vpop.f32.mrb[1].mxu0  ;;  %v4004_v47 = vpop.permute.xlu1 %1214 }
 0x101   : > { %v1093_v54 = vadd.f32 %v1092_v52, %v962_v48 }
 0x102   : > { %v3135_v53 = vpop.f32.mrb[2].mxu1  ;;  %v3978_v56 = vadd.f32 %v2915_v50, %v1098_v51 }
 0x103   : > { %v972_v55 = vpop.f32.mrb[3].mxu1  ;;  %v3980_v57 = vadd.f32 %v2915_v50, %v1093_v54  ;;  %v3155_v58 = vpop.f32.mrb[2].mxu0 }
 0x104   : > { %v2917_v59 = vmul.f32 -1.442695, %v3978_v56  ;;  %v1108_v60 = vadd.f32 %v3155_v58, %v3135_v53  ;;  %v1102_v61 = vpop.f32.mrb[3].mxu0 }
 0x105   : > { %v2916_v63 = vmul.f32 -1.442695, %v3980_v57  ;;  %v1103_v0 = vadd.f32 %v1102_v61, %v972_v55  ;;  %v4008_v55 = vpop.permute.xlu0 %1209 }
 0x106   : > { %v3138_v62 = vpop.f32.mrb[4].mxu1  ;;  %3523 = vpow2.f32 %v2917_v59  ;;  %v3984_v2 = vadd.f32 %v2915_v50, %v1108_v60  ;;  %v4011_v60 = vpop.permute.xlu1 %1219 }
 0x107   : > { %v982_v1 = vpop.f32.mrb[5].mxu1  ;;  %3525 = vpow2.f32 %v2916_v63  ;;  %v3986_v3 = vadd.f32 %v2915_v50, %v1103_v0  ;;  %v3158_v4 = vpop.f32.mrb[4].mxu0 }
 0x108   : > { %v2919_v5 = vmul.f32 -1.442695, %v3984_v2  ;;  %v1118_v6 = vadd.f32 %v3158_v4, %v3138_v62  ;;  %v1112_v7 = vpop.f32.mrb[5].mxu0 }
 0x109   : > { %v2918_v10 = vmul.f32 -1.442695, %v3986_v3  ;;  %v1113_v11 = vadd.f32 %v1112_v7, %v982_v1 }
 0x10a   : > { %v3141_v8 = vpop.f32.mrb[6].mxu1  ;;  %3527 = vpow2.f32 %v2919_v5  ;;  %v3990_v15 = vadd.f32 %v2915_v50, %v1118_v6 }
 0x10b   : > { %v992_v13 = vpop.f32.mrb[7].mxu1  ;;  %3529 = vpow2.f32 %v2918_v10  ;;  %v3992_v17 = vadd.f32 %v2915_v50, %v1113_v11  ;;  %v3161_v18 = vpop.f32.mrb[6].mxu0  ;;  %v4566_v10 = vmov 0.0|0.0  }
 0x10c   : > { %v2921_v19 = vmul.f32 -1.442695, %v3990_v15  ;;  %v1128_v21 = vadd.f32 %v3161_v18, %v3141_v8  ;;  %v1122_v23 = vpop.f32.mrb[7].mxu0  ;;  %v4034_v8 = vpop.permute.xlu1 %1229  ;;  %v4042_v18 = vld [vmem:[%s4593_s2 + $0x10] sm:$0xff] }
 0x10d   : > { %v2920_v24 = vmul.f32 -1.442695, %v3992_v17  ;;  %v1123_v25 = vadd.f32 %v1122_v23, %v992_v13  ;;  %v4055_v23 = vld [vmem:[%s4593_s2 + $0x18] sm:$0xff] }
 0x10e   : > { %3531 = vpow2.f32 %v2921_v19  ;;  %v3996_v27 = vadd.f32 %v2915_v50, %v1128_v21  ;;  %v4044_v19 = vpop.permute.xlu0 %1224  ;;  %4594 = vst [vmem:[#allocation9_spill] sm:$0xff] %v4055_v23 }
 0x10f   : > { %3533 = vpow2.f32 %v2920_v24  ;;  %v3998_v29 = vadd.f32 %v2915_v50, %v1123_v25  ;;  %v4064_v25 = vld [vmem:[%s4593_s2 + $0x20] sm:$0xff] }
 0x110   : > { %v3524_v30 = vpop.eup %3523  ;;  %v2923_v32 = vmul.f32 -1.442695, %v3996_v27  ;;  %4595 = vst [vmem:[#allocation10_spill] sm:$0xff] %v4064_v25 }
 0x111   : > { %v3526_v33 = vpop.eup %3525  ;;  %v1171_v34 = vadd.f32 1.0, %v3524_v30  ;;  %v2922_v35 = vmul.f32 -1.442695, %v3998_v29 }
 0x112   : > { %v1170_v36 = vadd.f32 1.0, %v3526_v33  ;;  %3535 = vpow2.f32 %v2923_v32  ;;  %v4068_v33 = vpop.permute.xlu1 %1239 }
 0x113   : > { %3537 = vrcp.f32 %v1171_v34 }
 0x114   : > { %v3528_v37 = vpop.eup %3527  ;;  %3539 = vrcp.f32 %v1170_v36  ;;  %v4082_v36 = vpop.permute.xlu0 %1234 }
 0x115   : > { %v3530_v38 = vpop.eup %3529  ;;  %v1173_v39 = vadd.f32 1.0, %v3528_v37  ;;  %3541 = vpow2.f32 %v2922_v35  ;;  %v4080_v35 = vld [vmem:[%s4593_s2 + $0x28] sm:$0xff] }
 0x116   : > { %v1172_v40 = vadd.f32 1.0, %v3530_v38  ;;  %4596 = vst [vmem:[#allocation11_spill] sm:$0xff] %v4080_v35  ;;  %v4096_v38 = vld [vmem:[%s4593_s2 + $0x30] sm:$0xff] }
 0x117   : > { %3543 = vrcp.f32 %v1173_v39  ;;  %4598 = vst [vmem:[#allocation12_spill] sm:$0xff] %v4096_v38 }
 0x118   : > { %v3532_v41 = vpop.eup %3531  ;;  %3545 = vrcp.f32 %v1172_v40  ;;  %v4102_v40 = vld [vmem:[%s4593_s2 + $0x38] sm:$0xff] }
 0x119   : > { %v3534_v42 = vpop.eup %3533  ;;  %v1175_v43 = vadd.f32 1.0, %v3532_v41  ;;  %4599 = vst [vmem:[#allocation13_spill] sm:$0xff] %v4102_v40  ;;  %v4111_v41 = vld [vmem:[%s4597_s0 + $0x8] sm:$0xff] }
 0x11a   : > { %v1174_v45 = vadd.f32 1.0, %v3534_v42  ;;  %v4118_v42 = vld [vmem:[%s4597_s0 + $0x10] sm:$0xff] }
 0x11b   : > { %3547 = vrcp.f32 %v1175_v43  ;;  %v4564_v43 = vmov 0.0  }
 0x11c   : > { %v3536_v48 = vpop.eup %3535  ;;  %3549 = vrcp.f32 %v1174_v45  ;;  %v4127_v45 = vld [vmem:[%s4542_s8] sm:$0xff] }
 0x11d   : > { %v3538_v49 = vpop.eup %3537  ;;  %v1177_v50 = vadd.f32 1.0, %v3536_v48  ;;  %v4137_v48 = vld [vmem:[%s4597_s0 + $0x18] sm:$0xff] }
 0x11e   : > { %v3540_v51 = vpop.eup %3539  ;;  %v1195_v52 = vmul.f32 %v3538_v49, %v3978_v56  ;;  %v4018_v56 = vld [vmem:[%s4593_s2] sm:$0xff] }
 0x11f   : > { %v3542_v53 = vpop.eup %3541  ;;  %v1194_v54 = vmul.f32 %v3540_v51, %v3980_v57  ;;  %3551 = vrcp.f32 %v1177_v50  ;;  %v4142_v49 = vld [vmem:[%s4597_s0 + $0x20] sm:$0xff]  ;;  %v4155_v50 = vld [vmem:[%s4597_s0 + $0x28] sm:$0xff]  ;;  %v4160_v51 = vld [vmem:[%s4597_s0 + $0x30] sm:$0xff] }
 0x120   : > { %v1176_v58 = vadd.f32 1.0, %v3542_v53  ;;  %v1243_v59 = vmul.f32 %v4008_v55, %v1195_v52  ;;  %v4169_v52 = vld [vmem:[%s4597_s0 + $0x38] sm:$0xff]  ;;  %v3656_v53 = vmov 32  }
 0x121   : > { %v3544_v61 = vpop.eup %3543  ;;  %v1242_v62 = vmul.f32 %v4002_v44, %v1194_v54  ;;  %3519 = vset.pattern.permute.xlu1 %v3656_v53  ;;  %3520 = vset.pattern.permute.xlu0 %v3656_v53  ;;  %v1391_v54 = vpop.permute.xlu1 %1390 }
 0x122   : > { %v3546_v63 = vpop.eup %3545  ;;  %v1197_v0 = vmul.f32 %v3544_v61, %v3984_v2  ;;  %3553 = vrcp.f32 %v1176_v58  ;;  %v4031_v2 = vld [vmem:[%s4593_s2 + $0x8] sm:$0xff]  ;;  %v1389_v58 = vpop.permute.xlu0 %1388  ;;  %s4602_s2 = sld [smem:[#allocation18_spill]] }
 0x123   : > { %v1196_v57 = vmul.f32 %v3546_v63, %v3986_v3  ;;  %3178 = vmatprep.mubr.msk.f32.mxu0 %vm1258_vm2, %v1242_v62  ;;  %v3397_v1 = vpack.c.bf16 %v1243_v59, %v1242_v62 }
 0x124   : > { %v1245_v4 = vmul.f32 %v4011_v60, %v1197_v0  ;;  %3179 = vmatmul.mubr.msk.f32.vlgmr.msra.gmra.mrb[8].mxu0 %vm1258_vm2, %v1243_v59 }
 0x125   : > { %v3548_v5 = vpop.eup %3547  ;;  %v1244_v6 = vmul.f32 %v4004_v47, %v1196_v57  ;;  %3205 = vmatpush3.msra.mxu0 %v3969_v46  ;;  %3206 = vmatprep.mubr.msk.f32.mxu0 %vm1420_vm3, %v4018_v56  ;;  %v1395_v61 = vpop.permute.xlu1 %1394 }
 0x126   : > { %v3550_v3 = vpop.eup %3549  ;;  %v1199_v7 = vmul.f32 %v3548_v5, %v3990_v15  ;;  %3396 = vmatprep.subr.bf16.mxu0 %v4566_v10  ;;  %v1393_v0 = vpop.permute.xlu0 %1392 }
 0x127   : > { %v1198_v11 = vmul.f32 %v3550_v3, %v3992_v17  ;;  %3181 = vmatprep.mubr.msk.f32.mxu1 %vm1258_vm2, %v1244_v6  ;;  %v3400_v13 = vpack.c.bf16 %v1245_v4, %v1244_v6 }
 0x128   : > { %v1247_v21 = vmul.f32 %v4034_v8, %v1199_v7  ;;  %3182 = vmatmul.mubr.msk.f32.vlgmr.msra.gmra.mrb[8].mxu1 %vm1258_vm2, %v1245_v4  ;;  %3207 = vmatmul.mubr.msk.f32.vlgmr.msra.gmra.mrb[10].mxu0 %vm1420_vm3, %v4031_v2 }
 0x129   : > { %v3552_v15 = vpop.eup %3551  ;;  %v1246_v17 = vmul.f32 %v4044_v19, %v1198_v11  ;;  %3398 = vmatpush3.bf16.msra.mxu0 %v3397_v1  ;;  %3191 = vmatpush3.msra.mxu1 %v3969_v46  ;;  %v1399_v11 = vpop.permute.xlu1 %1398 }
 0x12a   : > { %v1201_v24 = vmul.f32 %v3552_v15, %v3996_v27  ;;  %3399 = vmatprep.subr.bf16.mxu0 %v4566_v10  ;;  %3209 = vmatprep.mubr.msk.f32.mxu0 %vm1420_vm3, %v4042_v18 }
 0x12b   : > { %3184 = vmatprep.mubr.msk.f32.mxu1 %vm1258_vm2, %v1246_v17  ;;  %v3403_v30 = vpack.c.bf16 %v1247_v21, %v1246_v17  ;;  %3384 = vmatprep.subr.bf16.mxu1 %v4566_v10 }
 0x12c   : > { %v3554_v32 = vpop.eup %3553  ;;  %3185 = vmatmul.mubr.msk.f32.gmra.mrb[10].mxu1 %vm1258_vm2, %v1247_v21  ;;  %3210 = vmatmul.mubr.msk.f32.gmra.mrb[12].mxu0 %vm1420_vm3, %v4055_v23  ;;  %v1249_v34 = vmul.f32 %v4068_v33, %v1201_v24 }
 0x12d   : > { %v1200_v27 = vmul.f32 %v3554_v32, %v3998_v29  ;;  %3401 = vmatpush3.bf16.msra.mxu0 %v3400_v13  ;;  %3212 = vmatprep.mubr.msk.f32.mxu0 %vm1420_vm3, %v4064_v25  ;;  %v4089_v29 = vld [vmem:[%s4597_s0] sm:$0xff]  ;;  %v1397_v13 = vpop.permute.xlu0 %1396  ;;  %s807_s0 = scalar_lea.vmem %s4602_s2, %s3963_s28  ;;  %s2997_s2 = sshll.u32 %s3801_s5, 10 }
 0x12e   : > { %3402 = vmatprep.subr.bf16.mxu0 %v4566_v10 }
 0x12f   : > { %v1248_v37 = vmul.f32 %v4082_v36, %v1200_v27  ;;  %v1403_v27 = vpop.permute.xlu1 %1402 }
 0x130   : > { %3213 = vmatmul.mubr.msk.f32.gmra.mrb[14].mxu0 %vm1420_vm3, %v4080_v35 }
 0x131   : > { %3187 = vmatprep.mubr.msk.f32.mxu1 %vm1258_vm2, %v1248_v37  ;;  %3404 = vmatpush3.bf16.msra.mxu0 %v3403_v30  ;;  %v3406_v39 = vpack.c.bf16 %v1249_v34, %v1248_v37  ;;  %v1401_v37 = vpop.permute.xlu0 %1400 }
 0x132   : > { %3188 = vmatmul.mubr.msk.f32.gmra.mrb[12].mxu1 %vm1258_vm2, %v1249_v34  ;;  %3405 = vmatprep.subr.bf16.mxu0 %v4566_v10 }
 0x133   : > { %3192 = vmatprep.mubr.msk.f32.mxu1 %vm1420_vm3, %v4089_v29  ;;  %3215 = vmatprep.mubr.msk.f32.mxu0 %vm1420_vm3, %v4096_v38 }
 0x134   : > { %3216 = vmatmul.mubr.msk.f32.gmra.mrb[16].mxu0 %vm1420_vm3, %v4102_v40 }
 0x135   : > { %3407 = vmatpush3.bf16.msra.mxu0 %v3406_v39  ;;  %3253 = vmatprep.mubr.msk.f32.mxu0 %vm3654_vm4, %v4564_v43 }
 0x136   : > { %3193 = vmatmul.mubr.msk.f32.vlgmr.msra.gmra.mrb[14].mxu1 %vm1420_vm3, %v4111_v41  ;;  %3420 = vmatprep.subr.bf16.mxu0 %v4566_v10 }
 0x137   : > { %3195 = vmatprep.mubr.msk.f32.mxu1 %vm1420_vm3, %v4118_v42 }
 0x138   : > { %3254 = vmatmul.mubr.msk.f32.vlgmr.msra.gmra.mrb[18].mxu0 %vm1258_vm2, %v4127_v45 }
 0x139   : > { %3283 = vmatprep.mubr.msk.f32.mxu0 %vm3654_vm4, %v4564_v43 }
 0x13a   : > { %3196 = vmatmul.mubr.msk.f32.gmra.mrb[16].mxu1 %vm1420_vm3, %v4137_v48 }
 0x13b   : > { %3198 = vmatprep.mubr.msk.f32.mxu1 %vm1420_vm3, %v4142_v49 }
 0x13e   : > { %3199 = vmatmul.mubr.msk.f32.gmra.mrb[18].mxu1 %vm1420_vm3, %v4155_v50 }
 0x13f   : > { %3201 = vmatprep.mubr.msk.f32.mxu1 %vm1420_vm3, %v4160_v51 }
 0x142   : > { %3202 = vmatmul.mubr.msk.f32.gmra.mrb[20].mxu1 %vm1420_vm3, %v4169_v52 }
 0x143   : > { %3234 = vmatprep.mubr.msk.f32.mxu1 %vm3654_vm4, %v4564_v43 }
 0x1f7   : > { %v4175_v59 = vpop.f32.mrb[8].mxu0 }
 0x1f8   : > { %v1413_v62 = vmul.f32 %v4175_v59, %v1391_v54  ;;  %v4178_v63 = vpop.f32.mrb[9].mxu0 }
 0x1f9   : > { %v1412_v57 = vmul.f32 %v1389_v58, %v4178_v63 }
 0x1fa   : > { %1694 = vperm.xlu1 %3519, %v1413_v62  }
 0x1fb   : > { %v4181_v1 = vpop.f32.mrb[8].mxu1  ;;  %1689 = vperm.xlu0 %3520, %v1412_v57   ;;  %v4183_v4 = vpop.f32.mrb[10].mxu0 }
 0x1fc   : > { %v1415_v5 = vmul.f32 %v4181_v1, %v1395_v61  ;;  %v4186_v6 = vpop.f32.mrb[9].mxu1  ;;  %v4188_v3 = vpop.f32.mrb[11].mxu0 }
 0x1fd   : > { %v1414_v7 = vmul.f32 %v1393_v0, %v4186_v6 }
 0x1ff   : > { %v4191_v21 = vpop.f32.mrb[10].mxu1  ;;  %1699 = vperm.xlu1 %3519, %v1414_v7   ;;  %1704 = vperm.xlu0 %3520, %v1415_v5   ;;  %v4193_v15 = vpop.f32.mrb[12].mxu0 }
 0x200   : > { %v1417_v17 = vmul.f32 %v4191_v21, %v1399_v11  ;;  %v4196_v24 = vpop.f32.mrb[11].mxu1  ;;  %v1650_v30 = vpop.f32.mrb[13].mxu0 }
 0x201   : > { %v1416_v32 = vmul.f32 %v1397_v13, %v4196_v24 }
 0x203   : > { %1709 = vperm.xlu1 %3519, %v1416_v32   ;;  %1714 = vperm.xlu0 %3520, %v1417_v17   ;;  %v4199_v34 = vpop.f32.mrb[14].mxu0 }
 0x204   : > { %v1660_v39 = vpop.f32.mrb[15].mxu0 }
 0x205   : > { %v4201_v53 = vpop.f32.mrb[12].mxu1 }
 0x206   : > { %v1419_v54 = vmul.f32 %v4201_v53, %v1403_v27  ;;  %v4204_v58 = vpop.f32.mrb[13].mxu1 }
 0x207   : > { %v1418_v61 = vmul.f32 %v1401_v37, %v4204_v58  ;;  %v4207_v62 = vpop.f32.mrb[16].mxu0 }
 0x208   : > { %1724 = vperm.xlu0 %3520, %v1419_v54   ;;  %v4209_v0 = vpop.f32.mrb[17].mxu0 }
 0x209   : > { %1719 = vperm.xlu1 %3519, %v1418_v61   ;;  %v3194_v57 = vpop.f32.mrb[14].mxu1 }
 0x20a   : > { %v1680_v5 = vsub.f32 %v3194_v57, %v4183_v4  ;;  %v1511_v7 = vpop.f32.mrb[15].mxu1 }
 0x20b   : > { %v1679_v11 = vsub.f32 %v1511_v7, %v4188_v3  ;;  %v1885_v3 = vld [vmem:[%s4548_s14] sm:$0xff] }
 0x20c   : > { %3522 = vset.pattern.permute.xlu0 %v3651_v9  ;;  %v4236_v7 = vld [vmem:[%s789_s27] sm:$0xff] }
 0x20d   : > { %v3197_v13 = vpop.f32.mrb[16].mxu1  ;;  %3521 = vset.pattern.permute.xlu1 %v3651_v9  ;;  %v1886_v9 = vld [vmem:[%s4548_s14 + $0x8] sm:$0xff] }
 0x20e   : > { %v1682_v17 = vsub.f32 %v3197_v13, %v4193_v15  ;;  %v1521_v32 = vpop.f32.mrb[17].mxu1  ;;  %v839_v13 = vld [vmem:[%s807_s0] sm:$0xff] }
 0x20f   : > { %v1681_v27 = vsub.f32 %v1521_v32, %v1650_v30  ;;  %v3421_v30 = vpack.c.bf16 %v1886_v9, %v1885_v3  ;;  %v4603_v32 = vmov 0.0   ;;  %1810 = vperm.xlu1 %3521, %v839_v13  }
 0x211   : > { %v3200_v37 = vpop.f32.mrb[18].mxu1  ;;  %3422 = vmatpush3.bf16.msra.mxu0 %v3421_v30 }
 0x212   : > { %v1684_v54 = vsub.f32 %v3200_v37, %v4199_v34  ;;  %v1531_v43 = vpop.f32.mrb[19].mxu1  ;;  %v4600_v34 = vmov 0.0|0.0  }
 0x213   : > { %v1683_v61 = vsub.f32 %v1531_v43, %v1660_v39  ;;  %3423 = vmatprep.subr.bf16.mxu0 %v4600_v34  ;;  %v1888_v43 = vld [vmem:[%s4548_s14 + $0x18] sm:$0xff] }
 0x215   : > { %v3203_v10 = vpop.f32.mrb[20].mxu1 }
 0x216   : > { %v1686_v4 = vsub.f32 %v3203_v10, %v4207_v62  ;;  %v1541_v57 = vpop.f32.mrb[21].mxu1  ;;  %v1887_v10 = vld [vmem:[%s4548_s14 + $0x10] sm:$0xff]  ;;  %v1881_v62 = vpop.f32.mrb[18].mxu0 }
 0x217   : > { %v1685_v15 = vsub.f32 %v1541_v57, %v4209_v0  ;;  %v3424_v39 = vpack.c.bf16 %v1888_v43, %v1887_v10  ;;  %v3255_v0 = vpop.f32.mrb[19].mxu0 }
 0x219   : > { %3425 = vmatpush3.bf16.msra.mxu0 %v3424_v39 }
 0x21a   : > { %3426 = vmatprep.subr.bf16.mxu0 %v4600_v34 }
 0x21c   : > { %3284 = vmatmul.mubr.msk.f32.vlgmr.msra.gmra.mrb[20].mxu0 %vm1001_vm1, %v4236_v7 }
 0x21d   : > { %3294 = vmatprep.mubr.msk.f32.mxu0 %vm3654_vm4, %v4603_v32 }
 0x279   : > { %v1695_v37 = vpop.permute.xlu1 %1694 }
 0x27a   : > { %v1728_v57 = vmul.f32 %v1695_v37, %v1680_v5  ;;  %v1690_v3 = vpop.permute.xlu0 %1689 }
 0x27b   : > { %v1727_v9 = vmul.f32 %v1690_v3, %v1679_v11 }
 0x27d   : > { %v3385_v30 = vpack.c.bf16 %v1728_v57, %v1727_v9  ;;  %v1896_v57 = vld [vmem:[%s4549_s15 + $0x38] sm:$0xff] }
 0x27e   : > { %v1700_v10 = vpop.permute.xlu1 %1699  ;;  %v1705_v43 = vpop.permute.xlu0 %1704 }
 0x27f   : > { %v1729_v39 = vmul.f32 %v1700_v10, %v1681_v27  ;;  %v1730_v0 = vmul.f32 %v1705_v43, %v1682_v17  ;;  %3386 = vmatpush3.bf16.msra.mxu1 %v3385_v30  ;;  %v1889_v17 = vld [vmem:[%s4549_s15] sm:$0xff]  ;;  %v2219_v43 = vld [vmem:[%s4552_s18 + $0x8] sm:$0xff] }
 0x280   : > { %3387 = vmatprep.subr.bf16.mxu1 %v4600_v34  ;;  %v2218_v10 = vld [vmem:[%s4552_s18] sm:$0xff] }
 0x281   : > { %v3388_v40 = vpack.c.bf16 %v1730_v0, %v1729_v39  ;;  %v3433_v39 = vpack.c.bf16 %v2219_v43, %v2218_v10  ;;  %v2141_v0 = vld [vmem:[%s4551_s17] sm:$0xff] }
 0x282   : > { %v1710_v38 = vpop.permute.xlu1 %1709  ;;  %v1715_v35 = vpop.permute.xlu0 %1714 }
 0x283   : > { %v1731_v25 = vmul.f32 %v1710_v38, %v1683_v61  ;;  %v1732_v23 = vmul.f32 %v1715_v35, %v1684_v54  ;;  %3389 = vmatpush3.bf16.msra.mxu1 %v3388_v40  ;;  %v1890_v38 = vld [vmem:[%s4549_s15 + $0x8] sm:$0xff]  ;;  %v1893_v61 = vld [vmem:[%s4549_s15 + $0x20] sm:$0xff] }
 0x284   : > { %3390 = vmatprep.subr.bf16.mxu1 %v4600_v34  ;;  %v3409_v40 = vpack.c.bf16 %v1890_v38, %v1889_v17  ;;  %v2510_v38 = vld [vmem:[%s4553_s19] sm:$0xff] }
 0x285   : > { %v3391_v13 = vpack.c.bf16 %v1732_v23, %v1731_v25  ;;  %v1891_v23 = vld [vmem:[%s4549_s15 + $0x10] sm:$0xff]  ;;  %v1892_v25 = vld [vmem:[%s4549_s15 + $0x18] sm:$0xff] }
 0x286   : > { %v3412_v54 = vpack.c.bf16 %v1892_v25, %v1891_v23 }
 0x287   : > { %v1725_v5 = vpop.permute.xlu0 %1724  ;;  %3392 = vmatpush3.bf16.msra.mxu1 %v3391_v13  ;;  %v2220_v13 = vld [vmem:[%s4552_s18 + $0x10] sm:$0xff] }
 0x288   : > { %v1720_v11 = vpop.permute.xlu1 %1719  ;;  %v1734_v37 = vmul.f32 %v1725_v5, %v1686_v4  ;;  %3393 = vmatprep.subr.bf16.mxu1 %v4600_v34  ;;  %v1894_v4 = vld [vmem:[%s4549_s15 + $0x28] sm:$0xff]  ;;  %v2221_v5 = vld [vmem:[%s4552_s18 + $0x18] sm:$0xff] }
 0x289   : > { %v1733_v27 = vmul.f32 %v1720_v11, %v1685_v15  ;;  %v3415_v15 = vpack.c.bf16 %v1894_v4, %v1893_v61  ;;  %v3436_v11 = vpack.c.bf16 %v2221_v5, %v2220_v13 }
 0x28b   : > { %v3394_v35 = vpack.c.bf16 %v1734_v37, %v1733_v27  ;;  %v2143_v37 = vld [vmem:[%s4551_s17 + $0x10] sm:$0xff]  ;;  %v2144_v27 = vld [vmem:[%s4551_s17 + $0x18] sm:$0xff] }
 0x28c   : > { %v3430_v17 = vpack.c.bf16 %v2144_v27, %v2143_v37 }
 0x28d   : > { %3395 = vmatpush3.bf16.msra.mxu1 %v3394_v35  ;;  %v2511_v35 = vld [vmem:[%s4553_s19 + $0x8] sm:$0xff] }
 0x28e   : > { %3408 = vmatprep.subr.bf16.mxu1 %v4600_v34 }
 0x290   : > { %3235 = vmatmul.mubr.msk.f32.vlgmr.msra.gmra.mrb[22].mxu1 %vm1258_vm2, %v4127_v45  ;;  %v1895_v45 = vld [vmem:[%s4549_s15 + $0x30] sm:$0xff] }
 0x291   : > { %3410 = vmatpush3.bf16.msra.mxu1 %v3409_v40  ;;  %3272 = vmatprep.mubr.msk.f32.mxu1 %vm3654_vm4, %v4603_v32  ;;  %v3418_v3 = vpack.c.bf16 %v1896_v57, %v1895_v45  ;;  %v2953_v40 = vld [vmem:[%s4547_s13] ss:$0 sm:$0xff] }
 0x292   : > { %3411 = vmatprep.subr.bf16.mxu1 %v4600_v34  ;;  %v2061_v23 = vadd.f32 %v2953_v40, %v4178_v63  ;;  %v4331_v61 = vadd.f32 %v2953_v40, %v4186_v6  ;;  %v4339_v57 = vadd.f32 %v2953_v40, %v4196_v24  ;;  %v4351_v24 = vadd.f32 %v4201_v53, %v2953_v40 }
 0x294   : > { %v2954_v25 = vmul.f32 -1.442695, %v2061_v23  ;;  %v2956_v45 = vmul.f32 -1.442695, %v4331_v61  ;;  %v2958_v6 = vmul.f32 -1.442695, %v4339_v57 }
 0x295   : > { %3413 = vmatpush3.bf16.msra.mxu1 %v3412_v54  ;;  %v4328_v54 = vadd.f32 %v4175_v59, %v2953_v40  ;;  %v4343_v59 = vadd.f32 %v4191_v21, %v2953_v40 }
 0x296   : > { %3414 = vmatprep.subr.bf16.mxu1 %v4600_v34  ;;  %3555 = vpow2.f32 %v2954_v25 }
 0x297   : > { %v2955_v4 = vmul.f32 -1.442695, %v4328_v54  ;;  %v2959_v10 = vmul.f32 -1.442695, %v4343_v59 }
 0x299   : > { %3416 = vmatpush3.bf16.msra.mxu1 %v3415_v15  ;;  %v4335_v15 = vadd.f32 %v4181_v1, %v2953_v40  ;;  %3557 = vpow2.f32 %v2955_v4 }
 0x29a   : > { %3417 = vmatprep.subr.bf16.mxu1 %v4600_v34  ;;  %3559 = vpow2.f32 %v2956_v45  ;;  %v2952_v45 = vld [vmem:[%s4550_s16] ss:$0 sm:$0xff] }
 0x29b   : > { %v2957_v63 = vmul.f32 -1.442695, %v4335_v15 }
 0x29d   : > { %3419 = vmatpush3.bf16.msra.mxu1 %v3418_v3  ;;  %v4347_v3 = vadd.f32 %v2953_v40, %v4204_v58  ;;  %3561 = vpow2.f32 %v2957_v63  ;;  %v2961_v58 = vmul.f32 -1.442695, %v4351_v24 }
 0x29e   : > { %3432 = vmatprep.subr.bf16.mxu1 %v4600_v34  ;;  %3563 = vpow2.f32 %v2958_v6 }
 0x29f   : > { %v2960_v43 = vmul.f32 -1.442695, %v4347_v3  ;;  %3565 = vpow2.f32 %v2959_v10 }
 0x2a0   : > { %3273 = vmatmul.mubr.msk.f32.vlgmr.msra.gmra.mrb[24].mxu1 %vm1258_vm2, %v1881_v62  ;;  %v2142_v62 = vld [vmem:[%s4551_s17 + $0x8] sm:$0xff]  ;;  %v3556_v1 = vpop.eup %3555 }
 0x2a1   : > { %3305 = vmatprep.mubr.msk.f32.mxu1 %vm3654_vm4, %v4603_v32  ;;  %v3427_v32 = vpack.c.bf16 %v2142_v62, %v2141_v0  ;;  %3434 = vmatpush3.bf16.msra.mxu1 %v3433_v39  ;;  %v2093_v21 = vadd.f32 1.0, %v3556_v1  ;;  %3567 = vpow2.f32 %v2960_v43 }
 0x2a2   : > { %3435 = vmatprep.subr.bf16.mxu1 %v4600_v34 }
 0x2a3   : > { %3428 = vmatpush3.bf16.msra.mxu0 %v3427_v32  ;;  %v3558_v53 = vpop.eup %3557  ;;  %3569 = vrcp.f32 %v2093_v21 }
 0x2a4   : > { %3429 = vmatprep.subr.bf16.mxu0 %v4600_v34  ;;  %v4320_v34 = vpack.c.bf16 %v2511_v35, %v2510_v38  ;;  %v3560_v13 = vpop.eup %3559  ;;  %3571 = vpow2.f32 %v2961_v58  ;;  %v2094_v5 = vadd.f32 1.0, %v3558_v53  ;;  %v2513_v53 = vld [vmem:[%s4553_s19 + $0x18] sm:$0xff] }
 0x2a5   : > { %3437 = vmatpush3.bf16.msra.mxu1 %v3436_v11  ;;  %v2095_v37 = vadd.f32 1.0, %v3560_v13 }
 0x2a6   : > { %3439 = vmatprep.subr.bf16.mxu1 %v4320_v34  ;;  %3573 = vrcp.f32 %v2094_v5 }
 0x2a7   : > { %3431 = vmatpush3.bf16.msra.mxu0 %v3430_v17  ;;  %v3562_v11 = vpop.eup %3561  ;;  %3575 = vrcp.f32 %v2095_v37 }
 0x2a8   : > { %v3564_v27 = vpop.eup %3563  ;;  %v2096_v17 = vadd.f32 1.0, %v3562_v11 }
 0x2a9   : > { %v3566_v38 = vpop.eup %3565  ;;  %v2097_v35 = vadd.f32 1.0, %v3564_v27 }
 0x2aa   : > { %3577 = vrcp.f32 %v2096_v17  ;;  %v2098_v4 = vadd.f32 1.0, %v3566_v38 }
 0x2ab   : > { %v3568_v40 = vpop.eup %3567  ;;  %3579 = vrcp.f32 %v2097_v35 }
 0x2ac   : > { %v2099_v6 = vadd.f32 1.0, %v3568_v40  ;;  %3581 = vrcp.f32 %v2098_v4 }
 0x2ad   : > { %v3570_v25 = vpop.eup %3569 }
 0x2ae   : > { %v3572_v63 = vpop.eup %3571  ;;  %v2117_v43 = vmul.f32 %v3570_v25, %v2061_v23  ;;  %3583 = vrcp.f32 %v2099_v6 }
 0x2af   : > { %v2100_v21 = vadd.f32 1.0, %v3572_v63 }
 0x2b0   : > { %v2125_v58 = vadd.f32 %v2117_v43, %v3866_v12  ;;  %v4604_v43 = vld [vmem:[#allocation9_spill] sm:$0xff] }
 0x2b1   : > { %3585 = vrcp.f32 %v2100_v21 }
 0x2b2   : > { %v2133_v27 = vmul.f32 %v2125_v58, %v4002_v44 }
 0x2ef   : > { %v4286_v9 = vpop.f32.mrb[20].mxu0 }
 0x2f0   : > { %v3285_v30 = vpop.f32.mrb[21].mxu0 }
 0x2f1   : > { %v1811_v30 = vpop.permute.xlu1 %1810 }
 0x363   : > { %v1804_v39 = vpop.f32.mrb[22].mxu1 }
 0x364   : > { %v1813_v0 = vmul.f32 %v1811_v30, %v1804_v39  ;;  %v3236_v62 = vpop.f32.mrb[23].mxu1 }
 0x365   : > { %v3574_v62 = vpop.eup %3573 }
 0x366   : > { %v1814_v32 = vadd.f32 %v1813_v0, %v3969_v46  ;;  %v3576_v13 = vpop.eup %3575  ;;  %v2118_v23 = vmul.f32 %v3574_v62, %v4328_v54 }
 0x367   : > { %v3578_v11 = vpop.eup %3577  ;;  %v2119_v37 = vmul.f32 %v3576_v13, %v4331_v61 }
 0x368   : > { %2676 = vst.msk [vmem:[%s820_s26] sm:$0xff] %vm2675_vm5, %v1814_v32  ;;  %v2512_v32 = vld [vmem:[%s4553_s19 + $0x10] sm:$0xff]  ;;  %s816_s26 = scalar_lea.vmem %s4555_s21, %s3963_s28  ;;  %v3580_v17 = vpop.eup %3579  ;;  %v2120_v54 = vmul.f32 %v3578_v11, %v4335_v15  ;;  %s783_s28 = sand.u32 1, %s3641_s30  }
 0x369   : > { %v3442_v12 = vpack.c.bf16 %v2513_v53, %v2512_v32  ;;  %v3582_v61 = vpop.eup %3581  ;;  %v2121_v38 = vmul.f32 %v3580_v17, %v4339_v57  ;;  %s2887_s1 = sshll.u32 %s783_s28, 6  ;;  %s4493_s5 = scalar_lea.sflag [#allocation3], %s783_s28 }
 0x36a   : > { %v3584_v35 = vpop.eup %3583  ;;  %v2122_v25 = vmul.f32 %v3582_v61, %v4343_v59  ;;  %s4454_s0 = scalar_lea.vmem [#allocation2], %s2887_s1  ;;  %s3591_s1 = sshll.u32 %s3657_s24, 4  ;;  %s3592_s1 = int_to_ptr.vmem [resolvable:$false] %s3591_s1 }
 0x36b   : > { %v2129_v15 = vadd.f32 %v2121_v38, %v3904_v22  ;;  %v2123_v4 = vmul.f32 %v3584_v35, %v4347_v3  ;;  %s2713_s6 = sshll.u32 %s4454_s0, 4  ;;  %s4484_s6 = int_to_ptr.vmem [resolvable:$true] %s2713_s6 }
 0x36c   : > { %s3587_s27 = scalar_lea.vmem %s4484_s6, 1024  ;;  %p3594_p0 = scmp.lt.s32.totalorder %s4484_s6, %s3592_s1 }
 0x36d   : > { %v2137_v59 = vmul.f32 %v2129_v15, %v4044_v19  ;;  %p3588_p11 = scmp.ne.s32.totalorder %s4484_s6, %s3587_s27 }
 0x36f   : > { %p3589_p12 = pnand %p3588_p11, %p3818_p5 }
 0x371   : > { %p3590_p13 = pneg %p3589_p12 }
 0x373   : > { %v1966_v46 = vpop.f32.mrb[24].mxu1 }
 0x374   : > { %v2040_v1 = vadd.f32 %v4286_v9, %v1966_v46  ;;  %v3274_v10 = vpop.f32.mrb[25].mxu1 }
 0x376   : > { %v2050_v39 = vadd.f32 %v2952_v45, %v2040_v1 }
 0x378   : > { %v2051_v0 = vmax.f32 %v2050_v39, 0.0  ;;  %v4608_v39 = vld [vmem:[#allocation13_spill] sm:$0xff] }
 0x37a   : > { %v2052_v9 = vadd.f32 %v2051_v0, %v4236_v7  ;;  %v2126_v7 = vadd.f32 %v2118_v23, %v3874_v14  ;;  %v3586_v14 = vpop.eup %3585  ;;  %v2988_v0 = vld [vmem:[%s4554_s20] ss:$0 sm:$0xff] }
 0x37b   : > { %v2124_v57 = vmul.f32 %v3586_v14, %v4351_v24 }
 0x37c   : > { %v2053_v5 = vmul.f32 %v2052_v9, %v1811_v30  ;;  %v2127_v30 = vadd.f32 %v2119_v37, %v3884_v16  ;;  %v2134_v40 = vmul.f32 %v2126_v7, %v4008_v55  ;;  %v2130_v16 = vadd.f32 %v2122_v25, %v3917_v26 }
 0x37d   : > { %v2132_v22 = vadd.f32 %v2124_v57, %v3932_v31 }
 0x37e   : > { %2674 = vst.msk [vmem:[%s816_s26] sm:$0xff] %vm1001_vm1, %v2053_v5  ;;  %3295 = vmatmul.mubr.msk.f32.vlgmr.msra.gmra.mrb[22].mxu0 %vm1001_vm1, %v2053_v5  ;;  %3306 = vmatmul.mubr.msk.f32.vlgmr.msra.gmra.mrb[26].mxu1 %vm1001_vm1, %v2053_v5  ;;  %v2138_v3 = vmul.f32 %v2130_v16, %v4034_v8  ;;  %s4482_s26 = scalar_lea.hbm %s4557_s23, %s2997_s2  ;;  %s3593_s2 = scalar_lea.vmem %s3592_s1, 2048 }
 0x37f   : > { %3441 = vmatpush3.bf16.msra.mxu1 %v4320_v34  ;;  %3344 = vmatprep.mubr.msk.f32.mxu1 %vm1001_vm1, %v2133_v27  ;;  %v2128_v34 = vadd.f32 %v2120_v54, %v3899_v20  ;;  %v2131_v20 = vadd.f32 %v2123_v4, %v3922_v28  ;;  %v2140_v26 = vmul.f32 %v2132_v22, %v4068_v33  ;;  %p3595_p1 = scmp.lt.s32.totalorder %s3593_s2, %s3587_s27 }
 0x380   : > { %3443 = vmatprep.subr.bf16.mxu1 %v3442_v12  ;;  %3310 = vmatprep.mubr.msk.f32.mxu0 %vm1420_vm3, %v4089_v29  ;;  %v2135_v29 = vmul.f32 %v2127_v30, %v4004_v47 }
 0x381   : > { %v2136_v46 = vmul.f32 %v2128_v34, %v4011_v60  ;;  %v2139_v45 = vmul.f32 %v2131_v20, %v4082_v36  ;;  %p3596_p2 = por %p3595_p1, %p3594_p0 }
 0x383   : > { %3445 = vmatpush3.bf16.msra.mxu1 %v3442_v12  ;;  %p3597_p3 = pnand %p3596_p2, %p3590_p13 }
 0x386   : > { %3345 = vmatmul.mubr.msk.f32.vlgmr.msra.gmra.mrb[28].mxu1 %vm1001_vm1, %v2134_v40 }
 0x387   : > { %3347 = vmatprep.mubr.msk.f32.mxu1 %vm1001_vm1, %v2135_v29 }
 0x38a   : > { %3348 = vmatmul.mubr.msk.f32.gmra.mrb[30].mxu1 %vm1001_vm1, %v2136_v46 }
 0x38b   : > { %3350 = vmatprep.mubr.msk.f32.mxu1 %vm1001_vm1, %v2137_v59 }
 0x38e   : > { %3351 = vmatmul.mubr.msk.f32.gmra.mrb[32].mxu1 %vm1001_vm1, %v2138_v3 }
 0x38f   : > { %3353 = vmatprep.mubr.msk.f32.mxu1 %vm1001_vm1, %v2139_v45 }
 0x392   : > { %3354 = vmatmul.mubr.msk.f32.gmra.mrb[34].mxu1 %vm1001_vm1, %v2140_v26 }
 0x451   : > { %v2214_v28 = vpop.f32.mrb[22].mxu0  ;;  %v2288_v24 = vpop.f32.mrb[26].mxu1 }
 0x452   : > { %v3296_v63 = vpop.f32.mrb[23].mxu0  ;;  %v3307_v6 = vpop.f32.mrb[27].mxu1  ;;  %3308 = vmatprep.subr.mxu0 %v2288_v24 }
 0x453   : > { %3309 = vmatpush3.msra.mxu0 %v2288_v24 }
 0x454   : > { %3311 = vmatmul.mubr.msk.f32.vlgmr.msra.gmra.mrb[24].mxu0 %vm1420_vm3, %v4111_v41  ;;  %3322 = vmatprep.subr.mxu0 %v2214_v28 }
 0x455   : > { %3323 = vmatpush3.msra.mxu0 %v2214_v28  ;;  %3313 = vmatprep.mubr.msk.f32.mxu0 %vm1420_vm3, %v4118_v42 }
 0x458   : > { %3314 = vmatmul.mubr.msk.f32.gmra.mrb[26].mxu0 %vm1420_vm3, %v4137_v48 }
 0x459   : > { %v3346_v31 = vpop.f32.mrb[28].mxu1  ;;  %3316 = vmatprep.mubr.msk.f32.mxu0 %vm1420_vm3, %v4142_v49 }
 0x45a   : > { %v2604_v1 = vpop.f32.mrb[29].mxu1 }
 0x45c   : > { %3317 = vmatmul.mubr.msk.f32.gmra.mrb[28].mxu0 %vm1420_vm3, %v4155_v50 }
 0x45d   : > { %v3349_v10 = vpop.f32.mrb[30].mxu1  ;;  %3319 = vmatprep.mubr.msk.f32.mxu0 %vm1420_vm3, %v4160_v51  ;;  %v4605_v51 = vld [vmem:[#allocation10_spill] sm:$0xff] }
 0x45e   : > { %v2614_v41 = vpop.f32.mrb[31].mxu1 }
 0x460   : > { %3320 = vmatmul.mubr.msk.f32.gmra.mrb[30].mxu0 %vm1420_vm3, %v4169_v52  ;;  %v4606_v52 = vld [vmem:[#allocation11_spill] sm:$0xff] }
 0x461   : > { %v3352_v42 = vpop.f32.mrb[32].mxu1  ;;  %3324 = vmatprep.mubr.msk.f32.mxu0 %vm1420_vm3, %v4018_v56  ;;  %v4607_v56 = vld [vmem:[#allocation12_spill] sm:$0xff] }
 0x462   : > { %v2624_v48 = vpop.f32.mrb[33].mxu1 }
 0x464   : > { %3325 = vmatmul.mubr.msk.f32.vlgmr.msra.gmra.mrb[24].mxu0 %vm1420_vm3, %v4031_v2 }
 0x465   : > { %v3355_v49 = vpop.f32.mrb[34].mxu1  ;;  %3327 = vmatprep.mubr.msk.f32.mxu0 %vm1420_vm3, %v4042_v18 }
 0x466   : > { %v2634_v50 = vpop.f32.mrb[35].mxu1 }
 0x468   : > { %3328 = vmatmul.mubr.msk.f32.gmra.mrb[26].mxu0 %vm1420_vm3, %v4604_v43 }
 0x469   : > { %3330 = vmatprep.mubr.msk.f32.mxu0 %vm1420_vm3, %v4605_v51 }
 0x46c   : > { %3331 = vmatmul.mubr.msk.f32.gmra.mrb[28].mxu0 %vm1420_vm3, %v4606_v52 }
 0x46d   : > { %3333 = vmatprep.mubr.msk.f32.mxu0 %vm1420_vm3, %v4607_v56 }
 0x470   : > { %3334 = vmatmul.mubr.msk.f32.gmra.mrb[30].mxu0 %vm1420_vm3, %v4608_v39 }
 0x537   : > { %v3326_v2 = vpop.f32.mrb[24].mxu0 }
 0x538   : > { %v2503_v18 = vmul.f32 %v3326_v2, %v4008_v55  ;;  %v2463_v21 = vpop.f32.mrb[25].mxu0 }
 0x539   : > { %v2502_v62 = vmul.f32 %v2463_v21, %v4002_v44 }
 0x53a   : > { %v2644_v58 = vadd.f32 %v3346_v31, %v2503_v18 }
 0x53b   : > { %v2643_v32 = vadd.f32 %v2604_v1, %v2502_v62  ;;  %v3329_v53 = vpop.f32.mrb[26].mxu0 }
 0x53c   : > { %v2659_v13 = vadd.f32 %v2988_v0, %v2644_v58  ;;  %v2505_v9 = vmul.f32 %v3329_v53, %v4011_v60  ;;  %v2473_v23 = vpop.f32.mrb[27].mxu0 }
 0x53d   : > { %v2658_v5 = vadd.f32 %v2988_v0, %v2643_v32  ;;  %v2504_v12 = vmul.f32 %v2473_v23, %v4004_v47 }
 0x53e   : > { %v2667_v11 = vmul.f32 %v2659_v13, %v4008_v55  ;;  %v2646_v37 = vadd.f32 %v3349_v10, %v2505_v9 }
 0x53f   : > { %v2666_v27 = vmul.f32 %v2658_v5, %v4002_v44  ;;  %v2645_v17 = vadd.f32 %v2614_v41, %v2504_v12  ;;  %v3332_v7 = vpop.f32.mrb[28].mxu0 }
 0x540   : > { %2678 = vst.msk [vmem:[%s4454_s0 + $0x8] sm:$0xff] %vm1001_vm1, %v2667_v11  ;;  %v2661_v54 = vadd.f32 %v2988_v0, %v2646_v37  ;;  %v2507_v61 = vmul.f32 %v3332_v7, %v4034_v8  ;;  %v2483_v30 = vpop.f32.mrb[29].mxu0 }
 0x541   : > { %2677 = vst.msk [vmem:[%s4454_s0] sm:$0xff] %vm1001_vm1, %v2666_v27  ;;  %v2660_v55 = vadd.f32 %v2988_v0, %v2645_v17  ;;  %v2506_v38 = vmul.f32 %v2483_v30, %v4044_v19 }
 0x542   : > { %v2669_v44 = vmul.f32 %v2661_v54, %v4011_v60  ;;  %v2648_v35 = vadd.f32 %v3352_v42, %v2507_v61 }
 0x543   : > { %v2668_v40 = vmul.f32 %v2660_v55, %v4004_v47  ;;  %v2647_v34 = vadd.f32 %v2624_v48, %v2506_v38  ;;  %v3335_v25 = vpop.f32.mrb[30].mxu0 }
 0x544   : > { %2680 = vst.msk [vmem:[%s4454_s0 + $0x18] sm:$0xff] %vm1001_vm1, %v2669_v44  ;;  %v2663_v14 = vadd.f32 %v2988_v0, %v2648_v35  ;;  %v2509_v15 = vmul.f32 %v3335_v25, %v4068_v33  ;;  %v2493_v4 = vpop.f32.mrb[31].mxu0 }
 0x545   : > { %2679 = vst.msk [vmem:[%s4454_s0 + $0x10] sm:$0xff] %vm1001_vm1, %v2668_v40  ;;  %v2662_v29 = vadd.f32 %v2988_v0, %v2647_v34  ;;  %v2508_v60 = vmul.f32 %v2493_v4, %v4082_v36 }
 0x546   : > { %v2671_v16 = vmul.f32 %v2663_v14, %v4034_v8  ;;  %v2650_v47 = vadd.f32 %v3355_v49, %v2509_v15 }
 0x547   : > { %v2670_v57 = vmul.f32 %v2662_v29, %v4044_v19  ;;  %v2649_v46 = vadd.f32 %v2634_v50, %v2508_v60 }
 0x548   : > { %2682 = vst.msk [vmem:[%s4454_s0 + $0x28] sm:$0xff] %vm1001_vm1, %v2671_v16  ;;  %v2665_v20 = vadd.f32 %v2988_v0, %v2650_v47 }
 0x549   : > { %2681 = vst.msk [vmem:[%s4454_s0 + $0x20] sm:$0xff] %vm1001_vm1, %v2670_v57  ;;  %v2664_v59 = vadd.f32 %v2988_v0, %v2649_v46 }
 0x54a   : > { %v2673_v22 = vmul.f32 %v2665_v20, %v4068_v33 }
 0x54b   : > { %v2672_v8 = vmul.f32 %v2664_v59, %v4082_v36 }
 0x54c   : > { %2684 = vst.msk [vmem:[%s4454_s0 + $0x38] sm:$0xff] %vm1001_vm1, %v2673_v22 }
 0x54d   : > { %2683 = vst.msk [vmem:[%s4454_s0 + $0x30] sm:$0xff] %vm1001_vm1, %v2672_v8 }
 0x54e   : > { %3600 = shalt.err (!%p3597_p3)
}
 0x54f   : > { %s3601_s28 = scalar_lea.hbm %s4482_s26, 1024  ;;  %s3605_s3 = scalar_lea.hbm %s4557_s23, 2048 }
 0x550   : > { %p3602_p4 = scmp.ne.s32.totalorder %s4482_s26, %s3601_s28  ;;  %p3606_p9 = scmp.lt.u32.totalorder %s4482_s26, %s4557_s23 }
 0x551   : > { %p3607_p10 = scmp.lt.u32.totalorder %s3605_s3, %s3601_s28  ;;  %p3609_p12 = scmp.lt.u32.totalorder %s3601_s28, %s4482_s26 }
 0x552   : > { %p3603_p7 = pnand %p3602_p4, %p3818_p5 }
 0x553   : > { %p3608_p11 = por %p3607_p10, %p3606_p9 }
 0x554   : > { %p3604_p8 = pneg %p3603_p7 }
 0x555   : > { %p3610_p13 = por %p3609_p12, %p3608_p11 }
 0x557   : > { %p3611_p0 = pnand %p3610_p13, %p3604_p8 }
 0x559   : > { %3614 = shalt.err (!%p3611_p0)
}
 0x55a   : > { %s3658_s27 = smov 128   ;;  %s3659_s2 = smov 8  }
 0x55b   : > { %3470 = dma.vmem_to_hbm [thread:$0]  (%p3818_p5), %s4484_s6, 1024, %s4482_s26, %s4493_s5, %s3658_s27, %s3658_s27, %s3659_s2  }
 0x55c PF: > { %p3476_p1 = scmp.ge.s32.totalorder %s3649_s25, 2  ;;  %s2742_s29 = sand.u32 1, %s3637_s4  }
 0x55d   : > { %s2743_s28 = scalar_lea.sflag [#allocation3], %s2742_s29 }
 0x55e   : > { %p3473_p2 = pnand %p3476_p1, %p3822_p6 }
 0x560   : > { %3632 = dma.done.wait (!%p3473_p2), %s2743_s28, 1024  }
 0x561   : > { %3634 = vsyncadd (!%p3473_p2), %s2743_s28, 4294966272  ;;  %s4610_s25 = sld [smem:[#allocation6_spill]]  ;;  %s4611_s3 = sld [smem:[#allocation5_spill]] }
 0x562   : > { %s4612_s24 = sld [smem:[#allocation7_spill]]  ;;  %s4613_s4 = smov %s3641_s30 }
 0x567   : > { %p34_p3 = scmp.ge.s32.totalorder %s4610_s25, 4   ;;  %s4614_s30 = smov %s4611_s3 }
 0x569   :  { %36 = sbr.rel (!%p34_p3) target bundleno = 12 (0xc), region = 178 }
 0x570   :  { %2748 = vsyncpa [#allocation3], 1 }
 0x571   :  { %2750 = vsyncpa [#allocation3 + $0x1], 1 }

// kernel: _lambda_.7
= control target key start
LH: loop header
LB: loop body
LE: loop exit
PB: predicated region body
PF: predicated region fallthrough
CT: control target
= control target key end

     0   :  { %s4337_s0 = inlined_call_operand.vmem [shape: f32[2,8,32], index: 0, kind: input, shape index: {}]   ;;  %s4338_s1 = inlined_call_operand.vmem [shape: f32[2,64,32], index: 1, kind: input, shape index: {}]   ;;  %s4339_s2 = inlined_call_operand.vmem [shape: f32[2,64,16], index: 2, kind: input, shape index: {}]   ;;  %s4340_s3 = inlined_call_operand.vmem [shape: f32[2,8,3], index: 3, kind: input, shape index: {}]   ;;  %s4341_s4 = inlined_call_operand.vmem [shape: f32[2,8,1], index: 4, kind: input, shape index: {}]   ;;  %s4342_s5 = inlined_call_operand.vmem [shape: f32[2,64,1], index: 5, kind: input, shape index: {}]   ;;  %s4343_s6 = inlined_call_operand.vmem [shape: f32[64,8], index: 6, kind: input, shape index: {}]   ;;  %s4344_s7 = inlined_call_operand.vmem [shape: f32[64,8], index: 7, kind: input, shape index: {}]   ;;  %s4345_s8 = inlined_call_operand.vmem [shape: f32[8,64], index: 8, kind: input, shape index: {}]   ;;  %s4346_s9 = inlined_call_operand.vmem [shape: f32[32,64], index: 9, kind: input, shape index: {}]   ;;  %s4347_s10 = inlined_call_operand.vmem [shape: f32[16,64], index: 10, kind: input, shape index: {}]   ;;  %s4348_s11 = inlined_call_operand.vmem [shape: f32[1,64], index: 11, kind: input, shape index: {}]   ;;  %s4349_s12 = inlined_call_operand.vmem [shape: f32[64,33], index: 12, kind: input, shape index: {}]   ;;  %s4350_s13 = inlined_call_operand.vmem [shape: f32[1,32], index: 13, kind: input, shape index: {}]   ;;  %s4351_s14 = inlined_call_operand.vmem [shape: f32[32,32], index: 14, kind: input, shape index: {}]   ;;  %s4352_s15 = inlined_call_operand.vmem [shape: f32[64,32], index: 15, kind: input, shape index: {}]   ;;  %s4353_s16 = inlined_call_operand.vmem [shape: f32[1,32], index: 16, kind: input, shape index: {}]   ;;  %s4354_s17 = inlined_call_operand.vmem [shape: f32[32,32], index: 17, kind: input, shape index: {}]   ;;  %s4355_s18 = inlined_call_operand.vmem [shape: f32[32,32], index: 18, kind: input, shape index: {}]   ;;  %s4356_s19 = inlined_call_operand.vmem [shape: f32[32,32], index: 19, kind: input, shape index: {}]   ;;  %s4357_s20 = inlined_call_operand.vmem [shape: f32[1,32], index: 20, kind: input, shape index: {}]   ;;  %s4358_s21 = inlined_call_operand.vmem [shape: f32[2,8,32], index: 21, kind: output, shape index: {0}]   ;;  %s4359_s22 = inlined_call_operand.vmem [shape: f32[2,8,3], index: 22, kind: output, shape index: {1}]   ;;  %s4360_s23 = inlined_call_operand.vmem [shape: f32[2,64,32], index: 23, kind: output, shape index: {2}]  }
   0x1   :  { %4372 = sst [smem:[#allocation7_spill]] %s4337_s0 }
   0x2   :  { %4373 = sst [smem:[#allocation8_spill]] %s4338_s1 }
   0x3   :  { %4374 = sst [smem:[#allocation9_spill]] %s4339_s2 }
   0x4   :  { %4375 = sst [smem:[#allocation10_spill]] %s4340_s3 }
   0x5   :  { %4376 = sst [smem:[#allocation11_spill]] %s4341_s4  ;;  %s3668_s4 = smov 0  }
   0x6   :  { %4377 = sst [smem:[#allocation12_spill]] %s4342_s5 }
   0x7   :  { %4378 = sst [smem:[#allocation13_spill]] %s4343_s6 }
   0x8   :  { %4379 = sst [smem:[#allocation14_spill]] %s4344_s7 }
   0x9 LB: > { %s2864_s30 = sadd.s32 4294967295, %s3540_s4   ;;  %p2868_p0 = scmp.ge.s32.totalorder %s3540_s4, 1  ;;  %s3540_s4 = sphi %s3668_s4, %s34_s4  }
   0xa   : > { %p689_p1 = scmp.lt.s32.totalorder %s3540_s4, 3 }
   0xc   : > { %p690_p2 = pnand %p2868_p0, %p689_p1 }
   0xe   : > { %693 = sbr.rel (%p690_p2) target bundleno = 1346 (0x542), region = 104 }
  0x15   : > { %v867_v0 = vld [vmem:[%s4346_s9] sm:$0xff]  ;;  %v868_v1 = vld [vmem:[%s4346_s9 + $0x8] sm:$0xff]  ;;  %p783_p3 = scmp.lt.s32.totalorder %s2864_s30, 1  ;;  %v869_v5 = vld [vmem:[%s4346_s9 + $0x10] sm:$0xff]  ;;  %v3542_v9 = vmov 0   ;;  %vm873_vm0 = vcmask 130048  }
  0x16   : > { %v871_v2 = vld [vmem:[%s4347_s10] sm:$0xff]  ;;  %v3340_v3 = vpack.c.bf16 %v868_v1, %v867_v0  ;;  %v872_v4 = vld [vmem:[%s4347_s10 + $0x8] sm:$0xff]  ;;  %v870_v6 = vld [vmem:[%s4346_s9 + $0x18] sm:$0xff]  ;;  %3464 = vset.pattern.permute.xlu0 %v3542_v9  ;;  %3465 = vset.pattern.permute.xlu1 %v3542_v9  ;;  %s4380_s5 = sld [smem:[#allocation9_spill]]  ;;  %s4381_s6 = sld [smem:[#allocation8_spill]]  ;;  %vm1003_vm1 = vcmask 261120  }
  0x17   : > { %v3336_v7 = vpack.c.bf16 %v872_v4, %v871_v2  ;;  %v3344_v8 = vpack.c.bf16 %v870_v6, %v869_v5  ;;  %s4401_s30 = smov (!%p783_p3, %s2864_s30), 1  ;;  %s4382_s29 = sld [smem:[#allocation12_spill]]  ;;  %v1252_v34 = vld [vmem:[%s4349_s12] sm:$0xff]  ;;  %v1253_v35 = vld [vmem:[%s4349_s12 + $0x8] sm:$0xff]  ;;  %v1254_v37 = vld [vmem:[%s4349_s12 + $0x10] sm:$0xff]  ;;  %vm1260_vm2 = vcmask 523264  }
  0x18   : > { %3341 = vmatprep.subr.bf16.mxu0 %v3340_v3  ;;  %s3699_s0 = sshll.u32 %s4401_s30, 6  ;;  %v3348_v36 = vpack.c.bf16 %v1253_v35, %v1252_v34  ;;  %v1255_v38 = vld [vmem:[%s4349_s12 + $0x18] sm:$0xff]  ;;  %v1256_v40 = vld [vmem:[%s4349_s12 + $0x20] sm:$0xff]  ;;  %v1257_v41 = vld [vmem:[%s4349_s12 + $0x28] sm:$0xff]  ;;  %s3814_s26 = sshll.u32 %s4401_s30, 3  ;;  %vm1422_vm3 = vcmask 64512  }
  0x19   : > { %3343 = vmatpush3.bf16.msra.mxu0 %v3340_v3  ;;  %3337 = vmatprep.subr.bf16.mxu1 %v3336_v7  ;;  %v3352_v39 = vpack.c.bf16 %v1255_v38, %v1254_v37  ;;  %v3356_v42 = vpack.c.bf16 %v1257_v41, %v1256_v40  ;;  %v1258_v43 = vld [vmem:[%s4349_s12 + $0x30] sm:$0xff]  ;;  %v1259_v44 = vld [vmem:[%s4349_s12 + $0x38] sm:$0xff]  ;;  %s3543_s28 = smov 32   ;;  %v2898_v50 = vld [vmem:[%s4348_s11] ss:$0 sm:$0xff]  ;;  %s4384_s25 = sld [smem:[#allocation14_spill]] }
  0x1a   : > { %3339 = vmatpush3.bf16.msra.mxu1 %v3336_v7  ;;  %3345 = vmatprep.subr.bf16.mxu0 %v3344_v8  ;;  %v3360_v45 = vpack.c.bf16 %v1259_v44, %v1258_v43  ;;  %vm3545_vm4 = vmmov 0   ;;  %s4392_s2 = sld [smem:[#allocation7_spill]]  ;;  %vm2677_vm5 = vcmask 23552  }
  0x1b   : > { %3426 = vmatprep.subr.bf16.mxu1 %v3348_v36 }
  0x1c   : > { %s3705_s1 = scalar_lea.vmem %s4380_s5, %s3699_s0  ;;  %s3713_s27 = scalar_lea.vmem %s4381_s6, %s3699_s0 }
  0x1d   : > { %v832_v10 = vld [vmem:[%s3705_s1] sm:$0xff]  ;;  %v833_v11 = vld [vmem:[%s3705_s1 + $0x8] sm:$0xff]  ;;  %v834_v12 = vld [vmem:[%s3705_s1 + $0x10] sm:$0xff]  ;;  %3347 = vmatpush3.bf16.msra.mxu0 %v3344_v8  ;;  %s3728_s3 = scalar_lea.vmem %s4382_s29, %s3699_s0  ;;  %s817_s29 = scalar_lea.vmem %s4359_s22, %s3814_s26 }
  0x1e   : > { %3110 = vmatprep.mubr.msk.f32.mxu1 %vm873_vm0, %v832_v10  ;;  %v3718_v13 = vld [vmem:[%s3713_s27] sm:$0xff]  ;;  %v3722_v14 = vld [vmem:[%s3713_s27 + $0x8] sm:$0xff]  ;;  %v835_v15 = vld [vmem:[%s3705_s1 + $0x18] sm:$0xff]  ;;  %3349 = vmatprep.subr.bf16.mxu0 %v3348_v36  ;;  %s4303_s5 = scalar_lea.vmem %s4360_s23, %s3699_s0 }
  0x1f   : > { %3111 = vmatmul.mubr.msk.f32.vlgmr.msra.gmra.mrb[0].mxu1 %vm873_vm0, %v833_v11  ;;  %3130 = vmatprep.mubr.msk.f32.mxu0 %vm1003_vm1, %v3718_v13  ;;  %v3735_v16 = vld [vmem:[%s3713_s27 + $0x10] sm:$0xff]  ;;  %v836_v17 = vld [vmem:[%s3705_s1 + $0x20] sm:$0xff]  ;;  %v3750_v20 = vld [vmem:[%s3713_s27 + $0x18] sm:$0xff] }
  0x20   : > { %3113 = vmatprep.mubr.msk.f32.mxu1 %vm873_vm0, %v834_v12  ;;  %3131 = vmatmul.mubr.msk.f32.vlgmr.msra.gmra.mrb[0].mxu0 %vm1003_vm1, %v3722_v14  ;;  %v3741_v18 = vld [vmem:[%s3728_s3] sm:$0xff]  ;;  %v3744_v19 = vld [vmem:[%s3728_s3 + $0x10] sm:$0xff]  ;;  %v837_v21 = vld [vmem:[%s3705_s1 + $0x28] sm:$0xff]  ;;  %s786_s6 = scalar_lea.vmem %s4392_s2, %s3814_s26 }
  0x21   : > { %3133 = vmatprep.mubr.msk.f32.mxu0 %vm1003_vm1, %v3735_v16  ;;  %v3755_v22 = vld [vmem:[%s3713_s27 + $0x20] sm:$0xff]  ;;  %1206 = vperm.xlu0 %3464, %v3741_v18   ;;  %v838_v23 = vld [vmem:[%s3705_s1 + $0x30] sm:$0xff]  ;;  %v843_v24 = vld [vmem:[%s3728_s3 + $0x8] sm:$0xff] }
  0x22   : > { %1216 = vperm.xlu1 %3465, %v3744_v19   ;;  %v845_v25 = vld [vmem:[%s3728_s3 + $0x18] sm:$0xff]  ;;  %v3768_v26 = vld [vmem:[%s3713_s27 + $0x28] sm:$0xff]  ;;  %v3773_v28 = vld [vmem:[%s3713_s27 + $0x30] sm:$0xff]  ;;  %3351 = vmatpush3.bf16.msra.mxu0 %v3348_v36 }
  0x23   : > { %3114 = vmatmul.mubr.msk.f32.gmra.mrb[2].mxu1 %vm873_vm0, %v835_v15  ;;  %v839_v27 = vld [vmem:[%s3705_s1 + $0x38] sm:$0xff]  ;;  %v846_v29 = vld [vmem:[%s3728_s3 + $0x20] sm:$0xff]  ;;  %v847_v30 = vld [vmem:[%s3728_s3 + $0x28] sm:$0xff]  ;;  %3353 = vmatprep.subr.bf16.mxu0 %v3352_v39  ;;  %s4388_s1 = sld [smem:[#allocation13_spill]] }
  0x24   : > { %3116 = vmatprep.mubr.msk.f32.mxu1 %vm873_vm0, %v836_v17  ;;  %3134 = vmatmul.mubr.msk.f32.gmra.mrb[2].mxu0 %vm1003_vm1, %v3750_v20  ;;  %v3783_v31 = vld [vmem:[%s3713_s27 + $0x38] sm:$0xff]  ;;  %v848_v32 = vld [vmem:[%s3728_s3 + $0x30] sm:$0xff]  ;;  %s4383_s27 = sld [smem:[#allocation10_spill]] }
  0x25   : > { %3136 = vmatprep.mubr.msk.f32.mxu0 %vm1003_vm1, %v3755_v22  ;;  %1211 = vperm.xlu0 %3464, %v843_v24   ;;  %v849_v33 = vld [vmem:[%s3728_s3 + $0x38] sm:$0xff] }
  0x26   : > { %1221 = vperm.xlu1 %3465, %v845_v25   ;;  %3430 = vmatpush3.bf16.msra.mxu1 %v3348_v36 }
  0x27   : > { %3117 = vmatmul.mubr.msk.f32.gmra.mrb[4].mxu1 %vm873_vm0, %v837_v21  ;;  %3427 = vmatprep.subr.bf16.mxu1 %v3352_v39 }
  0x28   : > { %3119 = vmatprep.mubr.msk.f32.mxu1 %vm873_vm0, %v838_v23  ;;  %3137 = vmatmul.mubr.msk.f32.gmra.mrb[4].mxu0 %vm1003_vm1, %v3768_v26 }
  0x29   : > { %3139 = vmatprep.mubr.msk.f32.mxu0 %vm1003_vm1, %v3773_v28  ;;  %1226 = vperm.xlu0 %3464, %v846_v29  }
  0x2a   : > { %1231 = vperm.xlu1 %3465, %v847_v30   ;;  %3355 = vmatpush3.bf16.msra.mxu0 %v3352_v39  ;;  %s800_s7 = scalar_lea.vmem %s4383_s27, %s3814_s26 }
  0x2b   : > { %3120 = vmatmul.mubr.msk.f32.gmra.mrb[6].mxu1 %vm873_vm0, %v839_v27  ;;  %3357 = vmatprep.subr.bf16.mxu0 %v3356_v42  ;;  %v3820_v46 = vld [vmem:[%s800_s7] sm:$0xff] }
  0x2c   : > { %3140 = vmatmul.mubr.msk.f32.gmra.mrb[6].mxu0 %vm1003_vm1, %v3783_v31  ;;  %3431 = vmatpush3.bf16.msra.mxu1 %v3352_v39 }
  0x2d   : > { %1236 = vperm.xlu0 %3464, %v848_v32   ;;  %3428 = vmatprep.subr.bf16.mxu1 %v3356_v42 }
  0x2e   : > { %1241 = vperm.xlu1 %3465, %v849_v33   ;;  %3359 = vmatpush3.bf16.msra.mxu0 %v3356_v42 }
  0x2f   : > { %3361 = vmatprep.subr.bf16.mxu0 %v3360_v45 }
  0x30   : > { %3432 = vmatpush3.bf16.msra.mxu1 %v3356_v42 }
  0x31   : > { %3429 = vmatprep.subr.bf16.mxu1 %v3360_v45  ;;  %1390 = vrot.lane.b32.xlu0 %v3741_v18, %s3543_s28 }
  0x32   : > { %3363 = vmatpush3.bf16.msra.mxu0 %v3360_v45  ;;  %1392 = vrot.lane.b32.xlu1 %v843_v24, %s3543_s28 }
  0x33   : > { %3184 = vmatprep.subr.mxu0 %v3820_v46 }
  0x34   : > { %3433 = vmatpush3.bf16.msra.mxu1 %v3360_v45 }
  0x35   : > { %3170 = vmatprep.subr.mxu1 %v3820_v46  ;;  %1394 = vrot.lane.b32.xlu0 %v3744_v19, %s3543_s28 }
  0x36   : > { %1396 = vrot.lane.b32.xlu1 %v845_v25, %s3543_s28 }
  0x39   : > { %1398 = vrot.lane.b32.xlu0 %v846_v29, %s3543_s28 }
  0x3a   : > { %1400 = vrot.lane.b32.xlu1 %v847_v30, %s3543_s28 }
  0x3d   : > { %1402 = vrot.lane.b32.xlu0 %v848_v32, %s3543_s28 }
  0x3e   : > { %1404 = vrot.lane.b32.xlu1 %v849_v33, %s3543_s28  ;;  %s4393_s28 = sld [smem:[#allocation11_spill]] }
  0x44   : > { %s804_s30 = scalar_lea.vmem %s4393_s28, %s3814_s26 }
  0xa0   : > { %v3853_v44 = vpop.permute.xlu0 %1206 }
  0xf2   : > { %v3112_v47 = vpop.f32.mrb[0].mxu1 }
  0xf3   : > { %v964_v48 = vpop.f32.mrb[1].mxu1  ;;  %v3132_v49 = vpop.f32.mrb[0].mxu0 }
  0xf4   : > { %v1100_v51 = vadd.f32 %v3132_v49, %v3112_v47  ;;  %v1094_v52 = vpop.f32.mrb[1].mxu0  ;;  %v3855_v47 = vpop.permute.xlu1 %1216 }
  0xf5   : > { %v1095_v54 = vadd.f32 %v1094_v52, %v964_v48 }
  0xf6   : > { %v3115_v53 = vpop.f32.mrb[2].mxu1  ;;  %v3829_v56 = vadd.f32 %v2898_v50, %v1100_v51 }
  0xf7   : > { %v974_v55 = vpop.f32.mrb[3].mxu1  ;;  %v3831_v57 = vadd.f32 %v2898_v50, %v1095_v54  ;;  %v3135_v58 = vpop.f32.mrb[2].mxu0 }
  0xf8   : > { %v2900_v59 = vmul.f32 -1.442695, %v3829_v56  ;;  %v1110_v60 = vadd.f32 %v3135_v58, %v3115_v53  ;;  %v1104_v61 = vpop.f32.mrb[3].mxu0 }
  0xf9   : > { %v2899_v63 = vmul.f32 -1.442695, %v3831_v57  ;;  %v1105_v0 = vadd.f32 %v1104_v61, %v974_v55  ;;  %v3859_v55 = vpop.permute.xlu0 %1211 }
  0xfa   : > { %v3118_v62 = vpop.f32.mrb[4].mxu1  ;;  %3470 = vpow2.f32 %v2900_v59  ;;  %v3835_v2 = vadd.f32 %v2898_v50, %v1110_v60  ;;  %v3862_v60 = vpop.permute.xlu1 %1221 }
  0xfb   : > { %v984_v1 = vpop.f32.mrb[5].mxu1  ;;  %3472 = vpow2.f32 %v2899_v63  ;;  %v3837_v3 = vadd.f32 %v2898_v50, %v1105_v0  ;;  %v3138_v4 = vpop.f32.mrb[4].mxu0 }
  0xfc   : > { %v2902_v5 = vmul.f32 -1.442695, %v3835_v2  ;;  %v1120_v6 = vadd.f32 %v3138_v4, %v3118_v62  ;;  %v1114_v7 = vpop.f32.mrb[5].mxu0 }
  0xfd   : > { %v2901_v10 = vmul.f32 -1.442695, %v3837_v3  ;;  %v1115_v11 = vadd.f32 %v1114_v7, %v984_v1 }
  0xfe   : > { %v3121_v8 = vpop.f32.mrb[6].mxu1  ;;  %3474 = vpow2.f32 %v2902_v5  ;;  %v3841_v15 = vadd.f32 %v2898_v50, %v1120_v6 }
  0xff   : > { %v994_v12 = vpop.f32.mrb[7].mxu1  ;;  %3476 = vpow2.f32 %v2901_v10  ;;  %v3843_v17 = vadd.f32 %v2898_v50, %v1115_v11  ;;  %v3141_v18 = vpop.f32.mrb[6].mxu0  ;;  %v4365_v10 = vmov 0.0|0.0  }
 0x100   : > { %v2904_v19 = vmul.f32 -1.442695, %v3841_v15  ;;  %v1130_v21 = vadd.f32 %v3141_v18, %v3121_v8  ;;  %v1124_v23 = vpop.f32.mrb[7].mxu0  ;;  %v3885_v8 = vpop.permute.xlu1 %1231  ;;  %v3893_v18 = vld [vmem:[%s4384_s25 + $0x10] sm:$0xff] }
 0x101   : > { %v2903_v24 = vmul.f32 -1.442695, %v3843_v17  ;;  %v1125_v25 = vadd.f32 %v1124_v23, %v994_v12  ;;  %v3906_v23 = vld [vmem:[%s4384_s25 + $0x18] sm:$0xff] }
 0x102   : > { %3478 = vpow2.f32 %v2904_v19  ;;  %v3847_v27 = vadd.f32 %v2898_v50, %v1130_v21  ;;  %v3895_v19 = vpop.permute.xlu0 %1226  ;;  %4385 = vst [vmem:[#allocation2_spill] sm:$0xff] %v3906_v23 }
 0x103   : > { %3480 = vpow2.f32 %v2903_v24  ;;  %v3849_v29 = vadd.f32 %v2898_v50, %v1125_v25  ;;  %v3915_v25 = vld [vmem:[%s4384_s25 + $0x20] sm:$0xff] }
 0x104   : > { %v3471_v30 = vpop.eup %3470  ;;  %v2906_v32 = vmul.f32 -1.442695, %v3847_v27  ;;  %4386 = vst [vmem:[#allocation3_spill] sm:$0xff] %v3915_v25 }
 0x105   : > { %v3473_v33 = vpop.eup %3472  ;;  %v1173_v34 = vadd.f32 1.0, %v3471_v30  ;;  %v2905_v35 = vmul.f32 -1.442695, %v3849_v29 }
 0x106   : > { %v1172_v36 = vadd.f32 1.0, %v3473_v33  ;;  %3482 = vpow2.f32 %v2906_v32  ;;  %v3919_v33 = vpop.permute.xlu1 %1241 }
 0x107   : > { %3484 = vrcp.f32 %v1173_v34 }
 0x108   : > { %v3475_v37 = vpop.eup %3474  ;;  %3486 = vrcp.f32 %v1172_v36  ;;  %v3933_v36 = vpop.permute.xlu0 %1236 }
 0x109   : > { %v3477_v38 = vpop.eup %3476  ;;  %v1175_v39 = vadd.f32 1.0, %v3475_v37  ;;  %3488 = vpow2.f32 %v2905_v35  ;;  %v3931_v35 = vld [vmem:[%s4384_s25 + $0x28] sm:$0xff] }
 0x10a   : > { %v1174_v40 = vadd.f32 1.0, %v3477_v38  ;;  %4387 = vst [vmem:[#allocation4_spill] sm:$0xff] %v3931_v35  ;;  %v3947_v38 = vld [vmem:[%s4384_s25 + $0x30] sm:$0xff] }
 0x10b   : > { %3490 = vrcp.f32 %v1175_v39  ;;  %4389 = vst [vmem:[#allocation5_spill] sm:$0xff] %v3947_v38 }
 0x10c   : > { %v3479_v41 = vpop.eup %3478  ;;  %3492 = vrcp.f32 %v1174_v40  ;;  %v3953_v40 = vld [vmem:[%s4384_s25 + $0x38] sm:$0xff] }
 0x10d   : > { %v3481_v42 = vpop.eup %3480  ;;  %v1177_v43 = vadd.f32 1.0, %v3479_v41  ;;  %4390 = vst [vmem:[#allocation6_spill] sm:$0xff] %v3953_v40  ;;  %v3962_v41 = vld [vmem:[%s4388_s1 + $0x8] sm:$0xff] }
 0x10e   : > { %v1176_v45 = vadd.f32 1.0, %v3481_v42  ;;  %v3969_v42 = vld [vmem:[%s4388_s1 + $0x10] sm:$0xff] }
 0x10f   : > { %3494 = vrcp.f32 %v1177_v43  ;;  %v4363_v43 = vmov 0.0  }
 0x110   : > { %v3483_v48 = vpop.eup %3482  ;;  %3496 = vrcp.f32 %v1176_v45  ;;  %v3978_v45 = vld [vmem:[%s4345_s8] sm:$0xff] }
 0x111   : > { %v3485_v49 = vpop.eup %3484  ;;  %v1179_v50 = vadd.f32 1.0, %v3483_v48  ;;  %v3988_v48 = vld [vmem:[%s4388_s1 + $0x18] sm:$0xff] }
 0x112   : > { %v3487_v51 = vpop.eup %3486  ;;  %v1197_v52 = vmul.f32 %v3485_v49, %v3829_v56  ;;  %v3869_v56 = vld [vmem:[%s4384_s25] sm:$0xff] }
 0x113   : > { %v3489_v53 = vpop.eup %3488  ;;  %v1196_v54 = vmul.f32 %v3487_v51, %v3831_v57  ;;  %3498 = vrcp.f32 %v1179_v50  ;;  %v3993_v49 = vld [vmem:[%s4388_s1 + $0x20] sm:$0xff]  ;;  %v4006_v50 = vld [vmem:[%s4388_s1 + $0x28] sm:$0xff]  ;;  %v4011_v51 = vld [vmem:[%s4388_s1 + $0x30] sm:$0xff] }
 0x114   : > { %v1178_v58 = vadd.f32 1.0, %v3489_v53  ;;  %v1245_v59 = vmul.f32 %v3859_v55, %v1197_v52  ;;  %v4020_v52 = vld [vmem:[%s4388_s1 + $0x38] sm:$0xff]  ;;  %v3547_v53 = vmov 32  }
 0x115   : > { %v3491_v61 = vpop.eup %3490  ;;  %v1244_v62 = vmul.f32 %v3853_v44, %v1196_v54  ;;  %3466 = vset.pattern.permute.xlu1 %v3547_v53  ;;  %3467 = vset.pattern.permute.xlu0 %v3547_v53  ;;  %v1393_v54 = vpop.permute.xlu1 %1392 }
 0x116   : > { %v3493_v63 = vpop.eup %3492  ;;  %v1199_v0 = vmul.f32 %v3491_v61, %v3835_v2  ;;  %3500 = vrcp.f32 %v1178_v58  ;;  %v3882_v2 = vld [vmem:[%s4384_s25 + $0x8] sm:$0xff]  ;;  %v1391_v58 = vpop.permute.xlu0 %1390 }
 0x117   : > { %v1198_v57 = vmul.f32 %v3493_v63, %v3837_v3  ;;  %3158 = vmatprep.mubr.msk.f32.mxu0 %vm1260_vm2, %v1244_v62  ;;  %v3377_v1 = vpack.c.bf16 %v1245_v59, %v1244_v62 }
 0x118   : > { %v1247_v4 = vmul.f32 %v3862_v60, %v1199_v0  ;;  %3159 = vmatmul.mubr.msk.f32.vlgmr.msra.gmra.mrb[8].mxu0 %vm1260_vm2, %v1245_v59 }
 0x119   : > { %v3495_v5 = vpop.eup %3494  ;;  %v1246_v6 = vmul.f32 %v3855_v47, %v1198_v57  ;;  %3185 = vmatpush3.msra.mxu0 %v3820_v46  ;;  %3186 = vmatprep.mubr.msk.f32.mxu0 %vm1422_vm3, %v3869_v56  ;;  %v1397_v61 = vpop.permute.xlu1 %1396 }
 0x11a   : > { %v3497_v3 = vpop.eup %3496  ;;  %v1201_v7 = vmul.f32 %v3495_v5, %v3841_v15  ;;  %3376 = vmatprep.subr.bf16.mxu0 %v4365_v10  ;;  %v1395_v0 = vpop.permute.xlu0 %1394 }
 0x11b   : > { %v1200_v11 = vmul.f32 %v3497_v3, %v3843_v17  ;;  %3161 = vmatprep.mubr.msk.f32.mxu1 %vm1260_vm2, %v1246_v6  ;;  %v3380_v12 = vpack.c.bf16 %v1247_v4, %v1246_v6 }
 0x11c   : > { %v1249_v21 = vmul.f32 %v3885_v8, %v1201_v7  ;;  %3162 = vmatmul.mubr.msk.f32.vlgmr.msra.gmra.mrb[8].mxu1 %vm1260_vm2, %v1247_v4  ;;  %3187 = vmatmul.mubr.msk.f32.vlgmr.msra.gmra.mrb[10].mxu0 %vm1422_vm3, %v3882_v2 }
 0x11d   : > { %v3499_v15 = vpop.eup %3498  ;;  %v1248_v17 = vmul.f32 %v3895_v19, %v1200_v11  ;;  %3378 = vmatpush3.bf16.msra.mxu0 %v3377_v1  ;;  %3171 = vmatpush3.msra.mxu1 %v3820_v46  ;;  %v1401_v11 = vpop.permute.xlu1 %1400 }
 0x11e   : > { %v1203_v24 = vmul.f32 %v3499_v15, %v3847_v27  ;;  %3379 = vmatprep.subr.bf16.mxu0 %v4365_v10  ;;  %3189 = vmatprep.mubr.msk.f32.mxu0 %vm1422_vm3, %v3893_v18 }
 0x11f   : > { %3164 = vmatprep.mubr.msk.f32.mxu1 %vm1260_vm2, %v1248_v17  ;;  %v3383_v30 = vpack.c.bf16 %v1249_v21, %v1248_v17  ;;  %3364 = vmatprep.subr.bf16.mxu1 %v4365_v10 }
 0x120   : > { %v3501_v32 = vpop.eup %3500  ;;  %3165 = vmatmul.mubr.msk.f32.gmra.mrb[10].mxu1 %vm1260_vm2, %v1249_v21  ;;  %3190 = vmatmul.mubr.msk.f32.gmra.mrb[12].mxu0 %vm1422_vm3, %v3906_v23  ;;  %v1251_v34 = vmul.f32 %v3919_v33, %v1203_v24 }
 0x121   : > { %v1202_v27 = vmul.f32 %v3501_v32, %v3849_v29  ;;  %3381 = vmatpush3.bf16.msra.mxu0 %v3380_v12  ;;  %3192 = vmatprep.mubr.msk.f32.mxu0 %vm1422_vm3, %v3915_v25  ;;  %v3940_v29 = vld [vmem:[%s4388_s1] sm:$0xff]  ;;  %v1399_v12 = vpop.permute.xlu0 %1398 }
 0x122   : > { %3382 = vmatprep.subr.bf16.mxu0 %v4365_v10 }
 0x123   : > { %v1250_v37 = vmul.f32 %v3933_v36, %v1202_v27  ;;  %v1405_v27 = vpop.permute.xlu1 %1404 }
 0x124   : > { %3193 = vmatmul.mubr.msk.f32.gmra.mrb[14].mxu0 %vm1422_vm3, %v3931_v35 }
 0x125   : > { %3167 = vmatprep.mubr.msk.f32.mxu1 %vm1260_vm2, %v1250_v37  ;;  %3384 = vmatpush3.bf16.msra.mxu0 %v3383_v30  ;;  %v3386_v39 = vpack.c.bf16 %v1251_v34, %v1250_v37  ;;  %v1403_v37 = vpop.permute.xlu0 %1402 }
 0x126   : > { %3168 = vmatmul.mubr.msk.f32.gmra.mrb[12].mxu1 %vm1260_vm2, %v1251_v34  ;;  %3385 = vmatprep.subr.bf16.mxu0 %v4365_v10 }
 0x127   : > { %3172 = vmatprep.mubr.msk.f32.mxu1 %vm1422_vm3, %v3940_v29  ;;  %3195 = vmatprep.mubr.msk.f32.mxu0 %vm1422_vm3, %v3947_v38 }
 0x128   : > { %3196 = vmatmul.mubr.msk.f32.gmra.mrb[16].mxu0 %vm1422_vm3, %v3953_v40 }
 0x129   : > { %3387 = vmatpush3.bf16.msra.mxu0 %v3386_v39  ;;  %3233 = vmatprep.mubr.msk.f32.mxu0 %vm3545_vm4, %v4363_v43 }
 0x12a   : > { %3173 = vmatmul.mubr.msk.f32.vlgmr.msra.gmra.mrb[14].mxu1 %vm1422_vm3, %v3962_v41  ;;  %3400 = vmatprep.subr.bf16.mxu0 %v4365_v10 }
 0x12b   : > { %3175 = vmatprep.mubr.msk.f32.mxu1 %vm1422_vm3, %v3969_v42 }
 0x12c   : > { %3234 = vmatmul.mubr.msk.f32.vlgmr.msra.gmra.mrb[18].mxu0 %vm1260_vm2, %v3978_v45 }
 0x12d   : > { %3263 = vmatprep.mubr.msk.f32.mxu0 %vm3545_vm4, %v4363_v43 }
 0x12e   : > { %3176 = vmatmul.mubr.msk.f32.gmra.mrb[16].mxu1 %vm1422_vm3, %v3988_v48 }
 0x12f   : > { %3178 = vmatprep.mubr.msk.f32.mxu1 %vm1422_vm3, %v3993_v49 }
 0x132   : > { %3179 = vmatmul.mubr.msk.f32.gmra.mrb[18].mxu1 %vm1422_vm3, %v4006_v50 }
 0x133   : > { %3181 = vmatprep.mubr.msk.f32.mxu1 %vm1422_vm3, %v4011_v51 }
 0x136   : > { %3182 = vmatmul.mubr.msk.f32.gmra.mrb[20].mxu1 %vm1422_vm3, %v4020_v52 }
 0x137   : > { %3214 = vmatprep.mubr.msk.f32.mxu1 %vm3545_vm4, %v4363_v43 }
 0x1eb   : > { %v4026_v59 = vpop.f32.mrb[8].mxu0 }
 0x1ec   : > { %v1415_v62 = vmul.f32 %v4026_v59, %v1393_v54  ;;  %v4029_v63 = vpop.f32.mrb[9].mxu0 }
 0x1ed   : > { %v1414_v57 = vmul.f32 %v1391_v58, %v4029_v63 }
 0x1ee   : > { %1696 = vperm.xlu1 %3466, %v1415_v62  }
 0x1ef   : > { %v4032_v1 = vpop.f32.mrb[8].mxu1  ;;  %1691 = vperm.xlu0 %3467, %v1414_v57   ;;  %v4034_v4 = vpop.f32.mrb[10].mxu0 }
 0x1f0   : > { %v1417_v5 = vmul.f32 %v4032_v1, %v1397_v61  ;;  %v4037_v6 = vpop.f32.mrb[9].mxu1  ;;  %v4039_v3 = vpop.f32.mrb[11].mxu0 }
 0x1f1   : > { %v1416_v7 = vmul.f32 %v1395_v0, %v4037_v6 }
 0x1f3   : > { %v4042_v21 = vpop.f32.mrb[10].mxu1  ;;  %1701 = vperm.xlu1 %3466, %v1416_v7   ;;  %1706 = vperm.xlu0 %3467, %v1417_v5   ;;  %v4044_v15 = vpop.f32.mrb[12].mxu0 }
 0x1f4   : > { %v1419_v17 = vmul.f32 %v4042_v21, %v1401_v11  ;;  %v4047_v24 = vpop.f32.mrb[11].mxu1  ;;  %v1652_v30 = vpop.f32.mrb[13].mxu0 }
 0x1f5   : > { %v1418_v32 = vmul.f32 %v1399_v12, %v4047_v24 }
 0x1f7   : > { %1711 = vperm.xlu1 %3466, %v1418_v32   ;;  %1716 = vperm.xlu0 %3467, %v1419_v17   ;;  %v4050_v34 = vpop.f32.mrb[14].mxu0 }
 0x1f8   : > { %v1662_v39 = vpop.f32.mrb[15].mxu0 }
 0x1f9   : > { %v4052_v53 = vpop.f32.mrb[12].mxu1 }
 0x1fa   : > { %v1421_v54 = vmul.f32 %v4052_v53, %v1405_v27  ;;  %v4055_v58 = vpop.f32.mrb[13].mxu1 }
 0x1fb   : > { %v1420_v61 = vmul.f32 %v1403_v37, %v4055_v58  ;;  %v4058_v62 = vpop.f32.mrb[16].mxu0 }
 0x1fc   : > { %1726 = vperm.xlu0 %3467, %v1421_v54   ;;  %v4060_v0 = vpop.f32.mrb[17].mxu0 }
 0x1fd   : > { %1721 = vperm.xlu1 %3466, %v1420_v61   ;;  %v3174_v57 = vpop.f32.mrb[14].mxu1 }
 0x1fe   : > { %v1682_v5 = vsub.f32 %v3174_v57, %v4034_v4  ;;  %v1513_v7 = vpop.f32.mrb[15].mxu1 }
 0x1ff   : > { %v1681_v11 = vsub.f32 %v1513_v7, %v4039_v3  ;;  %v1887_v3 = vld [vmem:[%s4351_s14] sm:$0xff] }
 0x200   : > { %3469 = vset.pattern.permute.xlu0 %v3542_v9  ;;  %v4087_v7 = vld [vmem:[%s786_s6] sm:$0xff] }
 0x201   : > { %v3177_v12 = vpop.f32.mrb[16].mxu1  ;;  %3468 = vset.pattern.permute.xlu1 %v3542_v9  ;;  %v1888_v9 = vld [vmem:[%s4351_s14 + $0x8] sm:$0xff] }
 0x202   : > { %v1684_v17 = vsub.f32 %v3177_v12, %v4044_v15  ;;  %v1523_v32 = vpop.f32.mrb[17].mxu1  ;;  %v841_v12 = vld [vmem:[%s804_s30] sm:$0xff]  ;;  %s813_s30 = scalar_lea.vmem %s4358_s21, %s3814_s26 }
 0x203   : > { %v1683_v27 = vsub.f32 %v1523_v32, %v1652_v30  ;;  %v3401_v30 = vpack.c.bf16 %v1888_v9, %v1887_v3  ;;  %v4394_v32 = vmov 0.0   ;;  %1812 = vperm.xlu1 %3468, %v841_v12  }
 0x205   : > { %v3180_v37 = vpop.f32.mrb[18].mxu1  ;;  %3402 = vmatpush3.bf16.msra.mxu0 %v3401_v30 }
 0x206   : > { %v1686_v54 = vsub.f32 %v3180_v37, %v4050_v34  ;;  %v1533_v43 = vpop.f32.mrb[19].mxu1  ;;  %v4391_v34 = vmov 0.0|0.0  }
 0x207   : > { %v1685_v61 = vsub.f32 %v1533_v43, %v1662_v39  ;;  %3403 = vmatprep.subr.bf16.mxu0 %v4391_v34  ;;  %v1890_v43 = vld [vmem:[%s4351_s14 + $0x18] sm:$0xff] }
 0x209   : > { %v3183_v10 = vpop.f32.mrb[20].mxu1 }
 0x20a   : > { %v1688_v4 = vsub.f32 %v3183_v10, %v4058_v62  ;;  %v1543_v57 = vpop.f32.mrb[21].mxu1  ;;  %v1889_v10 = vld [vmem:[%s4351_s14 + $0x10] sm:$0xff]  ;;  %v1883_v62 = vpop.f32.mrb[18].mxu0 }
 0x20b   : > { %v1687_v15 = vsub.f32 %v1543_v57, %v4060_v0  ;;  %v3404_v39 = vpack.c.bf16 %v1890_v43, %v1889_v10  ;;  %v3235_v0 = vpop.f32.mrb[19].mxu0 }
 0x20d   : > { %3405 = vmatpush3.bf16.msra.mxu0 %v3404_v39 }
 0x20e   : > { %3406 = vmatprep.subr.bf16.mxu0 %v4391_v34 }
 0x210   : > { %3264 = vmatmul.mubr.msk.f32.vlgmr.msra.gmra.mrb[20].mxu0 %vm1003_vm1, %v4087_v7 }
 0x211   : > { %3274 = vmatprep.mubr.msk.f32.mxu0 %vm3545_vm4, %v4394_v32 }
 0x26d   : > { %v1697_v37 = vpop.permute.xlu1 %1696 }
 0x26e   : > { %v1730_v57 = vmul.f32 %v1697_v37, %v1682_v5  ;;  %v1692_v3 = vpop.permute.xlu0 %1691 }
 0x26f   : > { %v1729_v9 = vmul.f32 %v1692_v3, %v1681_v11 }
 0x271   : > { %v3365_v30 = vpack.c.bf16 %v1730_v57, %v1729_v9  ;;  %v1898_v57 = vld [vmem:[%s4352_s15 + $0x38] sm:$0xff] }
 0x272   : > { %v1702_v10 = vpop.permute.xlu1 %1701  ;;  %v1707_v43 = vpop.permute.xlu0 %1706 }
 0x273   : > { %v1731_v39 = vmul.f32 %v1702_v10, %v1683_v27  ;;  %v1732_v0 = vmul.f32 %v1707_v43, %v1684_v17  ;;  %3366 = vmatpush3.bf16.msra.mxu1 %v3365_v30  ;;  %v1891_v17 = vld [vmem:[%s4352_s15] sm:$0xff]  ;;  %v2221_v43 = vld [vmem:[%s4355_s18 + $0x8] sm:$0xff] }
 0x274   : > { %3367 = vmatprep.subr.bf16.mxu1 %v4391_v34  ;;  %v2220_v10 = vld [vmem:[%s4355_s18] sm:$0xff] }
 0x275   : > { %v3368_v40 = vpack.c.bf16 %v1732_v0, %v1731_v39  ;;  %v3413_v39 = vpack.c.bf16 %v2221_v43, %v2220_v10  ;;  %v2143_v0 = vld [vmem:[%s4354_s17] sm:$0xff] }
 0x276   : > { %v1712_v38 = vpop.permute.xlu1 %1711  ;;  %v1717_v35 = vpop.permute.xlu0 %1716 }
 0x277   : > { %v1733_v25 = vmul.f32 %v1712_v38, %v1685_v61  ;;  %v1734_v23 = vmul.f32 %v1717_v35, %v1686_v54  ;;  %3369 = vmatpush3.bf16.msra.mxu1 %v3368_v40  ;;  %v1892_v38 = vld [vmem:[%s4352_s15 + $0x8] sm:$0xff]  ;;  %v1895_v61 = vld [vmem:[%s4352_s15 + $0x20] sm:$0xff] }
 0x278   : > { %3370 = vmatprep.subr.bf16.mxu1 %v4391_v34  ;;  %v3389_v40 = vpack.c.bf16 %v1892_v38, %v1891_v17  ;;  %v2512_v38 = vld [vmem:[%s4356_s19] sm:$0xff] }
 0x279   : > { %v3371_v12 = vpack.c.bf16 %v1734_v23, %v1733_v25  ;;  %v1893_v23 = vld [vmem:[%s4352_s15 + $0x10] sm:$0xff]  ;;  %v1894_v25 = vld [vmem:[%s4352_s15 + $0x18] sm:$0xff] }
 0x27a   : > { %v3392_v54 = vpack.c.bf16 %v1894_v25, %v1893_v23 }
 0x27b   : > { %v1727_v5 = vpop.permute.xlu0 %1726  ;;  %3372 = vmatpush3.bf16.msra.mxu1 %v3371_v12  ;;  %v2222_v12 = vld [vmem:[%s4355_s18 + $0x10] sm:$0xff] }
 0x27c   : > { %v1722_v11 = vpop.permute.xlu1 %1721  ;;  %v1736_v37 = vmul.f32 %v1727_v5, %v1688_v4  ;;  %3373 = vmatprep.subr.bf16.mxu1 %v4391_v34  ;;  %v1896_v4 = vld [vmem:[%s4352_s15 + $0x28] sm:$0xff]  ;;  %v2223_v5 = vld [vmem:[%s4355_s18 + $0x18] sm:$0xff] }
 0x27d   : > { %v1735_v27 = vmul.f32 %v1722_v11, %v1687_v15  ;;  %v3395_v15 = vpack.c.bf16 %v1896_v4, %v1895_v61  ;;  %v3416_v11 = vpack.c.bf16 %v2223_v5, %v2222_v12 }
 0x27f   : > { %v3374_v35 = vpack.c.bf16 %v1736_v37, %v1735_v27  ;;  %v2145_v37 = vld [vmem:[%s4354_s17 + $0x10] sm:$0xff]  ;;  %v2146_v27 = vld [vmem:[%s4354_s17 + $0x18] sm:$0xff] }
 0x280   : > { %v3410_v17 = vpack.c.bf16 %v2146_v27, %v2145_v37 }
 0x281   : > { %3375 = vmatpush3.bf16.msra.mxu1 %v3374_v35  ;;  %v2513_v35 = vld [vmem:[%s4356_s19 + $0x8] sm:$0xff] }
 0x282   : > { %3388 = vmatprep.subr.bf16.mxu1 %v4391_v34 }
 0x284   : > { %3215 = vmatmul.mubr.msk.f32.vlgmr.msra.gmra.mrb[22].mxu1 %vm1260_vm2, %v3978_v45  ;;  %v1897_v45 = vld [vmem:[%s4352_s15 + $0x30] sm:$0xff] }
 0x285   : > { %3390 = vmatpush3.bf16.msra.mxu1 %v3389_v40  ;;  %3252 = vmatprep.mubr.msk.f32.mxu1 %vm3545_vm4, %v4394_v32  ;;  %v3398_v3 = vpack.c.bf16 %v1898_v57, %v1897_v45  ;;  %v2936_v40 = vld [vmem:[%s4350_s13] ss:$0 sm:$0xff] }
 0x286   : > { %3391 = vmatprep.subr.bf16.mxu1 %v4391_v34  ;;  %v2063_v23 = vadd.f32 %v2936_v40, %v4029_v63  ;;  %v4182_v61 = vadd.f32 %v2936_v40, %v4037_v6  ;;  %v4190_v57 = vadd.f32 %v2936_v40, %v4047_v24  ;;  %v4202_v24 = vadd.f32 %v4052_v53, %v2936_v40 }
 0x288   : > { %v2937_v25 = vmul.f32 -1.442695, %v2063_v23  ;;  %v2939_v45 = vmul.f32 -1.442695, %v4182_v61  ;;  %v2941_v6 = vmul.f32 -1.442695, %v4190_v57 }
 0x289   : > { %3393 = vmatpush3.bf16.msra.mxu1 %v3392_v54  ;;  %v4179_v54 = vadd.f32 %v4026_v59, %v2936_v40  ;;  %v4194_v59 = vadd.f32 %v4042_v21, %v2936_v40 }
 0x28a   : > { %3394 = vmatprep.subr.bf16.mxu1 %v4391_v34  ;;  %3502 = vpow2.f32 %v2937_v25 }
 0x28b   : > { %v2938_v4 = vmul.f32 -1.442695, %v4179_v54  ;;  %v2942_v10 = vmul.f32 -1.442695, %v4194_v59 }
 0x28d   : > { %3396 = vmatpush3.bf16.msra.mxu1 %v3395_v15  ;;  %v4186_v15 = vadd.f32 %v4032_v1, %v2936_v40  ;;  %3504 = vpow2.f32 %v2938_v4 }
 0x28e   : > { %3397 = vmatprep.subr.bf16.mxu1 %v4391_v34  ;;  %3506 = vpow2.f32 %v2939_v45  ;;  %v2935_v45 = vld [vmem:[%s4353_s16] ss:$0 sm:$0xff] }
 0x28f   : > { %v2940_v63 = vmul.f32 -1.442695, %v4186_v15 }
 0x291   : > { %3399 = vmatpush3.bf16.msra.mxu1 %v3398_v3  ;;  %v4198_v3 = vadd.f32 %v2936_v40, %v4055_v58  ;;  %3508 = vpow2.f32 %v2940_v63  ;;  %v2944_v58 = vmul.f32 -1.442695, %v4202_v24 }
 0x292   : > { %3412 = vmatprep.subr.bf16.mxu1 %v4391_v34  ;;  %3510 = vpow2.f32 %v2941_v6 }
 0x293   : > { %v2943_v43 = vmul.f32 -1.442695, %v4198_v3  ;;  %3512 = vpow2.f32 %v2942_v10 }
 0x294   : > { %3253 = vmatmul.mubr.msk.f32.vlgmr.msra.gmra.mrb[24].mxu1 %vm1260_vm2, %v1883_v62  ;;  %v2144_v62 = vld [vmem:[%s4354_s17 + $0x8] sm:$0xff]  ;;  %v3503_v1 = vpop.eup %3502 }
 0x295   : > { %3285 = vmatprep.mubr.msk.f32.mxu1 %vm3545_vm4, %v4394_v32  ;;  %v3407_v32 = vpack.c.bf16 %v2144_v62, %v2143_v0  ;;  %3414 = vmatpush3.bf16.msra.mxu1 %v3413_v39  ;;  %v2095_v21 = vadd.f32 1.0, %v3503_v1  ;;  %3514 = vpow2.f32 %v2943_v43 }
 0x296   : > { %3415 = vmatprep.subr.bf16.mxu1 %v4391_v34 }
 0x297   : > { %3408 = vmatpush3.bf16.msra.mxu0 %v3407_v32  ;;  %v3505_v53 = vpop.eup %3504  ;;  %3516 = vrcp.f32 %v2095_v21 }
 0x298   : > { %3409 = vmatprep.subr.bf16.mxu0 %v4391_v34  ;;  %v4171_v34 = vpack.c.bf16 %v2513_v35, %v2512_v38  ;;  %v3507_v12 = vpop.eup %3506  ;;  %3518 = vpow2.f32 %v2944_v58  ;;  %v2096_v5 = vadd.f32 1.0, %v3505_v53  ;;  %v2515_v53 = vld [vmem:[%s4356_s19 + $0x18] sm:$0xff] }
 0x299   : > { %3417 = vmatpush3.bf16.msra.mxu1 %v3416_v11  ;;  %v2097_v37 = vadd.f32 1.0, %v3507_v12 }
 0x29a   : > { %3419 = vmatprep.subr.bf16.mxu1 %v4171_v34  ;;  %3520 = vrcp.f32 %v2096_v5 }
 0x29b   : > { %3411 = vmatpush3.bf16.msra.mxu0 %v3410_v17  ;;  %v3509_v11 = vpop.eup %3508  ;;  %3522 = vrcp.f32 %v2097_v37 }
 0x29c   : > { %v3511_v27 = vpop.eup %3510  ;;  %v2098_v17 = vadd.f32 1.0, %v3509_v11 }
 0x29d   : > { %v3513_v38 = vpop.eup %3512  ;;  %v2099_v35 = vadd.f32 1.0, %v3511_v27 }
 0x29e   : > { %3524 = vrcp.f32 %v2098_v17  ;;  %v2100_v4 = vadd.f32 1.0, %v3513_v38 }
 0x29f   : > { %v3515_v40 = vpop.eup %3514  ;;  %3526 = vrcp.f32 %v2099_v35 }
 0x2a0   : > { %v2101_v6 = vadd.f32 1.0, %v3515_v40  ;;  %3528 = vrcp.f32 %v2100_v4 }
 0x2a1   : > { %v3517_v25 = vpop.eup %3516 }
 0x2a2   : > { %v3519_v63 = vpop.eup %3518  ;;  %v2119_v43 = vmul.f32 %v3517_v25, %v2063_v23  ;;  %3530 = vrcp.f32 %v2101_v6 }
 0x2a3   : > { %v2102_v21 = vadd.f32 1.0, %v3519_v63 }
 0x2a4   : > { %v2127_v58 = vadd.f32 %v2119_v43, %v3718_v13  ;;  %v4395_v43 = vld [vmem:[#allocation2_spill] sm:$0xff] }
 0x2a5   : > { %3532 = vrcp.f32 %v2102_v21 }
 0x2a6   : > { %v2135_v27 = vmul.f32 %v2127_v58, %v3853_v44 }
 0x2e3   : > { %v4137_v9 = vpop.f32.mrb[20].mxu0 }
 0x2e4   : > { %v3265_v30 = vpop.f32.mrb[21].mxu0 }
 0x2e5   : > { %v1813_v30 = vpop.permute.xlu1 %1812 }
 0x357   : > { %v1806_v39 = vpop.f32.mrb[22].mxu1 }
 0x358   : > { %v1815_v0 = vmul.f32 %v1813_v30, %v1806_v39  ;;  %v3216_v62 = vpop.f32.mrb[23].mxu1 }
 0x359   : > { %v3521_v62 = vpop.eup %3520 }
 0x35a   : > { %v1816_v32 = vadd.f32 %v1815_v0, %v3820_v46  ;;  %v3523_v12 = vpop.eup %3522  ;;  %v2120_v23 = vmul.f32 %v3521_v62, %v4179_v54 }
 0x35b   : > { %v3525_v11 = vpop.eup %3524  ;;  %v2121_v37 = vmul.f32 %v3523_v12, %v4182_v61 }
 0x35c   : > { %2678 = vst.msk [vmem:[%s817_s29] sm:$0xff] %vm2677_vm5, %v1816_v32  ;;  %v2514_v32 = vld [vmem:[%s4356_s19 + $0x10] sm:$0xff]  ;;  %v3527_v17 = vpop.eup %3526  ;;  %v2122_v54 = vmul.f32 %v3525_v11, %v4186_v15 }
 0x35d   : > { %v3422_v13 = vpack.c.bf16 %v2515_v53, %v2514_v32  ;;  %v3529_v61 = vpop.eup %3528  ;;  %v2123_v38 = vmul.f32 %v3527_v17, %v4190_v57 }
 0x35e   : > { %v3531_v35 = vpop.eup %3530  ;;  %v2124_v25 = vmul.f32 %v3529_v61, %v4194_v59 }
 0x35f   : > { %v2131_v15 = vadd.f32 %v2123_v38, %v3755_v22  ;;  %v2125_v4 = vmul.f32 %v3531_v35, %v4198_v3 }
 0x361   : > { %v2139_v59 = vmul.f32 %v2131_v15, %v3895_v19 }
 0x367   : > { %v1968_v46 = vpop.f32.mrb[24].mxu1 }
 0x368   : > { %v2042_v1 = vadd.f32 %v4137_v9, %v1968_v46  ;;  %v3254_v10 = vpop.f32.mrb[25].mxu1 }
 0x36a   : > { %v2052_v39 = vadd.f32 %v2935_v45, %v2042_v1 }
 0x36c   : > { %v2053_v0 = vmax.f32 %v2052_v39, 0.0  ;;  %v4399_v39 = vld [vmem:[#allocation6_spill] sm:$0xff] }
 0x36e   : > { %v2054_v9 = vadd.f32 %v2053_v0, %v4087_v7  ;;  %v2128_v7 = vadd.f32 %v2120_v23, %v3722_v14  ;;  %v3533_v14 = vpop.eup %3532  ;;  %v2971_v0 = vld [vmem:[%s4357_s20] ss:$0 sm:$0xff] }
 0x36f   : > { %v2126_v57 = vmul.f32 %v3533_v14, %v4202_v24 }
 0x370   : > { %v2055_v5 = vmul.f32 %v2054_v9, %v1813_v30  ;;  %v2129_v30 = vadd.f32 %v2121_v37, %v3735_v16  ;;  %v2136_v40 = vmul.f32 %v2128_v7, %v3859_v55  ;;  %v2132_v16 = vadd.f32 %v2124_v25, %v3768_v26 }
 0x371   : > { %v2134_v22 = vadd.f32 %v2126_v57, %v3783_v31 }
 0x372   : > { %2676 = vst.msk [vmem:[%s813_s30] sm:$0xff] %vm1003_vm1, %v2055_v5  ;;  %3275 = vmatmul.mubr.msk.f32.vlgmr.msra.gmra.mrb[22].mxu0 %vm1003_vm1, %v2055_v5  ;;  %3286 = vmatmul.mubr.msk.f32.vlgmr.msra.gmra.mrb[26].mxu1 %vm1003_vm1, %v2055_v5  ;;  %v2140_v3 = vmul.f32 %v2132_v16, %v3885_v8 }
 0x373   : > { %3421 = vmatpush3.bf16.msra.mxu1 %v4171_v34  ;;  %3324 = vmatprep.mubr.msk.f32.mxu1 %vm1003_vm1, %v2135_v27  ;;  %v2130_v34 = vadd.f32 %v2122_v54, %v3750_v20  ;;  %v2133_v20 = vadd.f32 %v2125_v4, %v3773_v28  ;;  %v2142_v26 = vmul.f32 %v2134_v22, %v3919_v33 }
 0x374   : > { %3423 = vmatprep.subr.bf16.mxu1 %v3422_v13  ;;  %3290 = vmatprep.mubr.msk.f32.mxu0 %vm1422_vm3, %v3940_v29  ;;  %v2137_v29 = vmul.f32 %v2129_v30, %v3855_v47 }
 0x375   : > { %v2138_v46 = vmul.f32 %v2130_v34, %v3862_v60  ;;  %v2141_v45 = vmul.f32 %v2133_v20, %v3933_v36 }
 0x377   : > { %3425 = vmatpush3.bf16.msra.mxu1 %v3422_v13 }
 0x37a   : > { %3325 = vmatmul.mubr.msk.f32.vlgmr.msra.gmra.mrb[28].mxu1 %vm1003_vm1, %v2136_v40 }
 0x37b   : > { %3327 = vmatprep.mubr.msk.f32.mxu1 %vm1003_vm1, %v2137_v29 }
 0x37e   : > { %3328 = vmatmul.mubr.msk.f32.gmra.mrb[30].mxu1 %vm1003_vm1, %v2138_v46 }
 0x37f   : > { %3330 = vmatprep.mubr.msk.f32.mxu1 %vm1003_vm1, %v2139_v59 }
 0x382   : > { %3331 = vmatmul.mubr.msk.f32.gmra.mrb[32].mxu1 %vm1003_vm1, %v2140_v3 }
 0x383   : > { %3333 = vmatprep.mubr.msk.f32.mxu1 %vm1003_vm1, %v2141_v45 }
 0x386   : > { %3334 = vmatmul.mubr.msk.f32.gmra.mrb[34].mxu1 %vm1003_vm1, %v2142_v26 }
 0x445   : > { %v2216_v28 = vpop.f32.mrb[22].mxu0  ;;  %v2290_v24 = vpop.f32.mrb[26].mxu1 }
 0x446   : > { %v3276_v63 = vpop.f32.mrb[23].mxu0  ;;  %v3287_v6 = vpop.f32.mrb[27].mxu1  ;;  %3288 = vmatprep.subr.mxu0 %v2290_v24 }
 0x447   : > { %3289 = vmatpush3.msra.mxu0 %v2290_v24 }
 0x448   : > { %3291 = vmatmul.mubr.msk.f32.vlgmr.msra.gmra.mrb[24].mxu0 %vm1422_vm3, %v3962_v41  ;;  %3302 = vmatprep.subr.mxu0 %v2216_v28 }
 0x449   : > { %3303 = vmatpush3.msra.mxu0 %v2216_v28  ;;  %3293 = vmatprep.mubr.msk.f32.mxu0 %vm1422_vm3, %v3969_v42 }
 0x44c   : > { %3294 = vmatmul.mubr.msk.f32.gmra.mrb[26].mxu0 %vm1422_vm3, %v3988_v48 }
 0x44d   : > { %v3326_v31 = vpop.f32.mrb[28].mxu1  ;;  %3296 = vmatprep.mubr.msk.f32.mxu0 %vm1422_vm3, %v3993_v49 }
 0x44e   : > { %v2606_v1 = vpop.f32.mrb[29].mxu1 }
 0x450   : > { %3297 = vmatmul.mubr.msk.f32.gmra.mrb[28].mxu0 %vm1422_vm3, %v4006_v50 }
 0x451   : > { %v3329_v10 = vpop.f32.mrb[30].mxu1  ;;  %3299 = vmatprep.mubr.msk.f32.mxu0 %vm1422_vm3, %v4011_v51  ;;  %v4396_v51 = vld [vmem:[#allocation3_spill] sm:$0xff] }
 0x452   : > { %v2616_v41 = vpop.f32.mrb[31].mxu1 }
 0x454   : > { %3300 = vmatmul.mubr.msk.f32.gmra.mrb[30].mxu0 %vm1422_vm3, %v4020_v52  ;;  %v4397_v52 = vld [vmem:[#allocation4_spill] sm:$0xff] }
 0x455   : > { %v3332_v42 = vpop.f32.mrb[32].mxu1  ;;  %3304 = vmatprep.mubr.msk.f32.mxu0 %vm1422_vm3, %v3869_v56  ;;  %v4398_v56 = vld [vmem:[#allocation5_spill] sm:$0xff] }
 0x456   : > { %v2626_v48 = vpop.f32.mrb[33].mxu1 }
 0x458   : > { %3305 = vmatmul.mubr.msk.f32.vlgmr.msra.gmra.mrb[24].mxu0 %vm1422_vm3, %v3882_v2 }
 0x459   : > { %v3335_v49 = vpop.f32.mrb[34].mxu1  ;;  %3307 = vmatprep.mubr.msk.f32.mxu0 %vm1422_vm3, %v3893_v18 }
 0x45a   : > { %v2636_v50 = vpop.f32.mrb[35].mxu1 }
 0x45c   : > { %3308 = vmatmul.mubr.msk.f32.gmra.mrb[26].mxu0 %vm1422_vm3, %v4395_v43 }
 0x45d   : > { %3310 = vmatprep.mubr.msk.f32.mxu0 %vm1422_vm3, %v4396_v51 }
 0x460   : > { %3311 = vmatmul.mubr.msk.f32.gmra.mrb[28].mxu0 %vm1422_vm3, %v4397_v52 }
 0x461   : > { %3313 = vmatprep.mubr.msk.f32.mxu0 %vm1422_vm3, %v4398_v56 }
 0x464   : > { %3314 = vmatmul.mubr.msk.f32.gmra.mrb[30].mxu0 %vm1422_vm3, %v4399_v39 }
 0x52b   : > { %v3306_v2 = vpop.f32.mrb[24].mxu0 }
 0x52c   : > { %v2505_v18 = vmul.f32 %v3306_v2, %v3859_v55  ;;  %v2465_v21 = vpop.f32.mrb[25].mxu0 }
 0x52d   : > { %v2504_v62 = vmul.f32 %v2465_v21, %v3853_v44 }
 0x52e   : > { %v2646_v58 = vadd.f32 %v3326_v31, %v2505_v18 }
 0x52f   : > { %v2645_v32 = vadd.f32 %v2606_v1, %v2504_v62  ;;  %v3309_v53 = vpop.f32.mrb[26].mxu0 }
 0x530   : > { %v2661_v12 = vadd.f32 %v2971_v0, %v2646_v58  ;;  %v2507_v9 = vmul.f32 %v3309_v53, %v3862_v60  ;;  %v2475_v23 = vpop.f32.mrb[27].mxu0 }
 0x531   : > { %v2660_v5 = vadd.f32 %v2971_v0, %v2645_v32  ;;  %v2506_v13 = vmul.f32 %v2475_v23, %v3855_v47 }
 0x532   : > { %v2669_v11 = vmul.f32 %v2661_v12, %v3859_v55  ;;  %v2648_v37 = vadd.f32 %v3329_v10, %v2507_v9 }
 0x533   : > { %v2668_v27 = vmul.f32 %v2660_v5, %v3853_v44  ;;  %v2647_v17 = vadd.f32 %v2616_v41, %v2506_v13  ;;  %v3312_v7 = vpop.f32.mrb[28].mxu0 }
 0x534   : > { %2680 = vst.msk [vmem:[%s4303_s5 + $0x8] sm:$0xff] %vm1003_vm1, %v2669_v11  ;;  %v2663_v54 = vadd.f32 %v2971_v0, %v2648_v37  ;;  %v2509_v61 = vmul.f32 %v3312_v7, %v3885_v8  ;;  %v2485_v30 = vpop.f32.mrb[29].mxu0 }
 0x535   : > { %2679 = vst.msk [vmem:[%s4303_s5] sm:$0xff] %vm1003_vm1, %v2668_v27  ;;  %v2662_v38 = vadd.f32 %v2971_v0, %v2647_v17  ;;  %v2508_v35 = vmul.f32 %v2485_v30, %v3895_v19 }
 0x536   : > { %v2671_v55 = vmul.f32 %v2663_v54, %v3862_v60  ;;  %v2650_v40 = vadd.f32 %v3332_v42, %v2509_v61 }
 0x537   : > { %v2670_v44 = vmul.f32 %v2662_v38, %v3855_v47  ;;  %v2649_v34 = vadd.f32 %v2626_v48, %v2508_v35  ;;  %v3315_v25 = vpop.f32.mrb[30].mxu0 }
 0x538   : > { %2682 = vst.msk [vmem:[%s4303_s5 + $0x18] sm:$0xff] %vm1003_vm1, %v2671_v55  ;;  %v2665_v14 = vadd.f32 %v2971_v0, %v2650_v40  ;;  %v2511_v15 = vmul.f32 %v3315_v25, %v3919_v33  ;;  %v2495_v4 = vpop.f32.mrb[31].mxu0 }
 0x539   : > { %2681 = vst.msk [vmem:[%s4303_s5 + $0x10] sm:$0xff] %vm1003_vm1, %v2670_v44  ;;  %v2664_v29 = vadd.f32 %v2971_v0, %v2649_v34  ;;  %v2510_v60 = vmul.f32 %v2495_v4, %v3933_v36 }
 0x53a   : > { %v2673_v16 = vmul.f32 %v2665_v14, %v3885_v8  ;;  %v2652_v57 = vadd.f32 %v3335_v49, %v2511_v15 }
 0x53b   : > { %v2672_v47 = vmul.f32 %v2664_v29, %v3895_v19  ;;  %v2651_v46 = vadd.f32 %v2636_v50, %v2510_v60 }
 0x53c   : > { %2684 = vst.msk [vmem:[%s4303_s5 + $0x28] sm:$0xff] %vm1003_vm1, %v2673_v16  ;;  %v2667_v20 = vadd.f32 %v2971_v0, %v2652_v57 }
 0x53d   : > { %2683 = vst.msk [vmem:[%s4303_s5 + $0x20] sm:$0xff] %vm1003_vm1, %v2672_v47  ;;  %v2666_v59 = vadd.f32 %v2971_v0, %v2651_v46 }
 0x53e   : > { %v2675_v22 = vmul.f32 %v2667_v20, %v3919_v33 }
 0x53f   : > { %v2674_v3 = vmul.f32 %v2666_v59, %v3933_v36 }
 0x540   : > { %2686 = vst.msk [vmem:[%s4303_s5 + $0x38] sm:$0xff] %vm1003_vm1, %v2675_v22 }
 0x541   : > { %2685 = vst.msk [vmem:[%s4303_s5 + $0x30] sm:$0xff] %vm1003_vm1, %v2674_v3 }
 0x542 PF: > { %s34_s4 = sadd.s32 1, %s3540_s4  }
 0x543   : > { %p31_p4 = scmp.ge.s32.totalorder %s34_s4, 4  }
 0x545   :  { %33 = sbr.rel (!%p31_p4) target bundleno = 9 (0x9), region = 173 }

// kernel: _lambda_.9
= control target key start
LH: loop header
LB: loop body
LE: loop exit
PB: predicated region body
PF: predicated region fallthrough
CT: control target
= control target key end

     0   :  { %s1015_s13 = smov 0   ;;  %s1113_s0 = inlined_call_operand.vmem [shape: f32[2,8,32], index: 0, kind: input, shape index: {}]   ;;  %s1114_s1 = inlined_call_operand.vmem [shape: f32[2,8,3], index: 1, kind: input, shape index: {}]   ;;  %s1115_s2 = inlined_call_operand.vmem [shape: f32[2,8,3], index: 2, kind: input, shape index: {}]   ;;  %s1116_s3 = inlined_call_operand.vmem [shape: f32[2,8,1], index: 3, kind: input, shape index: {}]   ;;  %s1117_s4 = inlined_call_operand.vmem [shape: f32[32,64], index: 4, kind: input, shape index: {}]   ;;  %s1118_s5 = inlined_call_operand.vmem [shape: f32[1,64], index: 5, kind: input, shape index: {}]   ;;  %s1119_s6 = inlined_call_operand.vmem [shape: f32[64,32], index: 6, kind: input, shape index: {}]   ;;  %s1120_s7 = inlined_call_operand.vmem [shape: f32[1,32], index: 7, kind: input, shape index: {}]   ;;  %s1121_s8 = inlined_call_operand.vmem [shape: f32[32,7], index: 8, kind: input, shape index: {}]   ;;  %s1122_s9 = inlined_call_operand.vmem [shape: f32[2,8,7], index: 9, kind: output, shape index: {0}]   ;;  %s1123_s10 = inlined_call_operand.vmem [shape: f32[2,8,3], index: 10, kind: output, shape index: {1}]  }
   0x1 LB: > { %s831_s14 = sadd.s32 4294967295, %s954_s13   ;;  %p835_p0 = scmp.ge.s32.totalorder %s954_s13, 1  ;;  %s954_s13 = sphi %s1015_s13, %s21_s13  }
   0x2   : > { %p341_p1 = scmp.lt.s32.totalorder %s954_s13, 3 }
   0x4   : > { %p342_p2 = pnand %p835_p0, %p341_p1 }
   0x5   : > { %v419_v0 = vld [vmem:[%s1117_s4] sm:$0xff] (!%p342_p2)  ;;  %v420_v1 = vld [vmem:[%s1117_s4 + $0x8] sm:$0xff] (!%p342_p2)  ;;  %v421_v2 = vld [vmem:[%s1117_s4 + $0x10] sm:$0xff] (!%p342_p2)  ;;  %v956_v3 = vmov (!%p342_p2), 0.0|0.0   ;;  %vm957_vm0 = vmmov (!%p342_p2), 0   ;;  %v958_v6 = vmov (!%p342_p2), 0.0  }
   0x6   : > { %345 = sbr.rel (%p342_p2) target bundleno = 664 (0x298), region = 56  ;;  %909 = vmatprep.subr.bf16.mxu0 (!%p342_p2), %v956_v3  ;;  %v910_v4 = vpack.c.bf16 (!%p342_p2), %v420_v1, %v419_v0  ;;  %v422_v5 = vld [vmem:[%s1117_s4 + $0x18] sm:$0xff] (!%p342_p2)  ;;  %876 = vmatprep.mubr.msk.f32.mxu0 (!%p342_p2), %vm957_vm0, %v958_v6  ;;  %p393_p3 = scmp.lt.s32.totalorder (!%p342_p2), %s831_s14, 1  ;;  %v505_v7 = vld [vmem:[%s1119_s6] sm:$0xff] (!%p342_p2)  ;;  %v506_v8 = vld [vmem:[%s1119_s6 + $0x8] sm:$0xff] (!%p342_p2)  ;;  %vm430_vm1 = vcmask (!%p342_p2), 261120  }
   0x7   : > { %915 = vmatprep.subr.bf16.mxu1 (!%p342_p2), %v956_v3  ;;  %v916_v9 = vpack.c.bf16 (!%p342_p2), %v506_v8, %v505_v7  ;;  %v507_v10 = vld [vmem:[%s1119_s6 + $0x10] sm:$0xff] (!%p342_p2)  ;;  %v508_v11 = vld [vmem:[%s1119_s6 + $0x18] sm:$0xff] (!%p342_p2)  ;;  %895 = vmatprep.mubr.msk.f32.mxu1 (!%p342_p2), %vm957_vm0, %v958_v6  ;;  %v913_v12 = vpack.c.bf16 (!%p342_p2), %v422_v5, %v421_v2  ;;  %v509_v14 = vld [vmem:[%s1119_s6 + $0x20] sm:$0xff] (!%p342_p2)  ;;  %vm520_vm2 = vcmask (!%p342_p2), 523264   ;;  %vm684_vm3 = vcmask (!%p342_p2), 7168  }
   0x8   : > { %911 = vmatpush3.bf16.msra.mxu0 (!%p342_p2), %v910_v4  ;;  %v919_v13 = vpack.c.bf16 (!%p342_p2), %v508_v11, %v507_v10  ;;  %v510_v15 = vld [vmem:[%s1119_s6 + $0x28] sm:$0xff] (!%p342_p2)  ;;  %v511_v18 = vld [vmem:[%s1119_s6 + $0x30] sm:$0xff] (!%p342_p2)  ;;  %v512_v19 = vld [vmem:[%s1119_s6 + $0x38] sm:$0xff] (!%p342_p2)  ;;  %v959_v32 = vmov (!%p342_p2), 0   ;;  %vm693_vm4 = vcmask (!%p342_p2), 23552   ;;  %vm678_vm5 = vcmask (!%p342_p2), 56320  }
   0x9   : > { %912 = vmatprep.subr.bf16.mxu0 (!%p342_p2), %v956_v3  ;;  %917 = vmatpush3.bf16.msra.mxu1 (!%p342_p2), %v916_v9  ;;  %v922_v17 = vpack.c.bf16 (!%p342_p2), %v510_v15, %v509_v14  ;;  %v925_v20 = vpack.c.bf16 (!%p342_p2), %v512_v19, %v511_v18  ;;  %v595_v21 = vld [vmem:[%s1121_s8] sm:$0xff] (!%p342_p2)  ;;  %v596_v22 = vld [vmem:[%s1121_s8 + $0x8] sm:$0xff] (!%p342_p2)  ;;  %v597_v29 = vld [vmem:[%s1121_s8 + $0x10] sm:$0xff] (!%p342_p2) }
   0xa   : > { %918 = vmatprep.subr.bf16.mxu1 (!%p342_p2), %v956_v3  ;;  %v928_v23 = vpack.c.bf16 (!%p342_p2), %v596_v22, %v595_v21  ;;  %v842_v24 = vld [vmem:[%s1118_s5] ss:$0 sm:$0xff] (!%p342_p2)  ;;  %v598_v30 = vld [vmem:[%s1121_s8 + $0x18] sm:$0xff] (!%p342_p2)  ;;  %945 = vset.pattern.permute.xlu0 (!%p342_p2), %v959_v32 }
   0xb   : > { %v931_v31 = vpack.c.bf16 (!%p342_p2), %v598_v30, %v597_v29  ;;  %v844_v42 = vld [vmem:[%s1120_s7] ss:$0 sm:$0xff] (!%p342_p2) }
   0xc   : > { %914 = vmatpush3.bf16.msra.mxu0 (!%p342_p2), %v913_v12 }
   0xd   : > { %s1125_s14 = smov (!%p393_p3, %s831_s14), 1  ;;  %920 = vmatpush3.bf16.msra.mxu1 %v919_v13  ;;  %927 = vmatprep.subr.bf16.mxu0 %v956_v3 }
   0xe   : > { %s1049_s11 = sshll.u32 %s1125_s14, 3  ;;  %921 = vmatprep.subr.bf16.mxu1 %v956_v3 }
   0xf   : > { %s396_s20 = scalar_lea.vmem %s1113_s0, %s1049_s11  ;;  %s408_s19 = scalar_lea.vmem %s1116_s3, %s1049_s11 }
  0x10   : > { %v418_v16 = vld [vmem:[%s396_s20] sm:$0xff]  ;;  %s400_s21 = scalar_lea.vmem %s1114_s1, %s1049_s11  ;;  %s404_s24 = scalar_lea.vmem %s1115_s2, %s1049_s11 }
  0x11   : > { %877 = vmatmul.mubr.msk.f32.vlgmr.msra.gmra.mrb[0].mxu0 %vm430_vm1, %v418_v16  ;;  %923 = vmatpush3.bf16.msra.mxu1 %v922_v17  ;;  %v417_v33 = vld [vmem:[%s408_s19] sm:$0xff]  ;;  %s416_s29 = scalar_lea.vmem %s1123_s10, %s1049_s11  ;;  %s412_s15 = scalar_lea.vmem %s1122_s9, %s1049_s11 }
  0x12   : > { %906 = vmatprep.mubr.msk.f32.mxu0 %vm957_vm0, %v958_v6  ;;  %924 = vmatprep.subr.bf16.mxu1 %v956_v3  ;;  %v685_v34 = vsel %vm684_vm3, %v417_v33, 0.0  ;;  %v680_v44 = vld [vmem:[%s400_s21] sm:$0xff] }
  0x13   : > { %929 = vmatpush3.bf16.msra.mxu0 %v928_v23  ;;  %674 = vperm.xlu0 %945, %v417_v33   ;;  %v686_v35 = vrot.slane %v685_v34, 4  ;;  %v681_v45 = vld [vmem:[%s404_s24] sm:$0xff] }
  0x14   : > { %930 = vmatprep.subr.bf16.mxu0 %v956_v3  ;;  %v682_v49 = vsub.f32 %v680_v44, %v681_v45 }
  0x15   : > { %926 = vmatpush3.bf16.msra.mxu1 %v925_v20  ;;  %v687_v36 = vadd.f32 %v686_v35, %v685_v34 }
  0x17   : > { %932 = vmatpush3.bf16.msra.mxu0 %v931_v31  ;;  %v688_v37 = vrot.slane %v687_v36, 2 }
  0x19   : > { %v689_v38 = vadd.f32 %v688_v37, %v687_v36 }
  0x1b   : > { %v690_v39 = vrot.slane %v689_v38, 1 }
  0x1d   : > { %v691_v40 = vadd.f32 %v690_v39, %v689_v38 }
  0x1f   : > { %v692_v41 = vmax.f32 %v691_v40, 1.0 }
  0x21   : > { %703 = vperm.xlu0 %945, %v692_v41  }
  0x92   : > { %v675_v50 = vpop.permute.xlu0 %674 }
  0x93   : > { %v683_v51 = vmul.f32 %v682_v49, %v675_v50 }
  0x95   : > { %v694_v52 = vsel %vm693_vm4, %v683_v51, 0.0 }
  0x96   : > { %v695_v53 = vrot.slane %v694_v52, 4 }
  0x98   : > { %v696_v54 = vadd.f32 %v695_v53, %v694_v52 }
  0x9a   : > { %v697_v55 = vrot.slane %v696_v54, 2 }
  0x9c   : > { %v698_v56 = vadd.f32 %v697_v55, %v696_v54 }
  0x9e   : > { %v699_v58 = vrot.slane %v698_v56, 1 }
  0xa0   : > { %v704_v57 = vpop.permute.xlu0 %703  ;;  %v700_v59 = vadd.f32 %v699_v58, %v698_v56 }
  0xa1   : > { %946 = vrcp.f32 %v704_v57 }
  0xab   : > { %v947_v60 = vpop.eup %946 }
  0xac   : > { %v707_v61 = vmul.f32 %v947_v60, %v700_v59 }
  0xae   : > { %v708_v62 = vmul.f32 %v707_v61, %v675_v50 }
  0xb0   : > { %v709_v63 = vsub.f32 %v683_v51, %v708_v62 }
  0xb2   : > { %710 = vst.msk [vmem:[%s416_s29] sm:$0xff] %vm693_vm4, %v709_v63 }
  0xe4   : > { %v500_v25 = vpop.f32.mrb[0].mxu0 }
  0xe5   : > { %v501_v26 = vadd.f32 %v842_v24, %v500_v25  ;;  %v878_v27 = vpop.f32.mrb[1].mxu0 }
  0xe7   : > { %v504_v28 = vmax.f32 %v501_v26, 0.0 }
  0xe9   : > { %896 = vmatmul.mubr.msk.f32.vlgmr.msra.gmra.mrb[0].mxu1 %vm520_vm2, %v504_v28 }
 0x1bc   : > { %v590_v43 = vpop.f32.mrb[0].mxu1 }
 0x1bd   : > { %v591_v46 = vadd.f32 %v844_v42, %v590_v43  ;;  %v897_v47 = vpop.f32.mrb[1].mxu1 }
 0x1bf   : > { %v594_v48 = vmax.f32 %v591_v46, 0.0 }
 0x1c1   : > { %907 = vmatmul.mubr.msk.f32.vlgmr.msra.gmra.mrb[2].mxu0 %vm430_vm1, %v594_v48 }
 0x294   : > { %v668_v0 = vpop.f32.mrb[2].mxu0 }
 0x295   : > { %v677_v1 = vmul.f32 %v675_v50, %v668_v0  ;;  %v908_v2 = vpop.f32.mrb[3].mxu0 }
 0x297   : > { %679 = vst.msk [vmem:[%s412_s15] sm:$0xff] %vm678_vm5, %v677_v1 }
 0x298 PF: > { %s21_s13 = sadd.s32 1, %s954_s13  }
 0x299   : > { %p18_p4 = scmp.ge.s32.totalorder %s21_s13, 4  }
 0x29b   :  { %20 = sbr.rel (!%p18_p4) target bundleno = 1 (0x1), region = 107 }

</bundles_post_ra>
